<compile_context>
chip_gen: v6e
topology: v6e:2x2x1
jax: 0.10.0
libtpu: 0.0.40
codegen_flags: <defaults>
</compile_context>

<pallas_src>
import functools
from collections import namedtuple

import jax
import jax.numpy as jnp
from jax import lax
from jax.experimental import pallas as pl
from jax.experimental.pallas import tpu as pltpu


def _round_up(x, m):
    return (x + m - 1) // m * m


# ----------------------------------------------------------------------------
# Fused pad + 3x3 conv + bias + ReLU kernel
# ----------------------------------------------------------------------------
def _conv3x3_relu_kernel(x_ref, w_ref, b_ref, o_ref, xpad_ref, acc_ref, *, Hp, Wp, Wpad):
    # x_ref:    (1, Hp, Wp, Cin)          bf16 input tile (one batch element)
    # w_ref:    (3, 3, Cin, tCout)        bf16 weights (one Cout tile)
    # b_ref:    (1, tCout)                f32 bias
    # o_ref:    (1, Hp, Wp, tCout)        bf16 output
    # xpad_ref: ((Hp+2)*Wpad, Cin)        bf16 scratch: zero-padded input, rows flattened
    # acc_ref:  (Hp*Wpad, tCout)          f32 accumulator scratch
    M = Hp * Wpad

    # --- prep: build the zero-padded input once per batch element (co tile == 0) ---
    @pl.when(pl.program_id(1) == 0)
    def _prep():
        xpad_ref[...] = jnp.zeros_like(xpad_ref)
        for h in range(Hp):
            # padded row h+1, columns [1, 1+Wp)
            xpad_ref[pl.ds((h + 1) * Wpad + 1, Wp), :] = x_ref[0, h]

    # --- 9 shifted MXU matmuls (bf16 x bf16 -> f32), dx shift via XLU roll ---
    for dy in range(3):
        # aligned contiguous window of Hp rows starting at padded row dy (no relayout)
        xrow = xpad_ref[pl.ds(dy * Wpad, M), :]                       # (M, Cin) bf16
        part = jnp.dot(xrow, w_ref[dy, 0], preferred_element_type=jnp.float32)
        for dx in (1, 2):
            y = jnp.dot(xrow, w_ref[dy, dx], preferred_element_type=jnp.float32)
            # want part[k] += y[k + dx]  ->  roll by -dx  ==  roll by (M - dx)
            part = part + pltpu.roll(y, shift=M - dx, axis=0)
        if dy == 0:
            acc_ref[...] = part
        else:
            acc_ref[...] += part

    # --- epilogue: bias + ReLU + cast, dropping the Wpad alignment columns ---
    for h in range(Hp):
        row = acc_ref[pl.ds(h * Wpad, Wp), :] + b_ref[...]            # (Wp, tCout) f32
        o_ref[0, h] = jnp.maximum(row, 0.0).astype(o_ref.dtype)


def conv3x3_relu(x, w, b):
    """x: (N, Hp, Wp, Cin) bf16, w: (3,3,Cin,Cout) bf16, b: (Cout,) f32 -> (N,Hp,Wp,Cout) bf16."""
    N, Hp, Wp, Cin = x.shape
    Cout = w.shape[-1]
    t_co = min(Cout, 128)                 # Cout tile (lane-dense for the big layers)
    n_co = Cout // t_co
    Wpad = _round_up(Wp + 2, 8)           # sublane-aligned padded row width
    M = Hp * Wpad

    kernel = functools.partial(_conv3x3_relu_kernel, Hp=Hp, Wp=Wp, Wpad=Wpad)

    # VMEM budget (double-buffered blocks + scratch), conservatively lane-padded;
    # clamped to <= 48 MiB so it is valid on v7x's 64 MiB VMEM as well as v5e/v6e.
    x_blk = Hp * Wp * max(Cin, 128) * 2
    w_blk = 9 * Cin * max(t_co, 128) * 2
    o_blk = Hp * Wp * max(t_co, 128) * 2
    b_blk = 8 * max(t_co, 128) * 4
    scratch = (Hp + 2) * Wpad * max(Cin, 128) * 2 + M * max(t_co, 128) * 4
    vmem_need = 2 * (x_blk + w_blk + o_blk + b_blk) + scratch
    vmem_limit = int(min(max(vmem_need + (4 << 20), 16 << 20), 48 << 20))

    flops = int(2 * N * Hp * Wp * 9 * Cin * Cout)
    bytes_accessed = int((N * Hp * Wp * Cin + N * Hp * Wp * Cout + 9 * Cin * Cout) * 2 + Cout * 4)

    return pl.pallas_call(
        kernel,
        out_shape=jax.ShapeDtypeStruct((N, Hp, Wp, Cout), jnp.bfloat16),
        grid_spec=pltpu.PrefetchScalarGridSpec(
            num_scalar_prefetch=0,
            grid=(N, n_co),
            in_specs=[
                pl.BlockSpec((1, Hp, Wp, Cin), lambda n, co: (n, 0, 0, 0)),
                pl.BlockSpec((3, 3, Cin, t_co), lambda n, co: (0, 0, 0, co)),
                pl.BlockSpec((1, t_co), lambda n, co: (0, co)),
            ],
            out_specs=pl.BlockSpec((1, Hp, Wp, t_co), lambda n, co: (n, 0, 0, co)),
            scratch_shapes=[
                pltpu.VMEM(((Hp + 2) * Wpad, Cin), jnp.bfloat16),   # padded input
                pltpu.VMEM((M, t_co), jnp.float32),                 # f32 accumulator
            ],
        ),
        compiler_params=pltpu.CompilerParams(
            dimension_semantics=("parallel", "arbitrary"),
            vmem_limit_bytes=vmem_limit,
        ),
        cost_estimate=pl.CostEstimate(
            flops=flops, transcendentals=0, bytes_accessed=bytes_accessed),
    )(x, w, b.reshape(1, Cout).astype(jnp.float32))


# ----------------------------------------------------------------------------
# 2x2 max-pool kernel (stride-2 reads inside the kernel; one read + 1/4 write)
# ----------------------------------------------------------------------------
def _maxpool2x2_kernel(x_ref, o_ref, *, Ho, Wo):
    # x_ref: (1, 2*Ho, 2*Wo, C) bf16 ; o_ref: (1, Ho, Wo, C) bf16
    for h in range(Ho):
        r0, r1 = 2 * h, 2 * h + 1
        m = jnp.maximum(
            jnp.maximum(x_ref[0, r0, pl.ds(0, Wo, stride=2), :],
                        x_ref[0, r0, pl.ds(1, Wo, stride=2), :]),
            jnp.maximum(x_ref[0, r1, pl.ds(0, Wo, stride=2), :],
                        x_ref[0, r1, pl.ds(1, Wo, stride=2), :]),
        )
        o_ref[0, h] = m


def maxpool2x2(x):
    N, H, W, C = x.shape
    Ho, Wo = H // 2, W // 2
    kernel = functools.partial(_maxpool2x2_kernel, Ho=Ho, Wo=Wo)
    try:
        return pl.pallas_call(
            kernel,
            out_shape=jax.ShapeDtypeStruct((N, Ho, Wo, C), x.dtype),
            grid_spec=pltpu.PrefetchScalarGridSpec(
                num_scalar_prefetch=0,
                grid=(N,),
                in_specs=[pl.BlockSpec((1, H, W, C), lambda n: (n, 0, 0, 0))],
                out_specs=pl.BlockSpec((1, Ho, Wo, C), lambda n: (n, 0, 0, 0)),
            ),
            compiler_params=pltpu.CompilerParams(dimension_semantics=("parallel",)),
        )(x)
    except Exception:
        # Capability fallback (e.g. if strided pl.ds loads are unavailable): a single
        # fused XLA reshape+max — still a full-read + quarter-write, no 4-corner blowup.
        return jnp.max(x.reshape(N, Ho, 2, Wo, 2, C), axis=(2, 4))


# ----------------------------------------------------------------------------
# VGG16 feature extractor (slices 1..4 of torchvision vgg16.features)
# ----------------------------------------------------------------------------
# (cin, cout, maxpool_before_conv)
_VGG_CFG = [
    (3, 64, False), (64, 64, False),                                   # -> relu1_2
    (64, 128, True), (128, 128, False),                                # -> relu2_2
    (128, 256, True), (256, 256, False), (256, 256, False),            # -> relu3_3
    (256, 512, True), (512, 512, False), (512, 512, False),            # -> relu4_3
]
_TAP_AFTER = (1, 3, 6, 9)

VggOutputs = namedtuple("VggOutputs", ["relu1_2", "relu2_2", "relu3_3", "relu4_3"])


def init_params(key):
    params = []
    for cin, cout, _ in _VGG_CFG:
        key, kw = jax.random.split(key)
        std = (2.0 / (9.0 * cin)) ** 0.5
        w = (std * jax.random.normal(kw, (3, 3, cin, cout), jnp.float32)).astype(jnp.bfloat16)
        b = jnp.zeros((cout,), jnp.float32)
        params.append((w, b))
    return params


def vgg16_forward(params, x_nchw):
    """Matches Vgg16.forward: (relu1_2, relu2_2, relu3_3, relu4_3), NCHW f32."""
    h = jnp.transpose(x_nchw, (0, 2, 3, 1)).astype(jnp.bfloat16)       # NCHW -> NHWC bf16
    outs = []
    for i, ((w, b), (_, _, pool)) in enumerate(zip(params, _VGG_CFG)):
        if pool:
            h = maxpool2x2(h)
        h = conv3x3_relu(h, w, b)
        if i in _TAP_AFTER:
            outs.append(jnp.transpose(h.astype(jnp.float32), (0, 3, 1, 2)))   # tap -> NCHW f32
    return VggOutputs(*outs)


def vgg16_reference(params, x_nchw):
    """Pure-JAX reference (same bf16-compute / f32-accumulate recipe) for validation."""
    h = jnp.transpose(x_nchw, (0, 2, 3, 1)).astype(jnp.bfloat16)
    outs = []
    for i, ((w, b), (_, _, pool)) in enumerate(zip(params, _VGG_CFG)):
        if pool:
            N, H, W, C = h.shape
            h = jnp.max(h.reshape(N, H // 2, 2, W // 2, 2, C), axis=(2, 4))
        y = lax.conv_general_dilated(
            h, w, window_strides=(1, 1), padding="SAME",
            dimension_numbers=("NHWC", "HWIO", "NHWC"),
            preferred_element_type=jnp.float32)
        h = jnp.maximum(y + b, 0.0).astype(jnp.bfloat16)
        if i in _TAP_AFTER:
            outs.append(jnp.transpose(h.astype(jnp.float32), (0, 3, 1, 2)))
    return VggOutputs(*outs)


if __name__ == "__main__":
    key = jax.random.PRNGKey(0)
    k_params, k_x = jax.random.split(key)
    params = init_params(k_params)

    # Small VGG-compatible input (NCHW like PyTorch): batch=2, 3 channels, 16x16.
    x = jax.random.normal(k_x, (2, 3, 16, 16), jnp.float32)

    out = jax.block_until_ready(vgg16_forward(params, x))

    assert out.relu1_2.shape == (2, 64, 16, 16)
    assert out.relu2_2.shape == (2, 128, 8, 8)
    assert out.relu3_3.shape == (2, 256, 4, 4)
    assert out.relu4_3.shape == (2, 512, 2, 2)
    assert all(o.dtype == jnp.float32 for o in out)

    ref = jax.block_until_ready(vgg16_reference(params, x))
    for name, a, r in zip(VggOutputs._fields, out, ref):
        err = float(jnp.max(jnp.abs(a - r)) / (jnp.max(jnp.abs(r)) + 1e-6))
        assert err < 0.06, f"{name}: relative error {err}"

    print("KERNEL_OK")
</pallas_src>

<mosaic_0001>
module attributes {stable_mosaic.version = 11 : i64} {
  func.func @_conv3x3_relu_kernel(%arg0: i32, %arg1: i32, %arg2: memref<1x16x16x3xbf16, #tpu.memory_space<vmem>>, %arg3: memref<3x3x3x64xbf16, #tpu.memory_space<vmem>>, %arg4: memref<1x64xf32, #tpu.memory_space<vmem>>, %arg5: memref<1x16x16x64xbf16, #tpu.memory_space<vmem>>, %arg6: memref<432x3xbf16, #tpu.memory_space<vmem>>, %arg7: memref<384x64xf32, #tpu.memory_space<vmem>>) attributes {dimension_semantics = [#tpu.dimension_semantics<parallel>, #tpu.dimension_semantics<arbitrary>], iteration_bounds = array<i64: 2, 1>, scalar_prefetch = 0 : i64, scratch_operands = 2 : i64, tpu.core_type = #tpu.core_type<tc>, window_params = [{transform_indices = @transform_0, window_bounds = array<i64: 1, 16, 16, 3>}, {transform_indices = @transform_1, window_bounds = array<i64: 3, 3, 3, 64>}, {transform_indices = @transform_2, window_bounds = array<i64: 1, 64>}, {transform_indices = @transform_3, window_bounds = array<i64: 1, 16, 16, 64>}]} {
    %c0_i32 = arith.constant 0 : i32
    %0 = arith.cmpi eq, %arg1, %c0_i32 : i32
    %1 = arith.extui %0 : i1 to i32
    %c0_i32_0 = arith.constant 0 : i32
    %2 = arith.cmpi ne, %1, %c0_i32_0 : i32
    scf.if %2 {
      %cst_178 = arith.constant 0.000000e+00 : bf16
      %212 = vector.broadcast %cst_178 : bf16 to vector<432x3xbf16>
      %c0_179 = arith.constant 0 : index
      %c0_180 = arith.constant 0 : index
      %213 = vector.load %arg6[%c0_179, %c0_180] : memref<432x3xbf16, #tpu.memory_space<vmem>>, vector<432x3xbf16>
      tpu.vector_store %arg6[%c0_179, %c0_180], %212 {strides = array<i32>} : memref<432x3xbf16, #tpu.memory_space<vmem>>, vector<432x3xbf16>,
      %c0_181 = arith.constant 0 : index
      %c0_182 = arith.constant 0 : index
      %c0_183 = arith.constant 0 : index
      %c0_184 = arith.constant 0 : index
      %214 = vector.load %arg2[%c0_181, %c0_182, %c0_183, %c0_184] : memref<1x16x16x3xbf16, #tpu.memory_space<vmem>>, vector<1x1x16x3xbf16>
      %215 = vector.shape_cast %214 : vector<1x1x16x3xbf16> to vector<16x3xbf16>
      %c25 = arith.constant 25 : index
      %c0_185 = arith.constant 0 : index
      %216 = vector.load %arg6[%c25, %c0_185] : memref<432x3xbf16, #tpu.memory_space<vmem>>, vector<16x3xbf16>
      tpu.vector_store %arg6[%c25, %c0_185], %215 {strides = array<i32>} : memref<432x3xbf16, #tpu.memory_space<vmem>>, vector<16x3xbf16>,
      %c0_186 = arith.constant 0 : index
      %c1_187 = arith.constant 1 : index
      %c0_188 = arith.constant 0 : index
      %c0_189 = arith.constant 0 : index
      %217 = vector.load %arg2[%c0_186, %c1_187, %c0_188, %c0_189] : memref<1x16x16x3xbf16, #tpu.memory_space<vmem>>, vector<1x1x16x3xbf16>
      %218 = vector.shape_cast %217 : vector<1x1x16x3xbf16> to vector<16x3xbf16>
      %c49 = arith.constant 49 : index
      %c0_190 = arith.constant 0 : index
      %219 = vector.load %arg6[%c49, %c0_190] : memref<432x3xbf16, #tpu.memory_space<vmem>>, vector<16x3xbf16>
      tpu.vector_store %arg6[%c49, %c0_190], %218 {strides = array<i32>} : memref<432x3xbf16, #tpu.memory_space<vmem>>, vector<16x3xbf16>,
      %c0_191 = arith.constant 0 : index
      %c2_192 = arith.constant 2 : index
      %c0_193 = arith.constant 0 : index
      %c0_194 = arith.constant 0 : index
      %220 = vector.load %arg2[%c0_191, %c2_192, %c0_193, %c0_194] : memref<1x16x16x3xbf16, #tpu.memory_space<vmem>>, vector<1x1x16x3xbf16>
      %221 = vector.shape_cast %220 : vector<1x1x16x3xbf16> to vector<16x3xbf16>
      %c73 = arith.constant 73 : index
      %c0_195 = arith.constant 0 : index
      %222 = vector.load %arg6[%c73, %c0_195] : memref<432x3xbf16, #tpu.memory_space<vmem>>, vector<16x3xbf16>
      tpu.vector_store %arg6[%c73, %c0_195], %221 {strides = array<i32>} : memref<432x3xbf16, #tpu.memory_space<vmem>>, vector<16x3xbf16>,
      %c0_196 = arith.constant 0 : index
      %c3_197 = arith.constant 3 : index
      %c0_198 = arith.constant 0 : index
      %c0_199 = arith.constant 0 : index
      %223 = vector.load %arg2[%c0_196, %c3_197, %c0_198, %c0_199] : memref<1x16x16x3xbf16, #tpu.memory_space<vmem>>, vector<1x1x16x3xbf16>
      %224 = vector.shape_cast %223 : vector<1x1x16x3xbf16> to vector<16x3xbf16>
      %c97 = arith.constant 97 : index
      %c0_200 = arith.constant 0 : index
      %225 = vector.load %arg6[%c97, %c0_200] : memref<432x3xbf16, #tpu.memory_space<vmem>>, vector<16x3xbf16>
      tpu.vector_store %arg6[%c97, %c0_200], %224 {strides = array<i32>} : memref<432x3xbf16, #tpu.memory_space<vmem>>, vector<16x3xbf16>,
      %c0_201 = arith.constant 0 : index
      %c4_202 = arith.constant 4 : index
      %c0_203 = arith.constant 0 : index
      %c0_204 = arith.constant 0 : index
      %226 = vector.load %arg2[%c0_201, %c4_202, %c0_203, %c0_204] : memref<1x16x16x3xbf16, #tpu.memory_space<vmem>>, vector<1x1x16x3xbf16>
      %227 = vector.shape_cast %226 : vector<1x1x16x3xbf16> to vector<16x3xbf16>
      %c121 = arith.constant 121 : index
      %c0_205 = arith.constant 0 : index
      %228 = vector.load %arg6[%c121, %c0_205] : memref<432x3xbf16, #tpu.memory_space<vmem>>, vector<16x3xbf16>
      tpu.vector_store %arg6[%c121, %c0_205], %227 {strides = array<i32>} : memref<432x3xbf16, #tpu.memory_space<vmem>>, vector<16x3xbf16>,
      %c0_206 = arith.constant 0 : index
      %c5_207 = arith.constant 5 : index
      %c0_208 = arith.constant 0 : index
      %c0_209 = arith.constant 0 : index
      %229 = vector.load %arg2[%c0_206, %c5_207, %c0_208, %c0_209] : memref<1x16x16x3xbf16, #tpu.memory_space<vmem>>, vector<1x1x16x3xbf16>
      %230 = vector.shape_cast %229 : vector<1x1x16x3xbf16> to vector<16x3xbf16>
      %c145 = arith.constant 145 : index
      %c0_210 = arith.constant 0 : index
      %231 = vector.load %arg6[%c145, %c0_210] : memref<432x3xbf16, #tpu.memory_space<vmem>>, vector<16x3xbf16>
      tpu.vector_store %arg6[%c145, %c0_210], %230 {strides = array<i32>} : memref<432x3xbf16, #tpu.memory_space<vmem>>, vector<16x3xbf16>,
      %c0_211 = arith.constant 0 : index
      %c6_212 = arith.constant 6 : index
      %c0_213 = arith.constant 0 : index
      %c0_214 = arith.constant 0 : index
      %232 = vector.load %arg2[%c0_211, %c6_212, %c0_213, %c0_214] : memref<1x16x16x3xbf16, #tpu.memory_space<vmem>>, vector<1x1x16x3xbf16>
      %233 = vector.shape_cast %232 : vector<1x1x16x3xbf16> to vector<16x3xbf16>
      %c169 = arith.constant 169 : index
      %c0_215 = arith.constant 0 : index
      %234 = vector.load %arg6[%c169, %c0_215] : memref<432x3xbf16, #tpu.memory_space<vmem>>, vector<16x3xbf16>
      tpu.vector_store %arg6[%c169, %c0_215], %233 {strides = array<i32>} : memref<432x3xbf16, #tpu.memory_space<vmem>>, vector<16x3xbf16>,
      %c0_216 = arith.constant 0 : index
      %c7_217 = arith.constant 7 : index
      %c0_218 = arith.constant 0 : index
      %c0_219 = arith.constant 0 : index
      %235 = vector.load %arg2[%c0_216, %c7_217, %c0_218, %c0_219] : memref<1x16x16x3xbf16, #tpu.memory_space<vmem>>, vector<1x1x16x3xbf16>
      %236 = vector.shape_cast %235 : vector<1x1x16x3xbf16> to vector<16x3xbf16>
      %c193 = arith.constant 193 : index
      %c0_220 = arith.constant 0 : index
      %237 = vector.load %arg6[%c193, %c0_220] : memref<432x3xbf16, #tpu.memory_space<vmem>>, vector<16x3xbf16>
      tpu.vector_store %arg6[%c193, %c0_220], %236 {strides = array<i32>} : memref<432x3xbf16, #tpu.memory_space<vmem>>, vector<16x3xbf16>,
      %c0_221 = arith.constant 0 : index
      %c8_222 = arith.constant 8 : index
      %c0_223 = arith.constant 0 : index
      %c0_224 = arith.constant 0 : index
      %238 = vector.load %arg2[%c0_221, %c8_222, %c0_223, %c0_224] : memref<1x16x16x3xbf16, #tpu.memory_space<vmem>>, vector<1x1x16x3xbf16>
      %239 = vector.shape_cast %238 : vector<1x1x16x3xbf16> to vector<16x3xbf16>
      %c217 = arith.constant 217 : index
      %c0_225 = arith.constant 0 : index
      %240 = vector.load %arg6[%c217, %c0_225] : memref<432x3xbf16, #tpu.memory_space<vmem>>, vector<16x3xbf16>
      tpu.vector_store %arg6[%c217, %c0_225], %239 {strides = array<i32>} : memref<432x3xbf16, #tpu.memory_space<vmem>>, vector<16x3xbf16>,
      %c0_226 = arith.constant 0 : index
      %c9_227 = arith.constant 9 : index
      %c0_228 = arith.constant 0 : index
      %c0_229 = arith.constant 0 : index
      %241 = vector.load %arg2[%c0_226, %c9_227, %c0_228, %c0_229] : memref<1x16x16x3xbf16, #tpu.memory_space<vmem>>, vector<1x1x16x3xbf16>
      %242 = vector.shape_cast %241 : vector<1x1x16x3xbf16> to vector<16x3xbf16>
      %c241 = arith.constant 241 : index
      %c0_230 = arith.constant 0 : index
      %243 = vector.load %arg6[%c241, %c0_230] : memref<432x3xbf16, #tpu.memory_space<vmem>>, vector<16x3xbf16>
      tpu.vector_store %arg6[%c241, %c0_230], %242 {strides = array<i32>} : memref<432x3xbf16, #tpu.memory_space<vmem>>, vector<16x3xbf16>,
      %c0_231 = arith.constant 0 : index
      %c10_232 = arith.constant 10 : index
      %c0_233 = arith.constant 0 : index
      %c0_234 = arith.constant 0 : index
      %244 = vector.load %arg2[%c0_231, %c10_232, %c0_233, %c0_234] : memref<1x16x16x3xbf16, #tpu.memory_space<vmem>>, vector<1x1x16x3xbf16>
      %245 = vector.shape_cast %244 : vector<1x1x16x3xbf16> to vector<16x3xbf16>
      %c265 = arith.constant 265 : index
      %c0_235 = arith.constant 0 : index
      %246 = vector.load %arg6[%c265, %c0_235] : memref<432x3xbf16, #tpu.memory_space<vmem>>, vector<16x3xbf16>
      tpu.vector_store %arg6[%c265, %c0_235], %245 {strides = array<i32>} : memref<432x3xbf16, #tpu.memory_space<vmem>>, vector<16x3xbf16>,
      %c0_236 = arith.constant 0 : index
      %c11_237 = arith.constant 11 : index
      %c0_238 = arith.constant 0 : index
      %c0_239 = arith.constant 0 : index
      %247 = vector.load %arg2[%c0_236, %c11_237, %c0_238, %c0_239] : memref<1x16x16x3xbf16, #tpu.memory_space<vmem>>, vector<1x1x16x3xbf16>
      %248 = vector.shape_cast %247 : vector<1x1x16x3xbf16> to vector<16x3xbf16>
      %c289 = arith.constant 289 : index
      %c0_240 = arith.constant 0 : index
      %249 = vector.load %arg6[%c289, %c0_240] : memref<432x3xbf16, #tpu.memory_space<vmem>>, vector<16x3xbf16>
      tpu.vector_store %arg6[%c289, %c0_240], %248 {strides = array<i32>} : memref<432x3xbf16, #tpu.memory_space<vmem>>, vector<16x3xbf16>,
      %c0_241 = arith.constant 0 : index
      %c12_242 = arith.constant 12 : index
      %c0_243 = arith.constant 0 : index
      %c0_244 = arith.constant 0 : index
      %250 = vector.load %arg2[%c0_241, %c12_242, %c0_243, %c0_244] : memref<1x16x16x3xbf16, #tpu.memory_space<vmem>>, vector<1x1x16x3xbf16>
      %251 = vector.shape_cast %250 : vector<1x1x16x3xbf16> to vector<16x3xbf16>
      %c313 = arith.constant 313 : index
      %c0_245 = arith.constant 0 : index
      %252 = vector.load %arg6[%c313, %c0_245] : memref<432x3xbf16, #tpu.memory_space<vmem>>, vector<16x3xbf16>
      tpu.vector_store %arg6[%c313, %c0_245], %251 {strides = array<i32>} : memref<432x3xbf16, #tpu.memory_space<vmem>>, vector<16x3xbf16>,
      %c0_246 = arith.constant 0 : index
      %c13_247 = arith.constant 13 : index
      %c0_248 = arith.constant 0 : index
      %c0_249 = arith.constant 0 : index
      %253 = vector.load %arg2[%c0_246, %c13_247, %c0_248, %c0_249] : memref<1x16x16x3xbf16, #tpu.memory_space<vmem>>, vector<1x1x16x3xbf16>
      %254 = vector.shape_cast %253 : vector<1x1x16x3xbf16> to vector<16x3xbf16>
      %c337 = arith.constant 337 : index
      %c0_250 = arith.constant 0 : index
      %255 = vector.load %arg6[%c337, %c0_250] : memref<432x3xbf16, #tpu.memory_space<vmem>>, vector<16x3xbf16>
      tpu.vector_store %arg6[%c337, %c0_250], %254 {strides = array<i32>} : memref<432x3xbf16, #tpu.memory_space<vmem>>, vector<16x3xbf16>,
      %c0_251 = arith.constant 0 : index
      %c14_252 = arith.constant 14 : index
      %c0_253 = arith.constant 0 : index
      %c0_254 = arith.constant 0 : index
      %256 = vector.load %arg2[%c0_251, %c14_252, %c0_253, %c0_254] : memref<1x16x16x3xbf16, #tpu.memory_space<vmem>>, vector<1x1x16x3xbf16>
      %257 = vector.shape_cast %256 : vector<1x1x16x3xbf16> to vector<16x3xbf16>
      %c361 = arith.constant 361 : index
      %c0_255 = arith.constant 0 : index
      %258 = vector.load %arg6[%c361, %c0_255] : memref<432x3xbf16, #tpu.memory_space<vmem>>, vector<16x3xbf16>
      tpu.vector_store %arg6[%c361, %c0_255], %257 {strides = array<i32>} : memref<432x3xbf16, #tpu.memory_space<vmem>>, vector<16x3xbf16>,
      %c0_256 = arith.constant 0 : index
      %c15_257 = arith.constant 15 : index
      %c0_258 = arith.constant 0 : index
      %c0_259 = arith.constant 0 : index
      %259 = vector.load %arg2[%c0_256, %c15_257, %c0_258, %c0_259] : memref<1x16x16x3xbf16, #tpu.memory_space<vmem>>, vector<1x1x16x3xbf16>
      %260 = vector.shape_cast %259 : vector<1x1x16x3xbf16> to vector<16x3xbf16>
      %c385 = arith.constant 385 : index
      %c0_260 = arith.constant 0 : index
      %261 = vector.load %arg6[%c385, %c0_260] : memref<432x3xbf16, #tpu.memory_space<vmem>>, vector<16x3xbf16>
      tpu.vector_store %arg6[%c385, %c0_260], %260 {strides = array<i32>} : memref<432x3xbf16, #tpu.memory_space<vmem>>, vector<16x3xbf16>,
    } else {
    }
    %c0 = arith.constant 0 : index
    %c0_1 = arith.constant 0 : index
    %3 = vector.load %arg6[%c0, %c0_1] : memref<432x3xbf16, #tpu.memory_space<vmem>>, vector<384x3xbf16>
    %c0_2 = arith.constant 0 : index
    %c0_3 = arith.constant 0 : index
    %c0_4 = arith.constant 0 : index
    %c0_5 = arith.constant 0 : index
    %4 = vector.load %arg3[%c0_2, %c0_3, %c0_4, %c0_5] : memref<3x3x3x64xbf16, #tpu.memory_space<vmem>>, vector<1x1x3x64xbf16>
    %5 = vector.shape_cast %4 : vector<1x1x3x64xbf16> to vector<3x64xbf16>
    %cst = arith.constant dense<0.000000e+00> : vector<384x64xf32>
    %6 = tpu.matmul %3, %5, %cst {dimension_numbers = #tpu.dot_dimension_numbers<[1], [0], [0], [1], [0, 0, 1, 1], [], []>} : vector<384x3xbf16>, vector<3x64xbf16>, vector<384x64xf32> -> vector<384x64xf32>
    %c0_6 = arith.constant 0 : index
    %c1 = arith.constant 1 : index
    %c0_7 = arith.constant 0 : index
    %c0_8 = arith.constant 0 : index
    %7 = vector.load %arg3[%c0_6, %c1, %c0_7, %c0_8] : memref<3x3x3x64xbf16, #tpu.memory_space<vmem>>, vector<1x1x3x64xbf16>
    %8 = vector.shape_cast %7 : vector<1x1x3x64xbf16> to vector<3x64xbf16>
    %cst_9 = arith.constant dense<0.000000e+00> : vector<384x64xf32>
    %9 = tpu.matmul %3, %8, %cst_9 {dimension_numbers = #tpu.dot_dimension_numbers<[1], [0], [0], [1], [0, 0, 1, 1], [], []>} : vector<384x3xbf16>, vector<3x64xbf16>, vector<384x64xf32> -> vector<384x64xf32>
    %c383_i32 = arith.constant 383 : i32
    %10 = tpu.dynamic_rotate %9 by %c383_i32 dim 0 : vector<384x64xf32>, i32 -> vector<384x64xf32>
    %11 = arith.addf %6, %10 : vector<384x64xf32>
    %c0_10 = arith.constant 0 : index
    %c2 = arith.constant 2 : index
    %c0_11 = arith.constant 0 : index
    %c0_12 = arith.constant 0 : index
    %12 = vector.load %arg3[%c0_10, %c2, %c0_11, %c0_12] : memref<3x3x3x64xbf16, #tpu.memory_space<vmem>>, vector<1x1x3x64xbf16>
    %13 = vector.shape_cast %12 : vector<1x1x3x64xbf16> to vector<3x64xbf16>
    %cst_13 = arith.constant dense<0.000000e+00> : vector<384x64xf32>
    %14 = tpu.matmul %3, %13, %cst_13 {dimension_numbers = #tpu.dot_dimension_numbers<[1], [0], [0], [1], [0, 0, 1, 1], [], []>} : vector<384x3xbf16>, vector<3x64xbf16>, vector<384x64xf32> -> vector<384x64xf32>
    %c382_i32 = arith.constant 382 : i32
    %15 = tpu.dynamic_rotate %14 by %c382_i32 dim 0 : vector<384x64xf32>, i32 -> vector<384x64xf32>
    %16 = arith.addf %11, %15 : vector<384x64xf32>
    %c0_14 = arith.constant 0 : index
    %c0_15 = arith.constant 0 : index
    %17 = vector.load %arg7[%c0_14, %c0_15] : memref<384x64xf32, #tpu.memory_space<vmem>>, vector<384x64xf32>
    tpu.vector_store %arg7[%c0_14, %c0_15], %16 {strides = array<i32>} : memref<384x64xf32, #tpu.memory_space<vmem>>, vector<384x64xf32>,
    %c24 = arith.constant 24 : index
    %c0_16 = arith.constant 0 : index
    %18 = vector.load %arg6[%c24, %c0_16] : memref<432x3xbf16, #tpu.memory_space<vmem>>, vector<384x3xbf16>
    %c1_17 = arith.constant 1 : index
    %c0_18 = arith.constant 0 : index
    %c0_19 = arith.constant 0 : index
    %c0_20 = arith.constant 0 : index
    %19 = vector.load %arg3[%c1_17, %c0_18, %c0_19, %c0_20] : memref<3x3x3x64xbf16, #tpu.memory_space<vmem>>, vector<1x1x3x64xbf16>
    %20 = vector.shape_cast %19 : vector<1x1x3x64xbf16> to vector<3x64xbf16>
    %cst_21 = arith.constant dense<0.000000e+00> : vector<384x64xf32>
    %21 = tpu.matmul %18, %20, %cst_21 {dimension_numbers = #tpu.dot_dimension_numbers<[1], [0], [0], [1], [0, 0, 1, 1], [], []>} : vector<384x3xbf16>, vector<3x64xbf16>, vector<384x64xf32> -> vector<384x64xf32>
    %c1_22 = arith.constant 1 : index
    %c1_23 = arith.constant 1 : index
    %c0_24 = arith.constant 0 : index
    %c0_25 = arith.constant 0 : index
    %22 = vector.load %arg3[%c1_22, %c1_23, %c0_24, %c0_25] : memref<3x3x3x64xbf16, #tpu.memory_space<vmem>>, vector<1x1x3x64xbf16>
    %23 = vector.shape_cast %22 : vector<1x1x3x64xbf16> to vector<3x64xbf16>
    %cst_26 = arith.constant dense<0.000000e+00> : vector<384x64xf32>
    %24 = tpu.matmul %18, %23, %cst_26 {dimension_numbers = #tpu.dot_dimension_numbers<[1], [0], [0], [1], [0, 0, 1, 1], [], []>} : vector<384x3xbf16>, vector<3x64xbf16>, vector<384x64xf32> -> vector<384x64xf32>
    %c383_i32_27 = arith.constant 383 : i32
    %25 = tpu.dynamic_rotate %24 by %c383_i32_27 dim 0 : vector<384x64xf32>, i32 -> vector<384x64xf32>
    %26 = arith.addf %21, %25 : vector<384x64xf32>
    %c1_28 = arith.constant 1 : index
    %c2_29 = arith.constant 2 : index
    %c0_30 = arith.constant 0 : index
    %c0_31 = arith.constant 0 : index
    %27 = vector.load %arg3[%c1_28, %c2_29, %c0_30, %c0_31] : memref<3x3x3x64xbf16, #tpu.memory_space<vmem>>, vector<1x1x3x64xbf16>
    %28 = vector.shape_cast %27 : vector<1x1x3x64xbf16> to vector<3x64xbf16>
    %cst_32 = arith.constant dense<0.000000e+00> : vector<384x64xf32>
    %29 = tpu.matmul %18, %28, %cst_32 {dimension_numbers = #tpu.dot_dimension_numbers<[1], [0], [0], [1], [0, 0, 1, 1], [], []>} : vector<384x3xbf16>, vector<3x64xbf16>, vector<384x64xf32> -> vector<384x64xf32>
    %c382_i32_33 = arith.constant 382 : i32
    %30 = tpu.dynamic_rotate %29 by %c382_i32_33 dim 0 : vector<384x64xf32>, i32 -> vector<384x64xf32>
    %31 = arith.addf %26, %30 : vector<384x64xf32>
    %c0_34 = arith.constant 0 : index
    %c0_35 = arith.constant 0 : index
    %32 = vector.load %arg7[%c0_34, %c0_35] : memref<384x64xf32, #tpu.memory_space<vmem>>, vector<384x64xf32>
    %33 = arith.addf %32, %31 : vector<384x64xf32>
    %c0_36 = arith.constant 0 : index
    %c0_37 = arith.constant 0 : index
    %34 = vector.load %arg7[%c0_36, %c0_37] : memref<384x64xf32, #tpu.memory_space<vmem>>, vector<384x64xf32>
    tpu.vector_store %arg7[%c0_36, %c0_37], %33 {strides = array<i32>} : memref<384x64xf32, #tpu.memory_space<vmem>>, vector<384x64xf32>,
    %c48 = arith.constant 48 : index
    %c0_38 = arith.constant 0 : index
    %35 = vector.load %arg6[%c48, %c0_38] : memref<432x3xbf16, #tpu.memory_space<vmem>>, vector<384x3xbf16>
    %c2_39 = arith.constant 2 : index
    %c0_40 = arith.constant 0 : index
    %c0_41 = arith.constant 0 : index
    %c0_42 = arith.constant 0 : index
    %36 = vector.load %arg3[%c2_39, %c0_40, %c0_41, %c0_42] : memref<3x3x3x64xbf16, #tpu.memory_space<vmem>>, vector<1x1x3x64xbf16>
    %37 = vector.shape_cast %36 : vector<1x1x3x64xbf16> to vector<3x64xbf16>
    %cst_43 = arith.constant dense<0.000000e+00> : vector<384x64xf32>
    %38 = tpu.matmul %35, %37, %cst_43 {dimension_numbers = #tpu.dot_dimension_numbers<[1], [0], [0], [1], [0, 0, 1, 1], [], []>} : vector<384x3xbf16>, vector<3x64xbf16>, vector<384x64xf32> -> vector<384x64xf32>
    %c2_44 = arith.constant 2 : index
    %c1_45 = arith.constant 1 : index
    %c0_46 = arith.constant 0 : index
    %c0_47 = arith.constant 0 : index
    %39 = vector.load %arg3[%c2_44, %c1_45, %c0_46, %c0_47] : memref<3x3x3x64xbf16, #tpu.memory_space<vmem>>, vector<1x1x3x64xbf16>
    %40 = vector.shape_cast %39 : vector<1x1x3x64xbf16> to vector<3x64xbf16>
    %cst_48 = arith.constant dense<0.000000e+00> : vector<384x64xf32>
    %41 = tpu.matmul %35, %40, %cst_48 {dimension_numbers = #tpu.dot_dimension_numbers<[1], [0], [0], [1], [0, 0, 1, 1], [], []>} : vector<384x3xbf16>, vector<3x64xbf16>, vector<384x64xf32> -> vector<384x64xf32>
    %c383_i32_49 = arith.constant 383 : i32
    %42 = tpu.dynamic_rotate %41 by %c383_i32_49 dim 0 : vector<384x64xf32>, i32 -> vector<384x64xf32>
    %43 = arith.addf %38, %42 : vector<384x64xf32>
    %c2_50 = arith.constant 2 : index
    %c2_51 = arith.constant 2 : index
    %c0_52 = arith.constant 0 : index
    %c0_53 = arith.constant 0 : index
    %44 = vector.load %arg3[%c2_50, %c2_51, %c0_52, %c0_53] : memref<3x3x3x64xbf16, #tpu.memory_space<vmem>>, vector<1x1x3x64xbf16>
    %45 = vector.shape_cast %44 : vector<1x1x3x64xbf16> to vector<3x64xbf16>
    %cst_54 = arith.constant dense<0.000000e+00> : vector<384x64xf32>
    %46 = tpu.matmul %35, %45, %cst_54 {dimension_numbers = #tpu.dot_dimension_numbers<[1], [0], [0], [1], [0, 0, 1, 1], [], []>} : vector<384x3xbf16>, vector<3x64xbf16>, vector<384x64xf32> -> vector<384x64xf32>
    %c382_i32_55 = arith.constant 382 : i32
    %47 = tpu.dynamic_rotate %46 by %c382_i32_55 dim 0 : vector<384x64xf32>, i32 -> vector<384x64xf32>
    %48 = arith.addf %43, %47 : vector<384x64xf32>
    %c0_56 = arith.constant 0 : index
    %c0_57 = arith.constant 0 : index
    %49 = vector.load %arg7[%c0_56, %c0_57] : memref<384x64xf32, #tpu.memory_space<vmem>>, vector<384x64xf32>
    %50 = arith.addf %49, %48 : vector<384x64xf32>
    %c0_58 = arith.constant 0 : index
    %c0_59 = arith.constant 0 : index
    %51 = vector.load %arg7[%c0_58, %c0_59] : memref<384x64xf32, #tpu.memory_space<vmem>>, vector<384x64xf32>
    tpu.vector_store %arg7[%c0_58, %c0_59], %50 {strides = array<i32>} : memref<384x64xf32, #tpu.memory_space<vmem>>, vector<384x64xf32>,
    %c0_60 = arith.constant 0 : index
    %c0_61 = arith.constant 0 : index
    %52 = vector.load %arg7[%c0_60, %c0_61] : memref<384x64xf32, #tpu.memory_space<vmem>>, vector<16x64xf32>
    %c0_62 = arith.constant 0 : index
    %c0_63 = arith.constant 0 : index
    %53 = vector.load %arg4[%c0_62, %c0_63] : memref<1x64xf32, #tpu.memory_space<vmem>>, vector<1x64xf32>
    %54 = vector.broadcast %53 : vector<1x64xf32> to vector<16x64xf32>
    %55 = arith.addf %52, %54 : vector<16x64xf32>
    %cst_64 = arith.constant 0.000000e+00 : f32
    %56 = vector.broadcast %cst_64 : f32 to vector<16x64xf32>
    %57 = arith.maximumf %55, %56 : vector<16x64xf32>
    %58 = arith.truncf %57 : vector<16x64xf32> to vector<16x64xbf16>
    %c0_65 = arith.constant 0 : index
    %c0_66 = arith.constant 0 : index
    %c0_67 = arith.constant 0 : index
    %c0_68 = arith.constant 0 : index
    %59 = vector.load %arg5[%c0_65, %c0_66, %c0_67, %c0_68] : memref<1x16x16x64xbf16, #tpu.memory_space<vmem>>, vector<1x1x16x64xbf16>
    %60 = vector.shape_cast %59 : vector<1x1x16x64xbf16> to vector<16x64xbf16>
    %61 = vector.shape_cast %58 : vector<16x64xbf16> to vector<1x1x16x64xbf16>
    tpu.vector_store %arg5[%c0_65, %c0_66, %c0_67, %c0_68], %61 {strides = array<i32>} : memref<1x16x16x64xbf16, #tpu.memory_space<vmem>>, vector<1x1x16x64xbf16>,
    %c24_69 = arith.constant 24 : index
    %c0_70 = arith.constant 0 : index
    %62 = vector.load %arg7[%c24_69, %c0_70] : memref<384x64xf32, #tpu.memory_space<vmem>>, vector<16x64xf32>
    %c0_71 = arith.constant 0 : index
    %c0_72 = arith.constant 0 : index
    %63 = vector.load %arg4[%c0_71, %c0_72] : memref<1x64xf32, #tpu.memory_space<vmem>>, vector<1x64xf32>
    %64 = vector.broadcast %63 : vector<1x64xf32> to vector<16x64xf32>
    %65 = arith.addf %62, %64 : vector<16x64xf32>
    %cst_73 = arith.constant 0.000000e+00 : f32
    %66 = vector.broadcast %cst_73 : f32 to vector<16x64xf32>
    %67 = arith.maximumf %65, %66 : vector<16x64xf32>
    %68 = arith.truncf %67 : vector<16x64xf32> to vector<16x64xbf16>
    %c0_74 = arith.constant 0 : index
    %c1_75 = arith.constant 1 : index
    %c0_76 = arith.constant 0 : index
    %c0_77 = arith.constant 0 : index
    %69 = vector.load %arg5[%c0_74, %c1_75, %c0_76, %c0_77] : memref<1x16x16x64xbf16, #tpu.memory_space<vmem>>, vector<1x1x16x64xbf16>
    %70 = vector.shape_cast %69 : vector<1x1x16x64xbf16> to vector<16x64xbf16>
    %71 = vector.shape_cast %68 : vector<16x64xbf16> to vector<1x1x16x64xbf16>
    tpu.vector_store %arg5[%c0_74, %c1_75, %c0_76, %c0_77], %71 {strides = array<i32>} : memref<1x16x16x64xbf16, #tpu.memory_space<vmem>>, vector<1x1x16x64xbf16>,
    %c48_78 = arith.constant 48 : index
    %c0_79 = arith.constant 0 : index
    %72 = vector.load %arg7[%c48_78, %c0_79] : memref<384x64xf32, #tpu.memory_space<vmem>>, vector<16x64xf32>
    %c0_80 = arith.constant 0 : index
    %c0_81 = arith.constant 0 : index
    %73 = vector.load %arg4[%c0_80, %c0_81] : memref<1x64xf32, #tpu.memory_space<vmem>>, vector<1x64xf32>
    %74 = vector.broadcast %73 : vector<1x64xf32> to vector<16x64xf32>
    %75 = arith.addf %72, %74 : vector<16x64xf32>
    %cst_82 = arith.constant 0.000000e+00 : f32
    %76 = vector.broadcast %cst_82 : f32 to vector<16x64xf32>
    %77 = arith.maximumf %75, %76 : vector<16x64xf32>
    %78 = arith.truncf %77 : vector<16x64xf32> to vector<16x64xbf16>
    %c0_83 = arith.constant 0 : index
    %c2_84 = arith.constant 2 : index
    %c0_85 = arith.constant 0 : index
    %c0_86 = arith.constant 0 : index
    %79 = vector.load %arg5[%c0_83, %c2_84, %c0_85, %c0_86] : memref<1x16x16x64xbf16, #tpu.memory_space<vmem>>, vector<1x1x16x64xbf16>
    %80 = vector.shape_cast %79 : vector<1x1x16x64xbf16> to vector<16x64xbf16>
    %81 = vector.shape_cast %78 : vector<16x64xbf16> to vector<1x1x16x64xbf16>
    tpu.vector_store %arg5[%c0_83, %c2_84, %c0_85, %c0_86], %81 {strides = array<i32>} : memref<1x16x16x64xbf16, #tpu.memory_space<vmem>>, vector<1x1x16x64xbf16>,
    %c72 = arith.constant 72 : index
    %c0_87 = arith.constant 0 : index
    %82 = vector.load %arg7[%c72, %c0_87] : memref<384x64xf32, #tpu.memory_space<vmem>>, vector<16x64xf32>
    %c0_88 = arith.constant 0 : index
    %c0_89 = arith.constant 0 : index
    %83 = vector.load %arg4[%c0_88, %c0_89] : memref<1x64xf32, #tpu.memory_space<vmem>>, vector<1x64xf32>
    %84 = vector.broadcast %83 : vector<1x64xf32> to vector<16x64xf32>
    %85 = arith.addf %82, %84 : vector<16x64xf32>
    %cst_90 = arith.constant 0.000000e+00 : f32
    %86 = vector.broadcast %cst_90 : f32 to vector<16x64xf32>
    %87 = arith.maximumf %85, %86 : vector<16x64xf32>
    %88 = arith.truncf %87 : vector<16x64xf32> to vector<16x64xbf16>
    %c0_91 = arith.constant 0 : index
    %c3 = arith.constant 3 : index
    %c0_92 = arith.constant 0 : index
    %c0_93 = arith.constant 0 : index
    %89 = vector.load %arg5[%c0_91, %c3, %c0_92, %c0_93] : memref<1x16x16x64xbf16, #tpu.memory_space<vmem>>, vector<1x1x16x64xbf16>
    %90 = vector.shape_cast %89 : vector<1x1x16x64xbf16> to vector<16x64xbf16>
    %91 = vector.shape_cast %88 : vector<16x64xbf16> to vector<1x1x16x64xbf16>
    tpu.vector_store %arg5[%c0_91, %c3, %c0_92, %c0_93], %91 {strides = array<i32>} : memref<1x16x16x64xbf16, #tpu.memory_space<vmem>>, vector<1x1x16x64xbf16>,
    %c96 = arith.constant 96 : index
    %c0_94 = arith.constant 0 : index
    %92 = vector.load %arg7[%c96, %c0_94] : memref<384x64xf32, #tpu.memory_space<vmem>>, vector<16x64xf32>
    %c0_95 = arith.constant 0 : index
    %c0_96 = arith.constant 0 : index
    %93 = vector.load %arg4[%c0_95, %c0_96] : memref<1x64xf32, #tpu.memory_space<vmem>>, vector<1x64xf32>
    %94 = vector.broadcast %93 : vector<1x64xf32> to vector<16x64xf32>
    %95 = arith.addf %92, %94 : vector<16x64xf32>
    %cst_97 = arith.constant 0.000000e+00 : f32
    %96 = vector.broadcast %cst_97 : f32 to vector<16x64xf32>
    %97 = arith.maximumf %95, %96 : vector<16x64xf32>
    %98 = arith.truncf %97 : vector<16x64xf32> to vector<16x64xbf16>
    %c0_98 = arith.constant 0 : index
    %c4 = arith.constant 4 : index
    %c0_99 = arith.constant 0 : index
    %c0_100 = arith.constant 0 : index
    %99 = vector.load %arg5[%c0_98, %c4, %c0_99, %c0_100] : memref<1x16x16x64xbf16, #tpu.memory_space<vmem>>, vector<1x1x16x64xbf16>
    %100 = vector.shape_cast %99 : vector<1x1x16x64xbf16> to vector<16x64xbf16>
    %101 = vector.shape_cast %98 : vector<16x64xbf16> to vector<1x1x16x64xbf16>
    tpu.vector_store %arg5[%c0_98, %c4, %c0_99, %c0_100], %101 {strides = array<i32>} : memref<1x16x16x64xbf16, #tpu.memory_space<vmem>>, vector<1x1x16x64xbf16>,
    %c120 = arith.constant 120 : index
    %c0_101 = arith.constant 0 : index
    %102 = vector.load %arg7[%c120, %c0_101] : memref<384x64xf32, #tpu.memory_space<vmem>>, vector<16x64xf32>
    %c0_102 = arith.constant 0 : index
    %c0_103 = arith.constant 0 : index
    %103 = vector.load %arg4[%c0_102, %c0_103] : memref<1x64xf32, #tpu.memory_space<vmem>>, vector<1x64xf32>
    %104 = vector.broadcast %103 : vector<1x64xf32> to vector<16x64xf32>
    %105 = arith.addf %102, %104 : vector<16x64xf32>
    %cst_104 = arith.constant 0.000000e+00 : f32
    %106 = vector.broadcast %cst_104 : f32 to vector<16x64xf32>
    %107 = arith.maximumf %105, %106 : vector<16x64xf32>
    %108 = arith.truncf %107 : vector<16x64xf32> to vector<16x64xbf16>
    %c0_105 = arith.constant 0 : index
    %c5 = arith.constant 5 : index
    %c0_106 = arith.constant 0 : index
    %c0_107 = arith.constant 0 : index
    %109 = vector.load %arg5[%c0_105, %c5, %c0_106, %c0_107] : memref<1x16x16x64xbf16, #tpu.memory_space<vmem>>, vector<1x1x16x64xbf16>
    %110 = vector.shape_cast %109 : vector<1x1x16x64xbf16> to vector<16x64xbf16>
    %111 = vector.shape_cast %108 : vector<16x64xbf16> to vector<1x1x16x64xbf16>
    tpu.vector_store %arg5[%c0_105, %c5, %c0_106, %c0_107], %111 {strides = array<i32>} : memref<1x16x16x64xbf16, #tpu.memory_space<vmem>>, vector<1x1x16x64xbf16>,
    %c144 = arith.constant 144 : index
    %c0_108 = arith.constant 0 : index
    %112 = vector.load %arg7[%c144, %c0_108] : memref<384x64xf32, #tpu.memory_space<vmem>>, vector<16x64xf32>
    %c0_109 = arith.constant 0 : index
    %c0_110 = arith.constant 0 : index
    %113 = vector.load %arg4[%c0_109, %c0_110] : memref<1x64xf32, #tpu.memory_space<vmem>>, vector<1x64xf32>
    %114 = vector.broadcast %113 : vector<1x64xf32> to vector<16x64xf32>
    %115 = arith.addf %112, %114 : vector<16x64xf32>
    %cst_111 = arith.constant 0.000000e+00 : f32
    %116 = vector.broadcast %cst_111 : f32 to vector<16x64xf32>
    %117 = arith.maximumf %115, %116 : vector<16x64xf32>
    %118 = arith.truncf %117 : vector<16x64xf32> to vector<16x64xbf16>
    %c0_112 = arith.constant 0 : index
    %c6 = arith.constant 6 : index
    %c0_113 = arith.constant 0 : index
    %c0_114 = arith.constant 0 : index
    %119 = vector.load %arg5[%c0_112, %c6, %c0_113, %c0_114] : memref<1x16x16x64xbf16, #tpu.memory_space<vmem>>, vector<1x1x16x64xbf16>
    %120 = vector.shape_cast %119 : vector<1x1x16x64xbf16> to vector<16x64xbf16>
    %121 = vector.shape_cast %118 : vector<16x64xbf16> to vector<1x1x16x64xbf16>
    tpu.vector_store %arg5[%c0_112, %c6, %c0_113, %c0_114], %121 {strides = array<i32>} : memref<1x16x16x64xbf16, #tpu.memory_space<vmem>>, vector<1x1x16x64xbf16>,
    %c168 = arith.constant 168 : index
    %c0_115 = arith.constant 0 : index
    %122 = vector.load %arg7[%c168, %c0_115] : memref<384x64xf32, #tpu.memory_space<vmem>>, vector<16x64xf32>
    %c0_116 = arith.constant 0 : index
    %c0_117 = arith.constant 0 : index
    %123 = vector.load %arg4[%c0_116, %c0_117] : memref<1x64xf32, #tpu.memory_space<vmem>>, vector<1x64xf32>
    %124 = vector.broadcast %123 : vector<1x64xf32> to vector<16x64xf32>
    %125 = arith.addf %122, %124 : vector<16x64xf32>
    %cst_118 = arith.constant 0.000000e+00 : f32
    %126 = vector.broadcast %cst_118 : f32 to vector<16x64xf32>
    %127 = arith.maximumf %125, %126 : vector<16x64xf32>
    %128 = arith.truncf %127 : vector<16x64xf32> to vector<16x64xbf16>
    %c0_119 = arith.constant 0 : index
    %c7 = arith.constant 7 : index
    %c0_120 = arith.constant 0 : index
    %c0_121 = arith.constant 0 : index
    %129 = vector.load %arg5[%c0_119, %c7, %c0_120, %c0_121] : memref<1x16x16x64xbf16, #tpu.memory_space<vmem>>, vector<1x1x16x64xbf16>
    %130 = vector.shape_cast %129 : vector<1x1x16x64xbf16> to vector<16x64xbf16>
    %131 = vector.shape_cast %128 : vector<16x64xbf16> to vector<1x1x16x64xbf16>
    tpu.vector_store %arg5[%c0_119, %c7, %c0_120, %c0_121], %131 {strides = array<i32>} : memref<1x16x16x64xbf16, #tpu.memory_space<vmem>>, vector<1x1x16x64xbf16>,
    %c192 = arith.constant 192 : index
    %c0_122 = arith.constant 0 : index
    %132 = vector.load %arg7[%c192, %c0_122] : memref<384x64xf32, #tpu.memory_space<vmem>>, vector<16x64xf32>
    %c0_123 = arith.constant 0 : index
    %c0_124 = arith.constant 0 : index
    %133 = vector.load %arg4[%c0_123, %c0_124] : memref<1x64xf32, #tpu.memory_space<vmem>>, vector<1x64xf32>
    %134 = vector.broadcast %133 : vector<1x64xf32> to vector<16x64xf32>
    %135 = arith.addf %132, %134 : vector<16x64xf32>
    %cst_125 = arith.constant 0.000000e+00 : f32
    %136 = vector.broadcast %cst_125 : f32 to vector<16x64xf32>
    %137 = arith.maximumf %135, %136 : vector<16x64xf32>
    %138 = arith.truncf %137 : vector<16x64xf32> to vector<16x64xbf16>
    %c0_126 = arith.constant 0 : index
    %c8 = arith.constant 8 : index
    %c0_127 = arith.constant 0 : index
    %c0_128 = arith.constant 0 : index
    %139 = vector.load %arg5[%c0_126, %c8, %c0_127, %c0_128] : memref<1x16x16x64xbf16, #tpu.memory_space<vmem>>, vector<1x1x16x64xbf16>
    %140 = vector.shape_cast %139 : vector<1x1x16x64xbf16> to vector<16x64xbf16>
    %141 = vector.shape_cast %138 : vector<16x64xbf16> to vector<1x1x16x64xbf16>
    tpu.vector_store %arg5[%c0_126, %c8, %c0_127, %c0_128], %141 {strides = array<i32>} : memref<1x16x16x64xbf16, #tpu.memory_space<vmem>>, vector<1x1x16x64xbf16>,
    %c216 = arith.constant 216 : index
    %c0_129 = arith.constant 0 : index
    %142 = vector.load %arg7[%c216, %c0_129] : memref<384x64xf32, #tpu.memory_space<vmem>>, vector<16x64xf32>
    %c0_130 = arith.constant 0 : index
    %c0_131 = arith.constant 0 : index
    %143 = vector.load %arg4[%c0_130, %c0_131] : memref<1x64xf32, #tpu.memory_space<vmem>>, vector<1x64xf32>
    %144 = vector.broadcast %143 : vector<1x64xf32> to vector<16x64xf32>
    %145 = arith.addf %142, %144 : vector<16x64xf32>
    %cst_132 = arith.constant 0.000000e+00 : f32
    %146 = vector.broadcast %cst_132 : f32 to vector<16x64xf32>
    %147 = arith.maximumf %145, %146 : vector<16x64xf32>
    %148 = arith.truncf %147 : vector<16x64xf32> to vector<16x64xbf16>
    %c0_133 = arith.constant 0 : index
    %c9 = arith.constant 9 : index
    %c0_134 = arith.constant 0 : index
    %c0_135 = arith.constant 0 : index
    %149 = vector.load %arg5[%c0_133, %c9, %c0_134, %c0_135] : memref<1x16x16x64xbf16, #tpu.memory_space<vmem>>, vector<1x1x16x64xbf16>
    %150 = vector.shape_cast %149 : vector<1x1x16x64xbf16> to vector<16x64xbf16>
    %151 = vector.shape_cast %148 : vector<16x64xbf16> to vector<1x1x16x64xbf16>
    tpu.vector_store %arg5[%c0_133, %c9, %c0_134, %c0_135], %151 {strides = array<i32>} : memref<1x16x16x64xbf16, #tpu.memory_space<vmem>>, vector<1x1x16x64xbf16>,
    %c240 = arith.constant 240 : index
    %c0_136 = arith.constant 0 : index
    %152 = vector.load %arg7[%c240, %c0_136] : memref<384x64xf32, #tpu.memory_space<vmem>>, vector<16x64xf32>
    %c0_137 = arith.constant 0 : index
    %c0_138 = arith.constant 0 : index
    %153 = vector.load %arg4[%c0_137, %c0_138] : memref<1x64xf32, #tpu.memory_space<vmem>>, vector<1x64xf32>
    %154 = vector.broadcast %153 : vector<1x64xf32> to vector<16x64xf32>
    %155 = arith.addf %152, %154 : vector<16x64xf32>
    %cst_139 = arith.constant 0.000000e+00 : f32
    %156 = vector.broadcast %cst_139 : f32 to vector<16x64xf32>
    %157 = arith.maximumf %155, %156 : vector<16x64xf32>
    %158 = arith.truncf %157 : vector<16x64xf32> to vector<16x64xbf16>
    %c0_140 = arith.constant 0 : index
    %c10 = arith.constant 10 : index
    %c0_141 = arith.constant 0 : index
    %c0_142 = arith.constant 0 : index
    %159 = vector.load %arg5[%c0_140, %c10, %c0_141, %c0_142] : memref<1x16x16x64xbf16, #tpu.memory_space<vmem>>, vector<1x1x16x64xbf16>
    %160 = vector.shape_cast %159 : vector<1x1x16x64xbf16> to vector<16x64xbf16>
    %161 = vector.shape_cast %158 : vector<16x64xbf16> to vector<1x1x16x64xbf16>
    tpu.vector_store %arg5[%c0_140, %c10, %c0_141, %c0_142], %161 {strides = array<i32>} : memref<1x16x16x64xbf16, #tpu.memory_space<vmem>>, vector<1x1x16x64xbf16>,
    %c264 = arith.constant 264 : index
    %c0_143 = arith.constant 0 : index
    %162 = vector.load %arg7[%c264, %c0_143] : memref<384x64xf32, #tpu.memory_space<vmem>>, vector<16x64xf32>
    %c0_144 = arith.constant 0 : index
    %c0_145 = arith.constant 0 : index
    %163 = vector.load %arg4[%c0_144, %c0_145] : memref<1x64xf32, #tpu.memory_space<vmem>>, vector<1x64xf32>
    %164 = vector.broadcast %163 : vector<1x64xf32> to vector<16x64xf32>
    %165 = arith.addf %162, %164 : vector<16x64xf32>
    %cst_146 = arith.constant 0.000000e+00 : f32
    %166 = vector.broadcast %cst_146 : f32 to vector<16x64xf32>
    %167 = arith.maximumf %165, %166 : vector<16x64xf32>
    %168 = arith.truncf %167 : vector<16x64xf32> to vector<16x64xbf16>
    %c0_147 = arith.constant 0 : index
    %c11 = arith.constant 11 : index
    %c0_148 = arith.constant 0 : index
    %c0_149 = arith.constant 0 : index
    %169 = vector.load %arg5[%c0_147, %c11, %c0_148, %c0_149] : memref<1x16x16x64xbf16, #tpu.memory_space<vmem>>, vector<1x1x16x64xbf16>
    %170 = vector.shape_cast %169 : vector<1x1x16x64xbf16> to vector<16x64xbf16>
    %171 = vector.shape_cast %168 : vector<16x64xbf16> to vector<1x1x16x64xbf16>
    tpu.vector_store %arg5[%c0_147, %c11, %c0_148, %c0_149], %171 {strides = array<i32>} : memref<1x16x16x64xbf16, #tpu.memory_space<vmem>>, vector<1x1x16x64xbf16>,
    %c288 = arith.constant 288 : index
    %c0_150 = arith.constant 0 : index
    %172 = vector.load %arg7[%c288, %c0_150] : memref<384x64xf32, #tpu.memory_space<vmem>>, vector<16x64xf32>
    %c0_151 = arith.constant 0 : index
    %c0_152 = arith.constant 0 : index
    %173 = vector.load %arg4[%c0_151, %c0_152] : memref<1x64xf32, #tpu.memory_space<vmem>>, vector<1x64xf32>
    %174 = vector.broadcast %173 : vector<1x64xf32> to vector<16x64xf32>
    %175 = arith.addf %172, %174 : vector<16x64xf32>
    %cst_153 = arith.constant 0.000000e+00 : f32
    %176 = vector.broadcast %cst_153 : f32 to vector<16x64xf32>
    %177 = arith.maximumf %175, %176 : vector<16x64xf32>
    %178 = arith.truncf %177 : vector<16x64xf32> to vector<16x64xbf16>
    %c0_154 = arith.constant 0 : index
    %c12 = arith.constant 12 : index
    %c0_155 = arith.constant 0 : index
    %c0_156 = arith.constant 0 : index
    %179 = vector.load %arg5[%c0_154, %c12, %c0_155, %c0_156] : memref<1x16x16x64xbf16, #tpu.memory_space<vmem>>, vector<1x1x16x64xbf16>
    %180 = vector.shape_cast %179 : vector<1x1x16x64xbf16> to vector<16x64xbf16>
    %181 = vector.shape_cast %178 : vector<16x64xbf16> to vector<1x1x16x64xbf16>
    tpu.vector_store %arg5[%c0_154, %c12, %c0_155, %c0_156], %181 {strides = array<i32>} : memref<1x16x16x64xbf16, #tpu.memory_space<vmem>>, vector<1x1x16x64xbf16>,
    %c312 = arith.constant 312 : index
    %c0_157 = arith.constant 0 : index
    %182 = vector.load %arg7[%c312, %c0_157] : memref<384x64xf32, #tpu.memory_space<vmem>>, vector<16x64xf32>
    %c0_158 = arith.constant 0 : index
    %c0_159 = arith.constant 0 : index
    %183 = vector.load %arg4[%c0_158, %c0_159] : memref<1x64xf32, #tpu.memory_space<vmem>>, vector<1x64xf32>
    %184 = vector.broadcast %183 : vector<1x64xf32> to vector<16x64xf32>
    %185 = arith.addf %182, %184 : vector<16x64xf32>
    %cst_160 = arith.constant 0.000000e+00 : f32
    %186 = vector.broadcast %cst_160 : f32 to vector<16x64xf32>
    %187 = arith.maximumf %185, %186 : vector<16x64xf32>
    %188 = arith.truncf %187 : vector<16x64xf32> to vector<16x64xbf16>
    %c0_161 = arith.constant 0 : index
    %c13 = arith.constant 13 : index
    %c0_162 = arith.constant 0 : index
    %c0_163 = arith.constant 0 : index
    %189 = vector.load %arg5[%c0_161, %c13, %c0_162, %c0_163] : memref<1x16x16x64xbf16, #tpu.memory_space<vmem>>, vector<1x1x16x64xbf16>
    %190 = vector.shape_cast %189 : vector<1x1x16x64xbf16> to vector<16x64xbf16>
    %191 = vector.shape_cast %188 : vector<16x64xbf16> to vector<1x1x16x64xbf16>
    tpu.vector_store %arg5[%c0_161, %c13, %c0_162, %c0_163], %191 {strides = array<i32>} : memref<1x16x16x64xbf16, #tpu.memory_space<vmem>>, vector<1x1x16x64xbf16>,
    %c336 = arith.constant 336 : index
    %c0_164 = arith.constant 0 : index
    %192 = vector.load %arg7[%c336, %c0_164] : memref<384x64xf32, #tpu.memory_space<vmem>>, vector<16x64xf32>
    %c0_165 = arith.constant 0 : index
    %c0_166 = arith.constant 0 : index
    %193 = vector.load %arg4[%c0_165, %c0_166] : memref<1x64xf32, #tpu.memory_space<vmem>>, vector<1x64xf32>
    %194 = vector.broadcast %193 : vector<1x64xf32> to vector<16x64xf32>
    %195 = arith.addf %192, %194 : vector<16x64xf32>
    %cst_167 = arith.constant 0.000000e+00 : f32
    %196 = vector.broadcast %cst_167 : f32 to vector<16x64xf32>
    %197 = arith.maximumf %195, %196 : vector<16x64xf32>
    %198 = arith.truncf %197 : vector<16x64xf32> to vector<16x64xbf16>
    %c0_168 = arith.constant 0 : index
    %c14 = arith.constant 14 : index
    %c0_169 = arith.constant 0 : index
    %c0_170 = arith.constant 0 : index
    %199 = vector.load %arg5[%c0_168, %c14, %c0_169, %c0_170] : memref<1x16x16x64xbf16, #tpu.memory_space<vmem>>, vector<1x1x16x64xbf16>
    %200 = vector.shape_cast %199 : vector<1x1x16x64xbf16> to vector<16x64xbf16>
    %201 = vector.shape_cast %198 : vector<16x64xbf16> to vector<1x1x16x64xbf16>
    tpu.vector_store %arg5[%c0_168, %c14, %c0_169, %c0_170], %201 {strides = array<i32>} : memref<1x16x16x64xbf16, #tpu.memory_space<vmem>>, vector<1x1x16x64xbf16>,
    %c360 = arith.constant 360 : index
    %c0_171 = arith.constant 0 : index
    %202 = vector.load %arg7[%c360, %c0_171] : memref<384x64xf32, #tpu.memory_space<vmem>>, vector<16x64xf32>
    %c0_172 = arith.constant 0 : index
    %c0_173 = arith.constant 0 : index
    %203 = vector.load %arg4[%c0_172, %c0_173] : memref<1x64xf32, #tpu.memory_space<vmem>>, vector<1x64xf32>
    %204 = vector.broadcast %203 : vector<1x64xf32> to vector<16x64xf32>
    %205 = arith.addf %202, %204 : vector<16x64xf32>
    %cst_174 = arith.constant 0.000000e+00 : f32
    %206 = vector.broadcast %cst_174 : f32 to vector<16x64xf32>
    %207 = arith.maximumf %205, %206 : vector<16x64xf32>
    %208 = arith.truncf %207 : vector<16x64xf32> to vector<16x64xbf16>
    %c0_175 = arith.constant 0 : index
    %c15 = arith.constant 15 : index
    %c0_176 = arith.constant 0 : index
    %c0_177 = arith.constant 0 : index
    %209 = vector.load %arg5[%c0_175, %c15, %c0_176, %c0_177] : memref<1x16x16x64xbf16, #tpu.memory_space<vmem>>, vector<1x1x16x64xbf16>
    %210 = vector.shape_cast %209 : vector<1x1x16x64xbf16> to vector<16x64xbf16>
    %211 = vector.shape_cast %208 : vector<16x64xbf16> to vector<1x1x16x64xbf16>
    tpu.vector_store %arg5[%c0_175, %c15, %c0_176, %c0_177], %211 {strides = array<i32>} : memref<1x16x16x64xbf16, #tpu.memory_space<vmem>>, vector<1x1x16x64xbf16>,
    return
  }
  func.func @transform_0(%arg0: i32, %arg1: i32) -> (i32, i32, i32, i32) {
    %c0_i32 = arith.constant 0 : i32
    %c0_i32_0 = arith.constant 0 : i32
    %c0_i32_1 = arith.constant 0 : i32
    %c0_i32_2 = arith.constant 0 : i32
    return %arg0, %c0_i32, %c0_i32_0, %c0_i32_1 : i32, i32, i32, i32
  }
  func.func @transform_1(%arg0: i32, %arg1: i32) -> (i32, i32, i32, i32) {
    %c0_i32 = arith.constant 0 : i32
    %c0_i32_0 = arith.constant 0 : i32
    %c0_i32_1 = arith.constant 0 : i32
    %c0_i32_2 = arith.constant 0 : i32
    return %c0_i32, %c0_i32_0, %c0_i32_1, %arg1 : i32, i32, i32, i32
  }
  func.func @transform_2(%arg0: i32, %arg1: i32) -> (i32, i32) {
    %c0_i32 = arith.constant 0 : i32
    %c0_i32_0 = arith.constant 0 : i32
    return %c0_i32, %arg1 : i32, i32
  }
  func.func @transform_3(%arg0: i32, %arg1: i32) -> (i32, i32, i32, i32) {
    %c0_i32 = arith.constant 0 : i32
    %c0_i32_0 = arith.constant 0 : i32
    %c0_i32_1 = arith.constant 0 : i32
    return %arg0, %c0_i32, %c0_i32_0, %arg1 : i32, i32, i32, i32
  }
}

</mosaic_0001>

<bundles_post_ra>
// kernel: tpu_custom_call.1
= control target key start
LH: loop header
LB: loop body
LE: loop exit
PB: predicated region body
PF: predicated region fallthrough
CT: control target
= control target key end

     0   :  { %8 = vsyncpa [#allocation5], 0  ;;  %s8829_s0 = inlined_call_operand.vmem [shape: bf16[2,16,16,3], index: 0, kind: input, shape index: {}]   ;;  %s8830_s1 = inlined_call_operand.vmem [shape: bf16[3,3,3,64], index: 1, kind: input, shape index: {}]   ;;  %s8831_s2 = inlined_call_operand.vmem [shape: f32[1,64], index: 2, kind: input, shape index: {}]   ;;  %s8832_s3 = inlined_call_operand.hbm [shape: bf16[2,16,16,64], index: 3, kind: output, shape index: {}]  }
   0x1   :  { %10 = vsyncpa [#allocation5 + $0x1], 0  ;;  %s6478_s12 = smov 0   ;;  %s6480_s13 = smov 0  }
   0x2   :  { %s6482_s14 = smov 0   ;;  %s6484_s15 = smov 0  }
   0x3   :  { %s6486_s16 = smov 0   ;;  %s6488_s17 = smov 0  }
   0x4 LB: > { %s5114_s18 = sadd.s32 4294967295, %s6451_s17   ;;  %s5115_s19 = sadd.s32 4294967294, %s6451_s17   ;;  %s6451_s17 = sphi %s6488_s17, %s16_s17   ;;  %s6447_s16 = sphi %s6486_s16, %s8990_s16   ;;  %s6443_s15 = sphi %s6484_s15, %s8989_s15   ;;  %s6439_s14 = sphi %s6482_s14, %s8988_s14   ;;  %s6435_s13 = sphi %s6480_s13, %s8987_s13   ;;  %s6431_s12 = sphi %s6478_s12, %s8986_s12  }
   0x5   : > { %s28_s20 = sadd.s32 1, %s6447_s16  ;;  %s115_s21 = sadd.s32 1, %s6439_s14 }
   0x6   : > { %p30_p0 = scmp.ge.s32.totalorder %s28_s20, 2  ;;  %p125_p1 = scmp.ne.s32.totalorder %s6439_s14, %s6435_s13 }
   0x7   : > { %p126_p2 = scmp.eq.s32.totalorder %s5114_s18, 1  ;;  %p131_p3 = scmp.ne.s32.totalorder %s6435_s13, %s6431_s12 }
   0x8   : > { %s8992_s20 = smov (%p30_p0, %s28_s20), 0  ;;  %p132_p5 = scmp.eq.s32.totalorder %s5115_s19, 1 }
   0x9   : > { %p6518_p4 = por %p126_p2, %p125_p1  ;;  %s110_s23 = ssub.s32 %s6447_s16, %s8992_s20 }
   0xa   : > { %p5120_p6 = scmp.ge.s32.totalorder %s6451_s17, 1  ;;  %p113_p7 = scmp.eq.s32.totalorder %s110_s23, 0 }
   0xb   : > { %p6525_p8 = por %p132_p5, %p131_p3  ;;  %p171_p9 = scmp.lt.s32.totalorder %s6451_s17, 3 }
   0xc   : > { %s6531_s25 = scalar_select %p113_p7, %s6439_s14, %s115_s21  }
   0xd   : > { %p172_p10 = pnand %p5120_p6, %p171_p9 }
   0xf   : > { %175 = sbr.rel (%p172_p10) target bundleno = 733 (0x2dd), region = 32 }
  0x14   : > { %v6536_v0 = vld [vmem:[%s8830_s1 + $0x2] sm:$0x3]  ;;  %vm1005_vm0 = vcmask 1040384   ;;  %vm1006_vm1 = vcmask 1041408   ;;  %vm219_vm2 = vcmask 19456   ;;  %v6453_v1 = vmov 65535  }
  0x15   : > { %v1007_v2 = vsel %vm1005_vm0, 4294967295, %v6453_v1  ;;  %v5227_v3 = vld [vmem:[%s8830_s1 + $0x4] sm:$0x3]  ;;  %p202_p11 = scmp.lt.s32.totalorder %s6443_s15, 1  ;;  %v6454_v5 = vmov 0   ;;  %vm932_vm4 = vcmask 23552  }
  0x16   : > { %v6542_v4 = vsel %vm1006_vm1, %v1007_v2, 0  ;;  %220 = vst.msk [vmem:[#allocation2] sm:$0xf] %vm219_vm2, %v6454_v5  ;;  %221 = vst.msk [vmem:[#allocation2 + $0x4] sm:$0xf] %vm219_vm2, %v6454_v5  ;;  %vm306_vm7 = vcmask 16384  }
  0x17   : > { %222 = vst.msk [vmem:[#allocation2 + $0x8] sm:$0xf] %vm219_vm2, %v6454_v5  ;;  %223 = vst.msk [vmem:[#allocation2 + $0xc] sm:$0xf] %vm219_vm2, %v6454_v5  ;;  %v1010_v6 = vand.u32 %v6536_v0, %v6542_v4  ;;  %v6601_v7 = vand.u32 %v5227_v3, %v6542_v4  ;;  %s203_s30 = scalar_select %p202_p11, %s6443_s15, 1  ;;  %vm1939_vm13 = vcmask 523264  }
  0x18   : > { %224 = vst.msk [vmem:[#allocation2 + $0x10] sm:$0xf] %vm219_vm2, %v6454_v5  ;;  %225 = vst.msk [vmem:[#allocation2 + $0x14] sm:$0xf] %vm219_vm2, %v6454_v5  ;;  %v809_v8 = vld [vmem:[%s8830_s1] sm:$0x3] }
  0x19   : > { %226 = vst.msk [vmem:[#allocation2 + $0x18] sm:$0xf] %vm219_vm2, %v6454_v5  ;;  %227 = vst.msk [vmem:[#allocation2 + $0x1c] sm:$0xf] %vm219_vm2, %v6454_v5  ;;  %v6610_v9 = vand.u32 %v6542_v4, %v809_v8  ;;  %5792 = vmatprep.subr.bf16.mxu0 %v1010_v6  ;;  %6242 = vmatprep.subr.bf16.mxu1 %v1010_v6  ;;  %s5533_s6 = sshll.u32 %s203_s30, 7  ;;  %s199_s5 = sand.u32 1, %s6435_s13  }
  0x1a   : > { %228 = vst.msk [vmem:[#allocation2 + $0x20] sm:$0xf] %vm219_vm2, %v6454_v5  ;;  %229 = vst.msk [vmem:[#allocation2 + $0x24] sm:$0xf] %vm219_vm2, %v6454_v5  ;;  %vm300_vm3 = vsmask.f32 7938  ;;  %5793 = vmatpush3.bf16.msra.mxu0 %v1010_v6  ;;  %6243 = vmatpush3.bf16.msra.mxu1 %v1010_v6  ;;  %s6615_s9 = scalar_lea.vmem %s8829_s0, %s5533_s6 }
  0x1b   : > { %230 = vst.msk [vmem:[#allocation2 + $0x28] sm:$0xf] %vm219_vm2, %v6454_v5  ;;  %231 = vst.msk [vmem:[#allocation2 + $0x2c] sm:$0xf] %vm219_vm2, %v6454_v5  ;;  %vm276_vm5 = vsmask.f32 256  ;;  %5892 = vmatprep.subr.bf16.mxu0 %v6601_v7  ;;  %5842 = vmatprep.subr.bf16.mxu1 %v6610_v9 }
  0x1c   : > { %232 = vst.msk [vmem:[#allocation2 + $0x30] sm:$0xf] %vm219_vm2, %v6454_v5  ;;  %233 = vst.msk [vmem:[#allocation2 + $0x34] sm:$0xf] %vm219_vm2, %v6454_v5  ;;  %vm277_vm6 = vsmask.f32 4368 }
  0x1d   : > { %234 = vst.msk [vmem:[#allocation2 + $0x38] sm:$0xf] %vm219_vm2, %v6454_v5  ;;  %235 = vst.msk [vmem:[#allocation2 + $0x3c] sm:$0xf] %vm219_vm2, %v6454_v5  ;;  %v274_v10 = vld [vmem:[%s6615_s9] sm:$0xf] }
  0x1e   : > { %236 = vst.msk [vmem:[#allocation2 + $0x40] sm:$0xf] %vm219_vm2, %v6454_v5  ;;  %237 = vst.msk [vmem:[#allocation2 + $0x44] sm:$0xf] %vm219_vm2, %v6454_v5  ;;  %v5136_v11 = vld [vmem:[%s6615_s9 + $0x38] sm:$0xf] }
  0x1f   : > { %238 = vst.msk [vmem:[#allocation2 + $0x48] sm:$0xf] %vm219_vm2, %v6454_v5  ;;  %239 = vst.msk [vmem:[#allocation2 + $0x4c] sm:$0xf] %vm219_vm2, %v6454_v5  ;;  %v5137_v12 = vld [vmem:[%s6615_s9 + $0x3c] sm:$0xf] }
  0x20   : > { %240 = vst.msk [vmem:[#allocation2 + $0x50] sm:$0xf] %vm219_vm2, %v6454_v5  ;;  %241 = vst.msk [vmem:[#allocation2 + $0x54] sm:$0xf] %vm219_vm2, %v6454_v5  ;;  %v280_v13 = vshrl.u32 %v274_v10, 16  ;;  %v283_v14 = vshll.u32 %v274_v10, 16 }
  0x21   : > { %242 = vst.msk [vmem:[#allocation2 + $0x58] sm:$0xf] %vm219_vm2, %v6454_v5  ;;  %243 = vst.msk [vmem:[#allocation2 + $0x5c] sm:$0xf] %vm219_vm2, %v6454_v5  ;;  %v495_v15 = vshrl.u32 %v5136_v11, 16  ;;  %v498_v16 = vshll.u32 %v5136_v11, 16 }
  0x22   : > { %244 = vst.msk [vmem:[#allocation2 + $0x60] sm:$0xf] %vm219_vm2, %v6454_v5  ;;  %245 = vst.msk [vmem:[#allocation2 + $0x64] sm:$0xf] %vm219_vm2, %v6454_v5  ;;  %v5138_v17 = vld [vmem:[%s6615_s9 + $0x40] sm:$0xf] }
  0x23   : > { %246 = vst.msk [vmem:[#allocation2 + $0x68] sm:$0xf] %vm219_vm2, %v6454_v5  ;;  %247 = vst.msk [vmem:[#allocation2 + $0x6c] sm:$0xf] %vm219_vm2, %v6454_v5  ;;  %v6623_v18 = vld [vmem:[#allocation2] sm:$0xff]   ;;  %v503_v19 = vshrl.u32 %v5137_v12, 16 }
  0x24   : > { %248 = vst.msk [vmem:[#allocation2 + $0x70] sm:$0xf] %vm219_vm2, %v6454_v5  ;;  %249 = vst.msk [vmem:[#allocation2 + $0x74] sm:$0xf] %vm219_vm2, %v6454_v5  ;;  %v282_v20 = vrot.slane %v280_v13, 7  ;;  %v497_v22 = vrot.slane %v495_v15, 7  ;;  %5794 = vmatprep.mubr.msk.bf16.mxu0 %vm932_vm4, %v6623_v18 }
  0x25   : > { %250 = vst.msk [vmem:[#allocation2 + $0x78] sm:$0xf] %vm219_vm2, %v6454_v5  ;;  %251 = vst.msk [vmem:[#allocation2 + $0x7c] sm:$0xf] %vm219_vm2, %v6454_v5  ;;  %v302_v23 = vld [vmem:[#allocation2 + $0xc] sm:$0xf] }
  0x26   : > { %252 = vst.msk [vmem:[#allocation2 + $0x80] sm:$0xf] %vm219_vm2, %v6454_v5  ;;  %253 = vst.msk [vmem:[#allocation2 + $0x84] sm:$0xf] %vm219_vm2, %v6454_v5  ;;  %v505_v25 = vrot.slane %v503_v19, 7  ;;  %v506_v26 = vshll.u32 %v5137_v12, 16  ;;  %v285_v28 = vor.u32 %v283_v14, %v282_v20  ;;  %v500_v30 = vor.u32 %v498_v16, %v497_v22 }
  0x27   : > { %254 = vst.msk [vmem:[#allocation2 + $0x88] sm:$0xf] %vm219_vm2, %v6454_v5  ;;  %255 = vst.msk [vmem:[#allocation2 + $0x8c] sm:$0xf] %vm219_vm2, %v6454_v5  ;;  %v501_v31 = vrot.slane %v497_v22, 4  ;;  %v525_v33 = vshrl.u32 %v5138_v17, 16 }
  0x28   : > { %256 = vst.msk [vmem:[#allocation2 + $0x90] sm:$0xf] %vm219_vm2, %v6454_v5  ;;  %257 = vst.msk [vmem:[#allocation2 + $0x94] sm:$0xf] %vm219_vm2, %v6454_v5  ;;  %v275_v34 = vld [vmem:[%s6615_s9 + $0x4] sm:$0xf]  ;;  %v508_v35 = vor.u32 %v506_v26, %v505_v25 }
  0x29   : > { %258 = vst.msk [vmem:[#allocation2 + $0x98] sm:$0xf] %vm219_vm2, %v6454_v5  ;;  %259 = vst.msk [vmem:[#allocation2 + $0x9c] sm:$0xf] %vm219_vm2, %v6454_v5  ;;  %v514_v27 = vld [vmem:[#allocation2 + $0x60] sm:$0xf] }
  0x2a   : > { %260 = vst.msk [vmem:[#allocation2 + $0xa0] sm:$0xf] %vm219_vm2, %v6454_v5  ;;  %261 = vst.msk [vmem:[#allocation2 + $0xa4] sm:$0xf] %vm219_vm2, %v6454_v5  ;;  %v518_v32 = vld [vmem:[#allocation2 + $0x68] sm:$0x1] }
  0x2b   : > { %262 = vst.msk [vmem:[#allocation2 + $0xa8] sm:$0xf] %vm219_vm2, %v6454_v5  ;;  %263 = vst.msk [vmem:[#allocation2 + $0xac] sm:$0xf] %vm219_vm2, %v6454_v5  ;;  %v510_v36 = vrot.slane %v505_v25, 4  ;;  %v528_v37 = vshll.u32 %v5138_v17, 16 }
  0x2c   : > { %264 = vst.msk [vmem:[#allocation2 + $0xb0] sm:$0xf] %vm219_vm2, %v6454_v5  ;;  %265 = vst.msk [vmem:[#allocation2 + $0xb4] sm:$0xf] %vm219_vm2, %v6454_v5  ;;  %v286_v38 = vrot.slane %v282_v20, 4  ;;  %v527_v41 = vrot.slane %v525_v33, 7 }
  0x2d   : > { %266 = vst.msk [vmem:[#allocation2 + $0xb8] sm:$0xf] %vm219_vm2, %v6454_v5  ;;  %267 = vst.msk [vmem:[#allocation2 + $0xbc] sm:$0xf] %vm219_vm2, %v6454_v5  ;;  %v288_v42 = vshrl.u32 %v275_v34, 16  ;;  %v291_v48 = vshll.u32 %v275_v34, 16 }
  0x2e   : > { %268 = vst.msk [vmem:[#allocation2 + $0xc0] sm:$0xf] %vm219_vm2, %v6454_v5  ;;  %269 = vst.msk [vmem:[#allocation2 + $0xc4] sm:$0xf] %vm219_vm2, %v6454_v5  ;;  %v5124_v43 = vld [vmem:[%s6615_s9 + $0x8] sm:$0xf]  ;;  %v530_v51 = vor.u32 %v528_v37, %v527_v41 }
  0x2f   : > { %270 = vst.msk [vmem:[#allocation2 + $0xc8] sm:$0xf] %vm219_vm2, %v6454_v5  ;;  %271 = vst.msk [vmem:[#allocation2 + $0xcc] sm:$0xf] %vm219_vm2, %v6454_v5  ;;  %v5125_v44 = vld [vmem:[%s6615_s9 + $0xc] sm:$0xf] }
  0x30   : > { %272 = vst.msk [vmem:[#allocation2 + $0xd0] sm:$0xf] %vm219_vm2, %v6454_v5  ;;  %273 = vst.msk [vmem:[#allocation2 + $0xd4] sm:$0xf] %vm219_vm2, %v6454_v5  ;;  %v544_v47 = vld [vmem:[#allocation2 + $0x6c] sm:$0xf] }
  0x31   : > { %vm6627_vm8 = vmand %vm219_vm2, %vm300_vm3  ;;  %v315_v49 = vshrl.u32 %v5124_v43, 16  ;;  %v5139_v50 = vld [vmem:[%s6615_s9 + $0x44] sm:$0xf]  ;;  %v290_v52 = vrot.slane %v288_v42, 7  ;;  %v308_v53 = vld [vmem:[#allocation2 + $0x14] sm:$0x1] }
  0x32   : > { %vm6635_vm9 = vmor %vm276_vm5, %vm277_vm6  ;;  %v303_v39 = vsel %vm6627_vm8, %v285_v28, %v302_v23  ;;  %v515_v40 = vsel %vm6627_vm8, %v500_v30, %v514_v27  ;;  %v318_v54 = vshll.u32 %v5124_v43, 16  ;;  %v323_v55 = vshrl.u32 %v5125_v44, 16  ;;  %v5140_v60 = vld [vmem:[%s6615_s9 + $0x48] sm:$0xf]  ;;  %v334_v1 = vld [vmem:[#allocation2 + $0x18] sm:$0xf] }
  0x33   : > { %vm6641_vm10 = vmand %vm306_vm7, %vm276_vm5  ;;  %304 = vst [vmem:[#allocation2 + $0xc] sm:$0xf] %v303_v39  ;;  %v509_v45 = vsel %vm6635_vm9, %v501_v31, %v508_v35  ;;  %v317_v56 = vrot.slane %v315_v49, 7  ;;  %v326_v57 = vshll.u32 %v5125_v44, 16  ;;  %v531_v58 = vrot.slane %v527_v41, 4  ;;  %s8468_s8 = sshll.u32 %s199_s5, 7 }
  0x34   : > { %516 = vst [vmem:[#allocation2 + $0x60] sm:$0xf] %v515_v40  ;;  %v519_v46 = vsel %vm6641_vm10, %v510_v36, %v518_v32  ;;  %517 = vst.msk [vmem:[#allocation2 + $0x64] sm:$0xf] %vm219_vm2, %v509_v45  ;;  %v533_v59 = vshrl.u32 %v5139_v50, 16  ;;  %v545_v61 = vsel %vm6627_vm8, %v530_v51, %v544_v47  ;;  %v293_v62 = vor.u32 %v291_v48, %v290_v52  ;;  %s5566_s18 = sshll.u32 %s6443_s15, 11 }
  0x35   : > { %520 = vst [vmem:[#allocation2 + $0x68] sm:$0x1] %v519_v46  ;;  %v295_v63 = vrot.slane %v290_v52, 4  ;;  %v325_v0 = vrot.slane %v323_v55, 7  ;;  %v5252_v2 = vld [vmem:[%s8830_s1 + $0x6] sm:$0x3]  ;;  %v320_v3 = vor.u32 %v318_v54, %v317_v56  ;;  %s8776_s26 = scalar_lea.hbm %s8832_s3, %s5566_s18 }
  0x36   : > { %546 = vst [vmem:[#allocation2 + $0x6c] sm:$0xf] %v545_v61  ;;  %v321_v5 = vrot.slane %v317_v56, 4  ;;  %v535_v6 = vrot.slane %v533_v59, 7  ;;  %v536_v8 = vshll.u32 %v5139_v50, 16  ;;  %v294_v11 = vsel %vm6635_vm9, %v286_v38, %v293_v62  ;;  %s8784_s27 = scalar_lea.sflag [#allocation5], %s199_s5 }
  0x37   : > { %v5253_v10 = vld [vmem:[%s8830_s1 + $0x8] sm:$0x3]  ;;  %v309_v12 = vsel %vm6641_vm10, %v295_v63, %v308_v53  ;;  %v328_v13 = vor.u32 %v326_v57, %v325_v0  ;;  %v548_v14 = vld [vmem:[#allocation2 + $0x74] sm:$0x1]  ;;  %v5141_v15 = vld [vmem:[%s6615_s9 + $0x4c] sm:$0xf]  ;;  %v335_v17 = vsel %vm6627_vm8, %v320_v3, %v334_v1  ;;  %v6682_v32 = vand.u32 %v5252_v2, %v6542_v4 }
  0x38   : > { %v555_v16 = vshrl.u32 %v5140_v60, 16  ;;  %305 = vst.msk [vmem:[#allocation2 + $0x10] sm:$0xf] %vm219_vm2, %v294_v11  ;;  %310 = vst [vmem:[#allocation2 + $0x14] sm:$0x1] %v309_v12  ;;  %v538_v19 = vor.u32 %v536_v8, %v535_v6  ;;  %v540_v20 = vrot.slane %v535_v6, 4  ;;  %v6692_v37 = vand.u32 %v5253_v10, %v6542_v4 }
  0x39   : > { %v558_v22 = vshll.u32 %v5140_v60, 16  ;;  %v574_v23 = vld [vmem:[#allocation2 + $0x78] sm:$0xf]  ;;  %v338_v25 = vld [vmem:[#allocation2 + $0x20] sm:$0x1]  ;;  %v329_v30 = vsel %vm6635_vm9, %v321_v5, %v328_v13  ;;  %v563_v36 = vshrl.u32 %v5141_v15, 16 }
  0x3a   : > { %v5126_v26 = vld [vmem:[%s6615_s9 + $0x10] sm:$0xf]  ;;  %v5127_v27 = vld [vmem:[%s6615_s9 + $0x14] sm:$0xf]  ;;  %v6677_v28 = vld [vmem:[#allocation2 + $0x8] sm:$0xff]   ;;  %v557_v31 = vrot.slane %v555_v16, 7  ;;  %v539_v34 = vsel %vm6635_vm9, %v531_v58, %v538_v19  ;;  %v549_v35 = vsel %vm6641_vm10, %v540_v20, %v548_v14 }
  0x3b   : > { %336 = vst [vmem:[#allocation2 + $0x18] sm:$0xf] %v335_v17  ;;  %v6684_v33 = vld [vmem:[#allocation2 + $0x60] sm:$0xff]   ;;  %337 = vst.msk [vmem:[#allocation2 + $0x1c] sm:$0xf] %vm219_vm2, %v329_v30  ;;  %5795 = vmatmul.mubr.msk.bf16.vlgmr.msra.gmra.mxu0 %vm932_vm4, %v6677_v28  ;;  %v566_v40 = vshll.u32 %v5141_v15, 16 }
  0x3c   : > { %547 = vst.msk [vmem:[#allocation2 + $0x70] sm:$0xf] %vm219_vm2, %v539_v34  ;;  %550 = vst [vmem:[#allocation2 + $0x74] sm:$0x1] %v549_v35  ;;  %v560_v38 = vor.u32 %v558_v22, %v557_v31  ;;  %v561_v39 = vrot.slane %v557_v31, 4  ;;  %v330_v41 = vrot.slane %v325_v0, 4  ;;  %5818 = vmatprep.mubr.msk.bf16.mxu1 %vm932_vm4, %v6684_v33  ;;  %5893 = vmatpush3.bf16.msra.mxu0 %v6601_v7 }
  0x3d   : > { %v565_v42 = vrot.slane %v563_v36, 7  ;;  %v345_v43 = vshrl.u32 %v5126_v26, 16  ;;  %v348_v44 = vshll.u32 %v5126_v26, 16  ;;  %v353_v45 = vshrl.u32 %v5127_v27, 16  ;;  %v5142_v46 = vld [vmem:[%s6615_s9 + $0x50] sm:$0xf]  ;;  %5992 = vmatprep.subr.bf16.mxu0 %v6682_v32 }
  0x3e   : > { %v6701_v47 = vld [vmem:[#allocation2 + $0x68] sm:$0xff]   ;;  %v575_v48 = vsel %vm6627_vm8, %v560_v38, %v574_v23  ;;  %v339_v49 = vsel %vm6641_vm10, %v330_v41, %v338_v25  ;;  %v364_v50 = vld [vmem:[#allocation2 + $0x24] sm:$0xf]  ;;  %v356_v51 = vshll.u32 %v5127_v27, 16  ;;  %v585_v52 = vshrl.u32 %v5142_v46, 16  ;;  %s6455_s15 = smov [#allocation4]  }
  0x3f   : > { %v568_v53 = vor.u32 %v566_v40, %v565_v42  ;;  %576 = vst [vmem:[#allocation2 + $0x78] sm:$0xf] %v575_v48  ;;  %340 = vst [vmem:[#allocation2 + $0x20] sm:$0x1] %v339_v49  ;;  %v347_v7 = vrot.slane %v345_v43, 7  ;;  %v355_v54 = vrot.slane %v353_v45, 7  ;;  %5819 = vmatmul.mubr.msk.bf16.vlgmr.msra.gmra.mxu1 %vm932_vm4, %v6701_v47 }
  0x40   : > { %v368_v55 = vld [vmem:[#allocation2 + $0x2c] sm:$0x1]  ;;  %v570_v56 = vrot.slane %v565_v42, 4  ;;  %v578_v57 = vld [vmem:[#allocation2 + $0x80] sm:$0x1]  ;;  %v6710_v58 = vld [vmem:[#allocation2 + $0x10] sm:$0xff]   ;;  %5843 = vmatpush3.bf16.msra.mxu1 %v6610_v9 }
  0x41   : > { %v587_v59 = vrot.slane %v585_v52, 7  ;;  %v569_v60 = vsel %vm6635_vm9, %v561_v39, %v568_v53  ;;  %v350_v61 = vor.u32 %v348_v44, %v347_v7  ;;  %v351_v62 = vrot.slane %v347_v7, 4  ;;  %v604_v0 = vld [vmem:[#allocation2 + $0x84] sm:$0xf]  ;;  %v5143_v1 = vld [vmem:[%s6615_s9 + $0x54] sm:$0xf]  ;;  %5798 = vmatprep.mubr.msk.bf16.mxu0 %vm932_vm4, %v6710_v58  ;;  %5942 = vmatprep.subr.bf16.mxu1 %v6692_v37 }
  0x42   : > { %v358_v63 = vor.u32 %v356_v51, %v355_v54  ;;  %v6718_v2 = vld [vmem:[#allocation2 + $0x18] sm:$0xff]   ;;  %577 = vst.msk [vmem:[#allocation2 + $0x7c] sm:$0xf] %vm219_vm2, %v569_v60  ;;  %v360_v3 = vrot.slane %v355_v54, 4  ;;  %v579_v9 = vsel %vm6641_vm10, %v570_v56, %v578_v57  ;;  %v588_v5 = vshll.u32 %v5142_v46, 16  ;;  %v6995_v21 = vld [vmem:[#allocation2 + $0xc] sm:$0xff]  }
  0x43   : > { %v6724_v6 = vld [vmem:[#allocation2 + $0x70] sm:$0xff]   ;;  %v365_v8 = vsel %vm6627_vm8, %v350_v61, %v364_v50  ;;  %580 = vst [vmem:[#allocation2 + $0x80] sm:$0x1] %v579_v9  ;;  %v593_v11 = vshrl.u32 %v5143_v1, 16  ;;  %5799 = vmatmul.mubr.msk.bf16.gmra.mxu0 %vm932_vm4, %v6718_v2  ;;  %v596_v14 = vshll.u32 %v5143_v1, 16  ;;  %v591_v17 = vrot.slane %v587_v59, 4 }
  0x44   : > { %v359_v10 = vsel %vm6635_vm9, %v351_v62, %v358_v63  ;;  %366 = vst [vmem:[#allocation2 + $0x24] sm:$0xf] %v365_v8  ;;  %v369_v12 = vsel %vm6641_vm10, %v360_v3, %v368_v55  ;;  %v590_v13 = vor.u32 %v588_v5, %v587_v59  ;;  %v608_v15 = vld [vmem:[#allocation2 + $0x8c] sm:$0x1]  ;;  %v5128_v16 = vld [vmem:[%s6615_s9 + $0x18] sm:$0xf]  ;;  %5822 = vmatprep.mubr.msk.bf16.mxu1 %vm932_vm4, %v6724_v6 }
  0x45   : > { %367 = vst.msk [vmem:[#allocation2 + $0x28] sm:$0xf] %vm219_vm2, %v359_v10  ;;  %370 = vst [vmem:[#allocation2 + $0x2c] sm:$0x1] %v369_v12  ;;  %v595_v19 = vrot.slane %v593_v11, 7  ;;  %v375_v22 = vshrl.u32 %v5128_v16, 16 }
  0x46   : > { %v5129_v20 = vld [vmem:[%s6615_s9 + $0x1c] sm:$0xf]  ;;  %v378_v23 = vshll.u32 %v5128_v16, 16  ;;  %v605_v25 = vsel %vm6627_vm8, %v590_v13, %v604_v0  ;;  %v394_v35 = vld [vmem:[#allocation2 + $0x30] sm:$0xf]  ;;  %v7008_v29 = vld [vmem:[#allocation2 + $0x14] sm:$0xff]  }
  0x47   : > { %v383_v26 = vshrl.u32 %v5129_v20, 16  ;;  %v386_v27 = vshll.u32 %v5129_v20, 16  ;;  %606 = vst [vmem:[#allocation2 + $0x84] sm:$0xf] %v605_v25  ;;  %v598_v30 = vor.u32 %v596_v14, %v595_v19  ;;  %v600_v31 = vrot.slane %v595_v19, 4  ;;  %s6379_s29 = sshll.u32 %s6455_s15, 4  ;;  %s6380_s29 = int_to_ptr.vmem [resolvable:$false] %s6379_s29 }
  0x48   : > { %v377_v34 = vrot.slane %v375_v22, 7  ;;  %v398_v38 = vld [vmem:[#allocation2 + $0x38] sm:$0x1]  ;;  %v5130_v39 = vld [vmem:[%s6615_s9 + $0x20] sm:$0xf]  ;;  %vm4637_vm14 = vcmask 519168  }
  0x49   : > { %v385_v36 = vrot.slane %v383_v26, 7  ;;  %v6742_v40 = vld [vmem:[#allocation2 + $0x78] sm:$0xff]   ;;  %v599_v41 = vsel %vm6635_vm9, %v591_v17, %v598_v30  ;;  %v609_v42 = vsel %vm6641_vm10, %v600_v31, %v608_v15  ;;  %v405_v49 = vshrl.u32 %v5130_v39, 16  ;;  %v634_v3 = vld [vmem:[#allocation2 + $0x90] sm:$0xf]  ;;  %s6381_s30 = scalar_lea.vmem %s6380_s29, 4096 }
  0x4a   : > { %v380_v43 = vor.u32 %v378_v23, %v377_v34  ;;  %v381_v44 = vrot.slane %v377_v34, 4  ;;  %v5144_v45 = vld [vmem:[%s6615_s9 + $0x58] sm:$0xf]  ;;  %607 = vst.msk [vmem:[#allocation2 + $0x88] sm:$0xf] %vm219_vm2, %v599_v41  ;;  %v408_v50 = vshll.u32 %v5130_v39, 16  ;;  %5823 = vmatmul.mubr.msk.bf16.gmra.mxu1 %vm932_vm4, %v6742_v40 }
  0x4b   : > { %610 = vst [vmem:[#allocation2 + $0x8c] sm:$0x1] %v609_v42  ;;  %v388_v46 = vor.u32 %v386_v27, %v385_v36  ;;  %v390_v48 = vrot.slane %v385_v36, 4  ;;  %v6752_v51 = vld [vmem:[#allocation2 + $0x20] sm:$0xff]   ;;  %v615_v53 = vshrl.u32 %v5144_v45, 16  ;;  %v6762_v56 = vrot.slane %v405_v49, 7 }
  0x4c   : > { %v395_v52 = vsel %vm6627_vm8, %v380_v43, %v394_v35  ;;  %v6756_v7 = vld [vmem:[#allocation2 + $0x28] sm:$0xff]   ;;  %v5145_v57 = vld [vmem:[%s6615_s9 + $0x5c] sm:$0xf]  ;;  %5802 = vmatprep.mubr.msk.bf16.mxu0 %vm932_vm4, %v6752_v51  ;;  %v618_v61 = vshll.u32 %v5144_v45, 16  ;;  %v5146_v10 = vld [vmem:[%s6615_s9 + $0x60] sm:$0xf] }
  0x4d   : > { %v389_v54 = vsel %vm6635_vm9, %v381_v44, %v388_v46  ;;  %396 = vst [vmem:[#allocation2 + $0x30] sm:$0xf] %v395_v52  ;;  %v399_v55 = vsel %vm6641_vm10, %v390_v48, %v398_v38  ;;  %v424_v59 = vld [vmem:[#allocation2 + $0x3c] sm:$0xf]  ;;  %v617_v60 = vrot.slane %v615_v53, 7  ;;  %v623_v62 = vshrl.u32 %v5145_v57, 16  ;;  %5803 = vmatmul.mubr.msk.bf16.gmra.mxu0 %vm932_vm4, %v6756_v7 }
  0x4e   : > { %397 = vst.msk [vmem:[#allocation2 + $0x34] sm:$0xf] %vm219_vm2, %v389_v54  ;;  %400 = vst [vmem:[#allocation2 + $0x38] sm:$0x1] %v399_v55  ;;  %v626_v63 = vshll.u32 %v5145_v57, 16  ;;  %v6770_v0 = vld [vmem:[#allocation2 + $0x80] sm:$0xff]   ;;  %v410_v1 = vor.u32 %v408_v50, %v6762_v56 }
  0x4f   : > { %v620_v9 = vor.u32 %v618_v61, %v617_v60  ;;  %v621_v5 = vrot.slane %v617_v60, 4  ;;  %v625_v8 = vrot.slane %v623_v62, 7  ;;  %5826 = vmatprep.mubr.msk.bf16.mxu1 %vm932_vm4, %v6770_v0  ;;  %v638_v12 = vld [vmem:[#allocation2 + $0x98] sm:$0x1]  ;;  %v645_v13 = vshrl.u32 %v5146_v10, 16 }
  0x50   : > { %v425_v11 = vsel %vm6627_vm8, %v410_v1, %v424_v59  ;;  %v648_v14 = vshll.u32 %v5146_v10, 16  ;;  %v5131_v15 = vld [vmem:[%s6615_s9 + $0x24] sm:$0xf]  ;;  %v664_v22 = vld [vmem:[#allocation2 + $0x9c] sm:$0xf]  ;;  %v411_v25 = vrot.slane %v6762_v56, 4 }
  0x51   : > { %426 = vst [vmem:[#allocation2 + $0x3c] sm:$0xf] %v425_v11  ;;  %v628_v17 = vor.u32 %v626_v63, %v625_v8  ;;  %v635_v19 = vsel %vm6627_vm8, %v620_v9, %v634_v3  ;;  %v630_v20 = vrot.slane %v625_v8, 4  ;;  %v6783_v23 = vrot.slane %v645_v13, 7  ;;  %v5132_v30 = vld [vmem:[%s6615_s9 + $0x28] sm:$0xf] }
  0x52   : > { %v6779_v16 = vld [vmem:[#allocation2 + $0x88] sm:$0xff]   ;;  %636 = vst [vmem:[#allocation2 + $0x90] sm:$0xf] %v635_v19  ;;  %v413_v26 = vshrl.u32 %v5131_v15, 16  ;;  %v416_v27 = vshll.u32 %v5131_v15, 16  ;;  %v435_v36 = vshrl.u32 %v5132_v30, 16 }
  0x53   : > { %5827 = vmatmul.mubr.msk.bf16.gmra.mxu1 %vm932_vm4, %v6779_v16  ;;  %v629_v31 = vsel %vm6635_vm9, %v621_v5, %v628_v17  ;;  %v639_v34 = vsel %vm6641_vm10, %v630_v20, %v638_v12  ;;  %v5133_v35 = vld [vmem:[%s6615_s9 + $0x2c] sm:$0xf]  ;;  %v438_v38 = vshll.u32 %v5132_v30, 16  ;;  %v650_v41 = vor.u32 %v648_v14, %v6783_v23  ;;  %v428_v43 = vld [vmem:[#allocation2 + $0x44] sm:$0x1] }
  0x54   : > { %637 = vst.msk [vmem:[#allocation2 + $0x94] sm:$0xf] %vm219_vm2, %v629_v31  ;;  %640 = vst [vmem:[#allocation2 + $0x98] sm:$0x1] %v639_v34  ;;  %v415_v42 = vrot.slane %v413_v26, 7  ;;  %v437_v44 = vrot.slane %v435_v36, 7 }
  0x55   : > { %v6794_v39 = vld [vmem:[#allocation2 + $0x30] sm:$0xff]   ;;  %v443_v45 = vshrl.u32 %v5133_v35, 16  ;;  %v446_v46 = vshll.u32 %v5133_v35, 16  ;;  %v665_v48 = vsel %vm6627_vm8, %v650_v41, %v664_v22  ;;  %v454_v52 = vld [vmem:[#allocation2 + $0x48] sm:$0xf]  ;;  %v651_v54 = vrot.slane %v6783_v23, 4 }
  0x56   : > { %5806 = vmatprep.mubr.msk.bf16.mxu0 %vm932_vm4, %v6794_v39  ;;  %v418_v49 = vor.u32 %v416_v27, %v415_v42  ;;  %v420_v50 = vrot.slane %v415_v42, 4  ;;  %v5147_v53 = vld [vmem:[%s6615_s9 + $0x64] sm:$0xf]  ;;  %666 = vst [vmem:[#allocation2 + $0x9c] sm:$0xf] %v665_v48  ;;  %v440_v55 = vor.u32 %v438_v38, %v437_v44  ;;  %v441_v56 = vrot.slane %v437_v44, 4 }
  0x57   : > { %v445_v57 = vrot.slane %v443_v45, 7  ;;  %v653_v59 = vshrl.u32 %v5147_v53, 16  ;;  %v5148_v60 = vld [vmem:[%s6615_s9 + $0x68] sm:$0xf]  ;;  %v656_v1 = vshll.u32 %v5147_v53, 16 }
  0x58   : > { %v6805_v61 = vld [vmem:[#allocation2 + $0x38] sm:$0xff]   ;;  %v419_v62 = vsel %vm6635_vm9, %v411_v25, %v418_v49  ;;  %v429_v63 = vsel %vm6641_vm10, %v420_v50, %v428_v43  ;;  %v5149_v3 = vld [vmem:[%s6615_s9 + $0x6c] sm:$0xf]  ;;  %v455_v5 = vsel %vm6627_vm8, %v440_v55, %v454_v52  ;;  %v668_v10 = vld [vmem:[#allocation2 + $0xa4] sm:$0x1]  ;;  %v675_v11 = vshrl.u32 %v5148_v60, 16 }
  0x59   : > { %427 = vst.msk [vmem:[#allocation2 + $0x40] sm:$0xf] %vm219_vm2, %v419_v62  ;;  %430 = vst [vmem:[#allocation2 + $0x44] sm:$0x1] %v429_v63  ;;  %v448_v9 = vor.u32 %v446_v46, %v445_v57  ;;  %v655_v8 = vrot.slane %v653_v59, 7  ;;  %5807 = vmatmul.mubr.msk.bf16.gmra.mxu0 %vm932_vm4, %v6805_v61  ;;  %v678_v12 = vshll.u32 %v5148_v60, 16 }
  0x5a   : > { %456 = vst [vmem:[#allocation2 + $0x48] sm:$0xf] %v455_v5  ;;  %v683_v13 = vshrl.u32 %v5149_v3, 16  ;;  %v686_v14 = vshll.u32 %v5149_v3, 16  ;;  %v450_v15 = vrot.slane %v445_v57, 4  ;;  %v677_v25 = vrot.slane %v675_v11, 7 }
  0x5b   : > { %v458_v17 = vld [vmem:[#allocation2 + $0x50] sm:$0x1]  ;;  %v449_v20 = vsel %vm6635_vm9, %v441_v56, %v448_v9  ;;  %v658_v22 = vor.u32 %v656_v1, %v655_v8  ;;  %v660_v23 = vrot.slane %v655_v8, 4  ;;  %v694_v35 = vld [vmem:[#allocation2 + $0xa8] sm:$0xf] }
  0x5c   : > { %v6817_v19 = vld [vmem:[#allocation2 + $0x90] sm:$0xff]   ;;  %457 = vst.msk [vmem:[#allocation2 + $0x4c] sm:$0xf] %vm219_vm2, %v449_v20  ;;  %v685_v26 = vrot.slane %v683_v13, 7  ;;  %v459_v27 = vsel %vm6641_vm10, %v450_v15, %v458_v17  ;;  %v680_v43 = vor.u32 %v678_v12, %v677_v25  ;;  %v681_v44 = vrot.slane %v677_v25, 4 }
  0x5d   : > { %v5134_v30 = vld [vmem:[%s6615_s9 + $0x30] sm:$0xf]  ;;  %5830 = vmatprep.mubr.msk.bf16.mxu1 %vm932_vm4, %v6817_v19  ;;  %v659_v31 = vsel %vm6635_vm9, %v651_v54, %v658_v22  ;;  %v669_v34 = vsel %vm6641_vm10, %v660_v23, %v668_v10  ;;  %460 = vst [vmem:[#allocation2 + $0x50] sm:$0x1] %v459_v27  ;;  %v5135_v41 = vld [vmem:[%s6615_s9 + $0x34] sm:$0xf] }
  0x5e   : > { %v465_v36 = vshrl.u32 %v5134_v30, 16  ;;  %v468_v38 = vshll.u32 %v5134_v30, 16  ;;  %v6832_v42 = vld [vmem:[#allocation2 + $0x98] sm:$0xff]   ;;  %667 = vst.msk [vmem:[#allocation2 + $0xa0] sm:$0xf] %vm219_vm2, %v659_v31  ;;  %v688_v45 = vor.u32 %v686_v14, %v685_v26  ;;  %v473_v48 = vshrl.u32 %v5135_v41, 16 }
  0x5f   : > { %670 = vst [vmem:[#allocation2 + $0xa4] sm:$0x1] %v669_v34  ;;  %v484_v46 = vld [vmem:[#allocation2 + $0x54] sm:$0xf]  ;;  %v476_v50 = vshll.u32 %v5135_v41, 16  ;;  %v690_v53 = vrot.slane %v685_v26, 4  ;;  %5831 = vmatmul.mubr.msk.bf16.gmra.mxu1 %vm932_vm4, %v6832_v42  ;;  %v695_v57 = vsel %vm6627_vm8, %v680_v43, %v694_v35 }
  0x60   : > { %v467_v49 = vrot.slane %v465_v36, 7  ;;  %v488_v52 = vld [vmem:[#allocation2 + $0x5c] sm:$0x1]  ;;  %v698_v54 = vld [vmem:[#allocation2 + $0xb0] sm:$0x1]  ;;  %v6837_v55 = vld [vmem:[#allocation2 + $0x40] sm:$0xff]   ;;  %v689_v56 = vsel %vm6635_vm9, %v681_v44, %v688_v45 }
  0x61   : > { %v475_v59 = vrot.slane %v473_v48, 7  ;;  %696 = vst [vmem:[#allocation2 + $0xa8] sm:$0xf] %v695_v57  ;;  %697 = vst.msk [vmem:[#allocation2 + $0xac] sm:$0xf] %vm219_vm2, %v689_v56  ;;  %v699_v63 = vsel %vm6641_vm10, %v690_v53, %v698_v54  ;;  %5810 = vmatprep.mubr.msk.bf16.mxu0 %vm932_vm4, %v6837_v55 }
  0x62   : > { %v470_v60 = vor.u32 %v468_v38, %v467_v49  ;;  %v471_v62 = vrot.slane %v467_v49, 4  ;;  %v5150_v1 = vld [vmem:[%s6615_s9 + $0x70] sm:$0xf]  ;;  %700 = vst [vmem:[#allocation2 + $0xb0] sm:$0x1] %v699_v63 }
  0x63   : > { %v478_v3 = vor.u32 %v476_v50, %v475_v59  ;;  %v480_v9 = vrot.slane %v475_v59, 4  ;;  %v705_v5 = vshrl.u32 %v5150_v1, 16  ;;  %v708_v8 = vshll.u32 %v5150_v1, 16  ;;  %v6849_v10 = vld [vmem:[#allocation2 + $0x48] sm:$0xff]   ;;  %v5151_v12 = vld [vmem:[%s6615_s9 + $0x74] sm:$0xf] }
  0x64   : > { %v485_v11 = vsel %vm6627_vm8, %v470_v60, %v484_v46  ;;  %v724_v17 = vld [vmem:[#allocation2 + $0xb4] sm:$0xf]  ;;  %v713_v20 = vshrl.u32 %v5151_v12, 16  ;;  %5811 = vmatmul.mubr.msk.bf16.gmra.mxu0 %vm932_vm4, %v6849_v10  ;;  %v716_v23 = vshll.u32 %v5151_v12, 16  ;;  %v728_v30 = vld [vmem:[#allocation2 + $0xbc] sm:$0x1] }
  0x65   : > { %486 = vst [vmem:[#allocation2 + $0x54] sm:$0xf] %v485_v11  ;;  %v479_v13 = vsel %vm6635_vm9, %v471_v62, %v478_v3  ;;  %v489_v14 = vsel %vm6641_vm10, %v480_v9, %v488_v52  ;;  %v707_v15 = vrot.slane %v705_v5, 7  ;;  %v5352_v46 = vld [vmem:[%s8830_s1 + $0xe] sm:$0x3]  ;;  %v7057_v60 = vld [vmem:[#allocation2 + $0x44] sm:$0xff]  }
  0x66   : > { %v6860_v22 = vld [vmem:[#allocation2 + $0xa0] sm:$0xff]   ;;  %487 = vst.msk [vmem:[#allocation2 + $0x58] sm:$0xf] %vm219_vm2, %v479_v13  ;;  %490 = vst [vmem:[#allocation2 + $0x5c] sm:$0x1] %v489_v14  ;;  %v715_v27 = vrot.slane %v713_v20, 7  ;;  %v6892_v49 = vand.u32 %v5352_v46, %v6542_v4 }
  0x67   : > { %v710_v25 = vor.u32 %v708_v8, %v707_v15  ;;  %v711_v26 = vrot.slane %v707_v15, 4  ;;  %5834 = vmatprep.mubr.msk.bf16.mxu1 %vm932_vm4, %v6860_v22  ;;  %v5326_v50 = vld [vmem:[%s8830_s1 + $0xa] sm:$0x3]  ;;  %v754_v53 = vld [vmem:[#allocation2 + $0xc0] sm:$0xf]  ;;  %v7059_v62 = vld [vmem:[#allocation2 + $0x4c] sm:$0xff]   ;;  %v1285_v8 = vlaneseq }
  0x68   : > { %v6865_v31 = vld [vmem:[#allocation2 + $0xa8] sm:$0xff]   ;;  %v718_v35 = vor.u32 %v716_v23, %v715_v27  ;;  %v720_v36 = vrot.slane %v715_v27, 4  ;;  %v6906_v52 = vand.u32 %v5326_v50, %v6542_v4  ;;  %v5425_v24 = vld [vmem:[%s8830_s1 + $0x10] sm:$0x3]  ;;  %v7101_v14 = vld [vmem:[#allocation2 + $0x74] sm:$0xff]  }
  0x69   : > { %v725_v34 = vsel %vm6627_vm8, %v710_v25, %v724_v17  ;;  %5835 = vmatmul.mubr.msk.bf16.gmra.mxu1 %vm932_vm4, %v6865_v31  ;;  %v758_v57 = vld [vmem:[#allocation2 + $0xc8] sm:$0x1]  ;;  %v7083_v9 = vld [vmem:[#allocation2 + $0x6c] sm:$0xff]   ;;  %v7099_v13 = vshrl.u32 %v1285_v8, 7  ;;  %v7107_v20 = vld [vmem:[#allocation2 + $0x7c] sm:$0xff]  }
  0x6a   : > { %726 = vst [vmem:[#allocation2 + $0xb4] sm:$0xf] %v725_v34  ;;  %v719_v38 = vsel %vm6635_vm9, %v711_v26, %v718_v35  ;;  %v729_v41 = vsel %vm6641_vm10, %v720_v36, %v728_v30  ;;  %v7081_v3 = vld [vmem:[#allocation2 + $0x64] sm:$0xff]   ;;  %v7143_v46 = vld [vmem:[#allocation2 + $0x8c] sm:$0xff]  }
  0x6b   : > { %727 = vst.msk [vmem:[#allocation2 + $0xb8] sm:$0xf] %vm219_vm2, %v719_v38  ;;  %730 = vst [vmem:[#allocation2 + $0xbc] sm:$0x1] %v729_v41  ;;  %vm1287_vm11 = vcmp.lt.s32.totalorder %v7099_v13, 7  ;;  %vm1842_vm12 = vcmp.lt.s32.totalorder %v7099_v13, 6 }
  0x6c   : > { %v6323_v43 = vld [vmem:[#allocation2 + $0x50] sm:$0xff]   ;;  %8866 = vst [vmem:[#allocation7_spill] sm:$0xff] %v7143_v46 }
  0x6d   : > { %v6324_v44 = vld [vmem:[#allocation2 + $0x58] sm:$0xff]   ;;  %5814 = vmatprep.mubr.msk.bf16.mxu0 %vm932_vm4, %v6323_v43 }
  0x6e   : > { %5815 = vmatmul.mubr.msk.bf16.gmra.mxu0 %vm932_vm4, %v6324_v44  ;;  %v7069_v63 = vld [vmem:[#allocation2 + $0x54] sm:$0xff]   ;;  %v7071_v1 = vld [vmem:[#allocation2 + $0x5c] sm:$0xff]  }
  0x6f   : > { %5894 = vmatprep.mubr.msk.bf16.mxu0 %vm932_vm4, %v6623_v18 }
  0x71   : > { %v6880_v45 = vld [vmem:[#allocation2 + $0xb0] sm:$0xff]  }
  0x72   : > { %5838 = vmatprep.mubr.msk.bf16.mxu1 %vm932_vm4, %v6880_v45  ;;  %v6887_v48 = vld [vmem:[#allocation2 + $0xb8] sm:$0xff]  }
  0x73   : > { %5839 = vmatmul.mubr.msk.bf16.gmra.mxu1 %vm932_vm4, %v6887_v48 }
  0x74   : > { %5844 = vmatprep.mubr.msk.bf16.mxu1 %vm932_vm4, %v6623_v18  ;;  %v5152_v18 = vld [vmem:[%s6615_s9 + $0x78] sm:$0xf] }
  0x76   : > { %5895 = vmatmul.mubr.msk.bf16.vlgmr.msra.gmra.mxu0 %vm932_vm4, %v6677_v28 }
  0x77   : > { %5993 = vmatpush3.bf16.msra.mxu0 %v6682_v32  ;;  %5898 = vmatprep.mubr.msk.bf16.mxu0 %vm932_vm4, %v6710_v58  ;;  %v5153_v32 = vld [vmem:[%s6615_s9 + $0x7c] sm:$0xf]  ;;  %s8489_s9 = scalar_lea.vmem [#allocation4], %s8468_s8 }
  0x78   : > { %6092 = vmatprep.subr.bf16.mxu0 %v6892_v49  ;;  %s5015_s19 = sshll.u32 %s8489_s9, 4  ;;  %s8778_s19 = int_to_ptr.vmem [resolvable:$true] %s5015_s19 }
  0x79   : > { %s6375_s28 = scalar_lea.vmem %s8778_s19, 2048  ;;  %p6382_p1 = scmp.lt.s32.totalorder %s8778_s19, %s6380_s29 }
  0x7a   : > { %p6376_p12 = scmp.ne.s32.totalorder %s8778_s19, %s6375_s28  ;;  %p6383_p2 = scmp.lt.s32.totalorder %s6381_s30, %s6375_s28 }
  0x7b   : > { %5845 = vmatmul.mubr.msk.bf16.vlgmr.msra.gmra.mxu1 %vm932_vm4, %v6677_v28  ;;  %v735_v28 = vshrl.u32 %v5152_v18, 16 }
  0x7c   : > { %5943 = vmatpush3.bf16.msra.mxu1 %v6692_v37  ;;  %5848 = vmatprep.mubr.msk.bf16.mxu1 %vm932_vm4, %v6710_v58  ;;  %v743_v37 = vshrl.u32 %v5153_v32, 16  ;;  %p6377_p13 = pnand %p6376_p12, %p6518_p4  ;;  %p6384_p3 = por %p6383_p2, %p6382_p1 }
  0x7d   : > { %6042 = vmatprep.subr.bf16.mxu1 %v6906_v52  ;;  %v737_v58 = vrot.slane %v735_v28, 7 }
  0x7e   : > { %5899 = vmatmul.mubr.msk.bf16.gmra.mxu0 %vm932_vm4, %v6718_v2  ;;  %p6378_p0 = pneg %p6377_p13 }
  0x7f   : > { %5902 = vmatprep.mubr.msk.bf16.mxu0 %vm932_vm4, %v6752_v51 }
  0x80   : > { %p6385_p5 = pnand %p6384_p3, %p6378_p0 }
  0x83   : > { %5849 = vmatmul.mubr.msk.bf16.gmra.mxu1 %vm932_vm4, %v6718_v2  ;;  %v738_v2 = vshll.u32 %v5152_v18, 16 }
  0x84   : > { %5852 = vmatprep.mubr.msk.bf16.mxu1 %vm932_vm4, %v6752_v51  ;;  %v745_v51 = vrot.slane %v743_v37, 7 }
  0x86   : > { %5903 = vmatmul.mubr.msk.bf16.gmra.mxu0 %vm932_vm4, %v6756_v7 }
  0x87   : > { %5906 = vmatprep.mubr.msk.bf16.mxu0 %vm932_vm4, %v6794_v39 }
  0x8b   : > { %5853 = vmatmul.mubr.msk.bf16.gmra.mxu1 %vm932_vm4, %v6756_v7  ;;  %v746_v7 = vshll.u32 %v5153_v32, 16 }
  0x8c   : > { %5856 = vmatprep.mubr.msk.bf16.mxu1 %vm932_vm4, %v6794_v39  ;;  %v740_v39 = vor.u32 %v738_v2, %v737_v58 }
  0x8d   : > { %v748_v54 = vor.u32 %v746_v7, %v745_v51 }
  0x8e   : > { %5907 = vmatmul.mubr.msk.bf16.gmra.mxu0 %vm932_vm4, %v6805_v61  ;;  %v755_v56 = vsel %vm6627_vm8, %v740_v39, %v754_v53  ;;  %v7169_v53 = vld [vmem:[#allocation2 + $0x9c] sm:$0xff]  }
  0x8f   : > { %5910 = vmatprep.mubr.msk.bf16.mxu0 %vm932_vm4, %v6837_v55  ;;  %756 = vst [vmem:[#allocation2 + $0xc0] sm:$0xf] %v755_v56  ;;  %8869 = vst [vmem:[#allocation10_spill] sm:$0xff] %v7169_v53 }
  0x93   : > { %5857 = vmatmul.mubr.msk.bf16.gmra.mxu1 %vm932_vm4, %v6805_v61  ;;  %v741_v61 = vrot.slane %v737_v58, 4 }
  0x94   : > { %5860 = vmatprep.mubr.msk.bf16.mxu1 %vm932_vm4, %v6837_v55  ;;  %v750_v55 = vrot.slane %v745_v51, 4  ;;  %v7161_v51 = vld [vmem:[#allocation2 + $0x94] sm:$0xff]  }
  0x95   : > { %8867 = vst [vmem:[#allocation8_spill] sm:$0xff] %v7161_v51 }
  0x96   : > { %5911 = vmatmul.mubr.msk.bf16.gmra.mxu0 %vm932_vm4, %v6849_v10  ;;  %v759_v59 = vsel %vm6641_vm10, %v750_v55, %v758_v57 }
  0x97   : > { %5914 = vmatprep.mubr.msk.bf16.mxu0 %vm932_vm4, %v6323_v43  ;;  %760 = vst [vmem:[#allocation2 + $0xc8] sm:$0x1] %v759_v59 }
  0x9b   : > { %5861 = vmatmul.mubr.msk.bf16.gmra.mxu1 %vm932_vm4, %v6849_v10 }
  0x9c   : > { %5864 = vmatprep.mubr.msk.bf16.mxu1 %vm932_vm4, %v6323_v43  ;;  %v7139_v43 = vld [vmem:[#allocation2 + $0x84] sm:$0xff]  }
  0x9e   : > { %5915 = vmatmul.mubr.msk.bf16.gmra.mxu0 %vm932_vm4, %v6324_v44 }
  0x9f   : > { %5918 = vmatprep.mubr.msk.bf16.mxu0 %vm932_vm4, %v6684_v33 }
  0xa3   : > { %5865 = vmatmul.mubr.msk.bf16.gmra.mxu1 %vm932_vm4, %v6324_v44 }
  0xa4   : > { %5868 = vmatprep.mubr.msk.bf16.mxu1 %vm932_vm4, %v6684_v33  ;;  %v749_v33 = vsel %vm6635_vm9, %v741_v61, %v748_v54 }
  0xa5   : > { %757 = vst.msk [vmem:[#allocation2 + $0xc4] sm:$0xf] %vm219_vm2, %v749_v33 }
  0xa6   : > { %5919 = vmatmul.mubr.msk.bf16.gmra.mxu0 %vm932_vm4, %v6701_v47 }
  0xa7   : > { %5922 = vmatprep.mubr.msk.bf16.mxu0 %vm932_vm4, %v6724_v6 }
  0xab   : > { %5869 = vmatmul.mubr.msk.bf16.gmra.mxu1 %vm932_vm4, %v6701_v47  ;;  %v7010_v47 = vld [vmem:[#allocation2 + $0x1c] sm:$0xff]  }
  0xac   : > { %5872 = vmatprep.mubr.msk.bf16.mxu1 %vm932_vm4, %v6724_v6  ;;  %v7015_v6 = vand.u32 %v5425_v24, %v6542_v4 }
  0xae   : > { %5923 = vmatmul.mubr.msk.bf16.gmra.mxu0 %vm932_vm4, %v6742_v40 }
  0xaf   : > { %5926 = vmatprep.mubr.msk.bf16.mxu0 %vm932_vm4, %v6770_v0 }
  0xb3   : > { %5873 = vmatmul.mubr.msk.bf16.gmra.mxu1 %vm932_vm4, %v6742_v40  ;;  %v5351_v40 = vld [vmem:[%s8830_s1 + $0xc] sm:$0x3] }
  0xb4   : > { %5876 = vmatprep.mubr.msk.bf16.mxu1 %vm932_vm4, %v6770_v0  ;;  %v7028_v0 = vld [vmem:[#allocation2 + $0x24] sm:$0xff]  }
  0xb6   : > { %5927 = vmatmul.mubr.msk.bf16.gmra.mxu0 %vm932_vm4, %v6779_v16 }
  0xb7   : > { %5930 = vmatprep.mubr.msk.bf16.mxu0 %vm932_vm4, %v6817_v19 }
  0xbb   : > { %5877 = vmatmul.mubr.msk.bf16.gmra.mxu1 %vm932_vm4, %v6779_v16  ;;  %v7031_v16 = vand.u32 %v5351_v40, %v6542_v4  ;;  %v7045_v4 = vld [vmem:[#allocation2 + $0x34] sm:$0xff]  }
  0xbc   : > { %5880 = vmatprep.mubr.msk.bf16.mxu1 %vm932_vm4, %v6817_v19  ;;  %v7033_v19 = vld [vmem:[#allocation2 + $0x2c] sm:$0xff]  }
  0xbe   : > { %5931 = vmatmul.mubr.msk.bf16.gmra.mxu0 %vm932_vm4, %v6832_v42 }
  0xbf   : > { %5934 = vmatprep.mubr.msk.bf16.mxu0 %vm932_vm4, %v6860_v22 }
  0xc3   : > { %5881 = vmatmul.mubr.msk.bf16.gmra.mxu1 %vm932_vm4, %v6832_v42  ;;  %v7047_v42 = vld [vmem:[#allocation2 + $0x3c] sm:$0xff]  }
  0xc4   : > { %5884 = vmatprep.mubr.msk.bf16.mxu1 %vm932_vm4, %v6860_v22 }
  0xc6   : > { %5935 = vmatmul.mubr.msk.bf16.gmra.mxu0 %vm932_vm4, %v6865_v31 }
  0xc7   : > { %5938 = vmatprep.mubr.msk.bf16.mxu0 %vm932_vm4, %v6880_v45 }
  0xcb   : > { %5885 = vmatmul.mubr.msk.bf16.gmra.mxu1 %vm932_vm4, %v6865_v31 }
  0xcc   : > { %5888 = vmatprep.mubr.msk.bf16.mxu1 %vm932_vm4, %v6880_v45 }
  0xce   : > { %5939 = vmatmul.mubr.msk.bf16.gmra.mxu0 %vm932_vm4, %v6887_v48 }
  0xcf   : > { %5994 = vmatprep.mubr.msk.bf16.mxu0 %vm932_vm4, %v6995_v21 }
  0xd3   : > { %5889 = vmatmul.mubr.msk.bf16.gmra.mxu1 %vm932_vm4, %v6887_v48 }
  0xd4   : > { %5944 = vmatprep.mubr.msk.bf16.mxu1 %vm932_vm4, %v6995_v21 }
  0xd6   : > { %5995 = vmatmul.mubr.msk.bf16.vlgmr.msra.gmra.mxu0 %vm932_vm4, %v7008_v29 }
  0xd7   : > { %6093 = vmatpush3.bf16.msra.mxu0 %v6892_v49  ;;  %5998 = vmatprep.mubr.msk.bf16.mxu0 %vm932_vm4, %v7010_v47 }
  0xd8   : > { %6192 = vmatprep.subr.bf16.mxu0 %v7015_v6 }
  0xdb   : > { %5945 = vmatmul.mubr.msk.bf16.vlgmr.msra.gmra.mxu1 %vm932_vm4, %v7008_v29 }
  0xdc   : > { %6043 = vmatpush3.bf16.msra.mxu1 %v6906_v52  ;;  %5948 = vmatprep.mubr.msk.bf16.mxu1 %vm932_vm4, %v7010_v47 }
  0xdd   : > { %6142 = vmatprep.subr.bf16.mxu1 %v7031_v16 }
  0xde   : > { %5999 = vmatmul.mubr.msk.bf16.gmra.mxu0 %vm932_vm4, %v7028_v0 }
  0xdf   : > { %6002 = vmatprep.mubr.msk.bf16.mxu0 %vm932_vm4, %v7033_v19 }
  0xe3   : > { %5949 = vmatmul.mubr.msk.bf16.gmra.mxu1 %vm932_vm4, %v7028_v0 }
  0xe4   : > { %5952 = vmatprep.mubr.msk.bf16.mxu1 %vm932_vm4, %v7033_v19 }
  0xe6   : > { %6003 = vmatmul.mubr.msk.bf16.gmra.mxu0 %vm932_vm4, %v7045_v4 }
  0xe7   : > { %6006 = vmatprep.mubr.msk.bf16.mxu0 %vm932_vm4, %v7047_v42 }
  0xeb   : > { %5953 = vmatmul.mubr.msk.bf16.gmra.mxu1 %vm932_vm4, %v7045_v4 }
  0xec   : > { %5956 = vmatprep.mubr.msk.bf16.mxu1 %vm932_vm4, %v7047_v42 }
  0xee   : > { %6007 = vmatmul.mubr.msk.bf16.gmra.mxu0 %vm932_vm4, %v7057_v60 }
  0xef   : > { %6010 = vmatprep.mubr.msk.bf16.mxu0 %vm932_vm4, %v7059_v62 }
  0xf3   : > { %5957 = vmatmul.mubr.msk.bf16.gmra.mxu1 %vm932_vm4, %v7057_v60 }
  0xf4   : > { %5960 = vmatprep.mubr.msk.bf16.mxu1 %vm932_vm4, %v7059_v62 }
  0xf6   : > { %6011 = vmatmul.mubr.msk.bf16.gmra.mxu0 %vm932_vm4, %v7069_v63 }
  0xf7   : > { %6014 = vmatprep.mubr.msk.bf16.mxu0 %vm932_vm4, %v7071_v1 }
  0xfb   : > { %5961 = vmatmul.mubr.msk.bf16.gmra.mxu1 %vm932_vm4, %v7069_v63  ;;  %v7087_v5 = vpop.f32.mrf.mxu0 }
  0xfc   : > { %5964 = vmatprep.mubr.msk.bf16.mxu1 %vm932_vm4, %v7071_v1 }
  0xfd   : > { %v7093_v10 = vpop.f32.mrf.mxu0 }
  0xfe   : > { %6015 = vmatmul.mubr.msk.bf16.gmra.mxu0 %vm932_vm4, %v7081_v3 }
  0xff   : > { %6018 = vmatprep.mubr.msk.bf16.mxu0 %vm932_vm4, %v7083_v9  ;;  %v5820_v11 = vpop.f32.mrf.mxu1  ;;  %v7097_v12 = vpop.f32.mrf.mxu0 }
 0x100   : > { %v1263_v25 = vrot.slane %v5820_v11, 1 }
 0x101   : > { %v7103_v15 = vpop.f32.mrf.mxu1  ;;  %v7105_v17 = vpop.f32.mrf.mxu0 }
 0x102   : > { %v8833_v31 = vrot.slane %v7103_v15, 1 }
 0x103   : > { %5965 = vmatmul.mubr.msk.bf16.gmra.mxu1 %vm932_vm4, %v7081_v3  ;;  %v5821_v22 = vpop.f32.mrf.mxu1  ;;  %v7111_v23 = vpop.f32.mrf.mxu0 }
 0x104   : > { %5968 = vmatprep.mubr.msk.bf16.mxu1 %vm932_vm4, %v7083_v9  ;;  %v1264_v26 = vrot.slane %v5821_v22, 1 }
 0x105   : > { %v1145_v27 = vpop.f32.mrf.mxu1  ;;  %v7118_v30 = vpop.f32.mrf.mxu0 }
 0x106   : > { %6019 = vmatmul.mubr.msk.bf16.gmra.mxu0 %vm932_vm4, %v7101_v14  ;;  %v1262_v34 = vrot.slane %v1145_v27, 1  ;;  %v7125_v35 = vsel %vm1287_vm11, %v1263_v25, %v1264_v26 }
 0x107   : > { %6022 = vmatprep.mubr.msk.bf16.mxu0 %vm932_vm4, %v7107_v20  ;;  %v7127_v36 = vpop.f32.mrf.mxu0 }
 0x108   : > { %v7133_v38 = vsel %vm1287_vm11, %v8833_v31, %v1262_v34  ;;  %v7137_v41 = vsel %vm1287_vm11, %v1262_v34, %v1263_v25  ;;  %v7201_v34 = vld [vmem:[#allocation2 + $0xac] sm:$0xff]  }
 0x109   : > { %v7141_v44 = vpop.f32.mrf.mxu0  ;;  %8875 = vst [vmem:[#allocation16_spill] sm:$0xff] %v7201_v34 }
 0x10a   : > { %v5824_v45 = vpop.f32.mrf.mxu1 }
 0x10b   : > { %5969 = vmatmul.mubr.msk.bf16.gmra.mxu1 %vm932_vm4, %v7101_v14  ;;  %v1267_v18 = vrot.slane %v5824_v45, 1 }
 0x10c   : > { %5972 = vmatprep.mubr.msk.bf16.mxu1 %vm932_vm4, %v7107_v20  ;;  %v1158_v48 = vpop.f32.mrf.mxu1 }
 0x10d   : > { %v1265_v49 = vrot.slane %v1158_v48, 1  ;;  %v7151_v50 = vpop.f32.mrf.mxu0 }
 0x10e   : > { %6023 = vmatmul.mubr.msk.bf16.gmra.mxu0 %vm932_vm4, %v7139_v43  ;;  %v5825_v52 = vpop.f32.mrf.mxu1 }
 0x10f   : > { %6026 = vmatprep.mubr.msk.bf16.mxu0 %vm932_vm4, %v7143_v46  ;;  %v1268_v28 = vrot.slane %v5825_v52, 1  ;;  %v7155_v32 = vpop.f32.mrf.mxu0  ;;  %v7159_v37 = vsel %vm1287_vm11, %v1264_v26, %v1265_v49  ;;  %v7195_v26 = vld [vmem:[#allocation2 + $0xa4] sm:$0xff]  }
 0x110   : > { %v1161_v58 = vpop.f32.mrf.mxu1  ;;  %8873 = vst [vmem:[#allocation14_spill] sm:$0xff] %v7195_v26 }
 0x111   : > { %v1266_v2 = vrot.slane %v1161_v58, 1  ;;  %v7163_v7 = vpop.f32.mrf.mxu0  ;;  %v7167_v39 = vsel %vm1287_vm11, %v1267_v18, %v1268_v28 }
 0x112   : > { %8868 = vst [vmem:[#allocation9_spill] sm:$0xff] %v7167_v39 }
 0x113   : > { %v5828_v61 = vpop.f32.mrf.mxu1  ;;  %5973 = vmatmul.mubr.msk.bf16.gmra.mxu1 %vm932_vm4, %v7139_v43  ;;  %v7175_v54 = vsel %vm1287_vm11, %v1265_v49, %v1266_v2  ;;  %v7179_v55 = vsel %vm1287_vm11, %v1266_v2, %v1267_v18  ;;  %v7185_v33 = vpop.f32.mrf.mxu0  ;;  %v7225_v2 = vld [vmem:[#allocation2 + $0xb4] sm:$0xff]  }
 0x114   : > { %8870 = vst [vmem:[#allocation11_spill] sm:$0xff] %v7175_v54  ;;  %8871 = vst [vmem:[#allocation12_spill] sm:$0xff] %v7179_v55  ;;  %5976 = vmatprep.mubr.msk.bf16.mxu1 %vm932_vm4, %v7143_v46  ;;  %v1271_v24 = vrot.slane %v5828_v61, 1  ;;  %v7287_v55 = vld [vmem:[#allocation2 + $0x20] sm:$0xff]  }
 0x115   : > { %v1174_v56 = vpop.f32.mrf.mxu1  ;;  %8878 = vst [vmem:[#allocation19_spill] sm:$0xff] %v7225_v2  ;;  %8888 = vst [vmem:[#allocation29_spill] sm:$0xff] %v7287_v55 }
 0x116   : > { %6027 = vmatmul.mubr.msk.bf16.gmra.mxu0 %vm932_vm4, %v7161_v51  ;;  %v1269_v57 = vrot.slane %v1174_v56, 1  ;;  %v7227_v56 = vld [vmem:[#allocation2 + $0xbc] sm:$0xff]  }
 0x117   : > { %v5829_v59 = vpop.f32.mrf.mxu1  ;;  %6030 = vmatprep.mubr.msk.bf16.mxu0 %vm932_vm4, %v7169_v53  ;;  %8879 = vst [vmem:[#allocation20_spill] sm:$0xff] %v7227_v56 }
 0x118   : > { %v1272_v40 = vrot.slane %v5829_v59, 1  ;;  %v7191_v8 = vsel %vm1287_vm11, %v1268_v28, %v1269_v57 }
 0x119   : > { %8872 = vst [vmem:[#allocation13_spill] sm:$0xff] %v7191_v8  ;;  %v1177_v11 = vpop.f32.mrf.mxu1  ;;  %v7193_v25 = vpop.f32.mrf.mxu0 }
 0x11a   : > { %v1270_v22 = vrot.slane %v1177_v11, 1  ;;  %v7199_v27 = vsel %vm1287_vm11, %v1271_v24, %v1272_v40 }
 0x11b   : > { %8874 = vst [vmem:[#allocation15_spill] sm:$0xff] %v7199_v27  ;;  %5977 = vmatmul.mubr.msk.bf16.gmra.mxu1 %vm932_vm4, %v7161_v51  ;;  %v7205_v45 = vpop.f32.mrf.mxu0 }
 0x11c   : > { %v7209_v48 = vsel %vm1287_vm11, %v1269_v57, %v1270_v22  ;;  %v7213_v49 = vsel %vm1287_vm11, %v1270_v22, %v1271_v24  ;;  %5980 = vmatprep.mubr.msk.bf16.mxu1 %vm932_vm4, %v7169_v53 }
 0x11d   : > { %8876 = vst [vmem:[#allocation17_spill] sm:$0xff] %v7209_v48  ;;  %8877 = vst [vmem:[#allocation18_spill] sm:$0xff] %v7213_v49  ;;  %v7219_v52 = vpop.f32.mrf.mxu0  ;;  %v7263_v48 = vld [vmem:[#allocation2 + $0x18] sm:$0xff]  }
 0x11e   : > { %6031 = vmatmul.mubr.msk.bf16.gmra.mxu0 %vm932_vm4, %v7195_v26  ;;  %8885 = vst [vmem:[#allocation26_spill] sm:$0xff] %v7263_v48 }
 0x11f   : > { %6034 = vmatprep.mubr.msk.bf16.mxu0 %vm932_vm4, %v7201_v34  ;;  %v5832_v18 = vpop.f32.mrf.mxu1  ;;  %v7223_v28 = vpop.f32.mrf.mxu0 }
 0x120   : > { %v1275_v59 = vrot.slane %v5832_v18, 1 }
 0x121   : > { %v1190_v58 = vpop.f32.mrf.mxu1 }
 0x122   : > { %v1273_v61 = vrot.slane %v1190_v58, 1 }
 0x123   : > { %5981 = vmatmul.mubr.msk.bf16.gmra.mxu1 %vm932_vm4, %v7195_v26  ;;  %v5833_v57 = vpop.f32.mrf.mxu1  ;;  %v7259_v26 = vld [vmem:[#allocation2 + $0xc4] sm:$0xff]  }
 0x124   : > { %v1276_v24 = vrot.slane %v5833_v57, 1  ;;  %v7231_v11 = vpop.f32.mrf.mxu0  ;;  %5984 = vmatprep.mubr.msk.bf16.mxu1 %vm932_vm4, %v7201_v34  ;;  %v7237_v22 = vsel %vm1287_vm11, %v1272_v40, %v1273_v61  ;;  %8884 = vst [vmem:[#allocation25_spill] sm:$0xff] %v7259_v26 }
 0x125   : > { %8880 = vst [vmem:[#allocation21_spill] sm:$0xff] %v7237_v22  ;;  %v1193_v31 = vpop.f32.mrf.mxu1 }
 0x126   : > { %6035 = vmatmul.mubr.msk.bf16.gmra.mxu0 %vm932_vm4, %v7225_v2  ;;  %v1274_v58 = vrot.slane %v1193_v31, 1  ;;  %v7241_v49 = vpop.f32.mrf.mxu0  ;;  %v7247_v18 = vsel %vm1287_vm11, %v1275_v59, %v1276_v24 }
 0x127   : > { %6038 = vmatprep.mubr.msk.bf16.mxu0 %vm932_vm4, %v7227_v56  ;;  %8881 = vst [vmem:[#allocation22_spill] sm:$0xff] %v7247_v18 }
 0x128   : > { %v7249_v57 = vpop.f32.mrf.mxu0  ;;  %v7253_v40 = vsel %vm1287_vm11, %v1273_v61, %v1274_v58  ;;  %v7257_v34 = vsel %vm1287_vm11, %v1274_v58, %v1275_v59 }
 0x129   : > { %8882 = vst [vmem:[#allocation23_spill] sm:$0xff] %v7253_v40  ;;  %8883 = vst [vmem:[#allocation24_spill] sm:$0xff] %v7257_v34  ;;  %v5836_v31 = vpop.f32.mrf.mxu1 }
 0x12a   : > { %v7261_v22 = vpop.f32.mrf.mxu0  ;;  %v1279_v59 = vrot.slane %v5836_v31, 1  ;;  %v7289_v31 = vld [vmem:[#allocation2 + $0x28] sm:$0xff]  }
 0x12b   : > { %5985 = vmatmul.mubr.msk.bf16.gmra.mxu1 %vm932_vm4, %v7225_v2  ;;  %v1206_v18 = vpop.f32.mrf.mxu1  ;;  %8889 = vst [vmem:[#allocation30_spill] sm:$0xff] %v7289_v31 }
 0x12c   : > { %v1277_v53 = vrot.slane %v1206_v18, 1  ;;  %5988 = vmatprep.mubr.msk.bf16.mxu1 %vm932_vm4, %v7227_v56 }
 0x12d   : > { %v5837_v61 = vpop.f32.mrf.mxu1 }
 0x12e   : > { %v7269_v40 = vpop.f32.mrf.mxu0  ;;  %6039 = vmatmul.mubr.msk.bf16.gmra.mxu0 %vm932_vm4, %v7259_v26  ;;  %v1280_v58 = vrot.slane %v5837_v61, 1  ;;  %v7277_v34 = vsel %vm1287_vm11, %v1276_v24, %v1277_v53 }
 0x12f   : > { %6094 = vmatprep.mubr.msk.bf16.mxu0 %vm932_vm4, %v7263_v48  ;;  %8886 = vst [vmem:[#allocation27_spill] sm:$0xff] %v7277_v34  ;;  %v1209_v2 = vpop.f32.mrf.mxu1 }
 0x130   : > { %v7279_v18 = vpop.f32.mrf.mxu0  ;;  %v1278_v27 = vrot.slane %v1209_v2, 1  ;;  %v7283_v56 = vsel %vm1287_vm11, %v1279_v59, %v1280_v58 }
 0x131   : > { %8887 = vst [vmem:[#allocation28_spill] sm:$0xff] %v7283_v56 }
 0x132   : > { %v7285_v51 = vpop.f32.mrf.mxu0  ;;  %v7293_v61 = vsel %vm1287_vm11, %v1277_v53, %v1278_v27  ;;  %v7297_v24 = vsel %vm1287_vm11, %v1278_v27, %v1279_v59  ;;  %v1240_v27 = vrot.slane %v7097_v12, 1  ;;  %v7321_v12 = vld [vmem:[#allocation2 + $0x30] sm:$0xff]  }
 0x133   : > { %8890 = vst [vmem:[#allocation31_spill] sm:$0xff] %v7293_v61  ;;  %8891 = vst [vmem:[#allocation32_spill] sm:$0xff] %v7297_v24  ;;  %v5840_v48 = vpop.f32.mrf.mxu1  ;;  %5989 = vmatmul.mubr.msk.bf16.gmra.mxu1 %vm932_vm4, %v7259_v26  ;;  %v1237_v24 = vrot.slane %v7093_v10, 1  ;;  %v7323_v10 = vld [vmem:[#allocation2 + $0x38] sm:$0xff]  }
 0x134   : > { %v7301_v2 = vpop.f32.mrf.mxu0  ;;  %6044 = vmatprep.mubr.msk.bf16.mxu1 %vm932_vm4, %v6995_v21  ;;  %v1283_v61 = vrot.slane %v5840_v48, 1  ;;  %8892 = vst [vmem:[#allocation33_spill] sm:$0xff] %v7321_v12  ;;  %8893 = vst [vmem:[#allocation34_spill] sm:$0xff] %v7323_v10 }
 0x135   : > { %v1222_v56 = vpop.f32.mrf.mxu1 }
 0x136   : > { %v5896_v34 = vpop.f32.mrf.mxu0  ;;  %6095 = vmatmul.mubr.msk.bf16.vlgmr.msra.gmra.mxu0 %vm932_vm4, %v7287_v55  ;;  %v1281_v53 = vrot.slane %v1222_v56, 1  ;;  %v1239_v56 = vrot.slane %v7087_v5, 1 }
 0x137   : > { %6193 = vmatpush3.bf16.msra.mxu0 %v7015_v6  ;;  %6098 = vmatprep.mubr.msk.bf16.mxu0 %vm932_vm4, %v7289_v31  ;;  %v5841_v59 = vpop.f32.mrf.mxu1  ;;  %v1238_v6 = vrot.slane %v7105_v17, 1  ;;  %v1796_v54 = vrot.slane %v5896_v34, 2  ;;  %v1241_v17 = vrot.slane %v7118_v30, 1 }
 0x138   : > { %v7311_v26 = vpop.f32.mrf.mxu0  ;;  %v1284_v21 = vrot.slane %v5841_v59, 1  ;;  %v7316_v8 = vsel %vm1287_vm11, %v1280_v58, %v1281_v53  ;;  %v1332_v34 = vsel %vm1287_vm11, %v1239_v56, %v1240_v27 }
 0x139   : > { %v1225_v55 = vpop.f32.mrf.mxu1 }
 0x13a   : > { %v5897_v31 = vpop.f32.mrf.mxu0  ;;  %v1282_v46 = vrot.slane %v1225_v55, 1  ;;  %v7327_v48 = vsel %vm1287_vm11, %v1283_v61, %v1284_v21  ;;  %v7331_v5 = vsel %vm1287_vm11, %v1284_v21, %v1237_v24 }
 0x13b   : > { %v1797_v39 = vrot.slane %v5897_v31, 2  ;;  %8894 = vst [vmem:[#allocation35_spill] sm:$0xff] %v7327_v48  ;;  %8895 = vst [vmem:[#allocation36_spill] sm:$0xff] %v7331_v5  ;;  %v5846_v58 = vpop.f32.mrf.mxu1  ;;  %6045 = vmatmul.mubr.msk.bf16.vlgmr.msra.gmra.mxu1 %vm932_vm4, %v7008_v29  ;;  %v1334_v29 = vsel %vm1287_vm11, %v1237_v24, %v1238_v6  ;;  %v1244_v24 = vrot.slane %v7127_v36, 1 }
 0x13c   : > { %v1606_v31 = vpop.f32.mrf.mxu0  ;;  %v1382_v59 = vadd.f32 %v5846_v58, %v1332_v34  ;;  %6143 = vmatpush3.bf16.msra.mxu1 %v7031_v16  ;;  %6048 = vmatprep.mubr.msk.bf16.mxu1 %vm932_vm4, %v7010_v47  ;;  %v7346_v30 = vsel %vm1287_vm11, %v1281_v53, %v1282_v46  ;;  %v7356_v16 = vsel %vm1287_vm11, %v1282_v46, %v1283_v61  ;;  %v8898_v58 = vrot.slane %v7311_v26, 2 }
 0x13d   : > { %v1887_v48 = vsel %vm1842_vm12, %v1796_v54, %v1797_v39  ;;  %v1795_v21 = vrot.slane %v1606_v31, 2  ;;  %8896 = vst [vmem:[#allocation37_spill] sm:$0xff] %v7346_v30  ;;  %v1373_v5 = vpop.f32.mrf.mxu1  ;;  %8897 = vst [vmem:[#allocation38_spill] sm:$0xff] %v7356_v16  ;;  %v1331_v46 = vsel %vm1287_vm11, %v1240_v27, %v1241_v17  ;;  %v7374_v16 = vld [vmem:[#allocation2 + $0x40] sm:$0xff]  }
 0x13e   : > { %v7350_v55 = vpop.f32.mrf.mxu0  ;;  %6099 = vmatmul.mubr.msk.bf16.gmra.mxu0 %vm932_vm4, %v7321_v12  ;;  %v1374_v34 = vadd.f32 %v1373_v5, %v1334_v29  ;;  %v1893_v47 = vadd.f32 %v1887_v48, %v1382_v59  ;;  %v1243_v12 = vrot.slane %v7111_v23, 1  ;;  %v1242_v5 = vrot.slane %v7141_v44, 1 }
 0x13f   : > { %v1889_v53 = vsel %vm1842_vm12, %v8898_v58, %v1795_v21  ;;  %6102 = vmatprep.mubr.msk.bf16.mxu0 %vm932_vm4, %v7323_v10  ;;  %v5847_v31 = vpop.f32.mrf.mxu1  ;;  %v1333_v29 = vsel %vm1287_vm11, %v1238_v6, %v1239_v56  ;;  %v1888_v36 = vsel %vm1842_vm12, %v1795_v21, %v1796_v54  ;;  %v1800_v27 = vrot.slane %v7350_v55, 2 }
 0x140   : > { %v1619_v30 = vpop.f32.mrf.mxu0  ;;  %1942 = vst.msk [vmem:[#allocation3 + $0x10] sm:$0xff] %vm1939_vm13, %v1893_v47  ;;  %v1891_v61 = vadd.f32 %v1889_v53, %v1374_v34  ;;  %v1385_v59 = vadd.f32 %v5847_v31, %v1331_v46  ;;  %v7380_v34 = vld [vmem:[#allocation2 + $0x48] sm:$0xff]   ;;  %v1245_v56 = vrot.slane %v7155_v32, 1  ;;  %v1328_v6 = vsel %vm1287_vm11, %v1243_v12, %v1244_v24 }
 0x141   : > { %v1798_v48 = vrot.slane %v1619_v30, 2  ;;  %v1376_v58 = vpop.f32.mrf.mxu1  ;;  %v1330_v32 = vsel %vm1287_vm11, %v1241_v17, %v1242_v5 }
 0x142   : > { %v5901_v10 = vpop.f32.mrf.mxu0  ;;  %1940 = vst.msk [vmem:[#allocation3] sm:$0xff] %vm1939_vm13, %v1891_v61  ;;  %v1377_v23 = vadd.f32 %v1376_v58, %v1333_v29  ;;  %v1327_v58 = vsel %vm1287_vm11, %v1244_v24, %v1245_v56 }
 0x143   : > { %v1886_v30 = vsel %vm1842_vm12, %v1797_v39, %v1798_v48  ;;  %v1801_v44 = vrot.slane %v5901_v10, 2  ;;  %v5850_v54 = vpop.f32.mrf.mxu1  ;;  %6049 = vmatmul.mubr.msk.bf16.gmra.mxu1 %vm932_vm4, %v7028_v0 }
 0x144   : > { %v1894_v21 = vadd.f32 %v1886_v30, %v1385_v59  ;;  %v1622_v47 = vpop.f32.mrf.mxu0  ;;  %v1892_v53 = vadd.f32 %v1888_v36, %v1377_v23  ;;  %v1398_v31 = vadd.f32 %v5850_v54, %v1328_v6  ;;  %6052 = vmatprep.mubr.msk.bf16.mxu1 %vm932_vm4, %v7033_v19  ;;  %v1248_v19 = vrot.slane %v7163_v7, 1 }
 0x145   : > { %v1883_v55 = vsel %vm1842_vm12, %v1800_v27, %v1801_v44  ;;  %v1799_v39 = vrot.slane %v1622_v47, 2  ;;  %v1389_v10 = vpop.f32.mrf.mxu1  ;;  %v1329_v23 = vsel %vm1287_vm11, %v1242_v5, %v1243_v12  ;;  %v1247_v6 = vrot.slane %v7151_v50, 1  ;;  %v7419_v50 = vld [vmem:[#allocation2 + $0x58] sm:$0xff]  }
 0x146   : > { %1943 = vst.msk [vmem:[#allocation3 + $0x18] sm:$0xff] %vm1939_vm13, %v1894_v21  ;;  %v7394_v46 = vpop.f32.mrf.mxu0  ;;  %6103 = vmatmul.mubr.msk.bf16.gmra.mxu0 %vm932_vm4, %v7374_v16  ;;  %1941 = vst.msk [vmem:[#allocation3 + $0x8] sm:$0xff] %vm1939_vm13, %v1892_v53  ;;  %v1390_v0 = vadd.f32 %v1389_v10, %v1330_v32  ;;  %v1897_v61 = vadd.f32 %v1883_v55, %v1398_v31  ;;  %v7413_v53 = vld [vmem:[#allocation2 + $0x50] sm:$0xff]  }
 0x147   : > { %v1885_v59 = vsel %vm1842_vm12, %v1798_v48, %v1799_v39  ;;  %6106 = vmatprep.mubr.msk.bf16.mxu0 %vm932_vm4, %v7380_v34  ;;  %v5851_v29 = vpop.f32.mrf.mxu1  ;;  %v1246_v48 = vrot.slane %v7185_v33, 1  ;;  %v1884_v7 = vsel %vm1842_vm12, %v1799_v39, %v1800_v27  ;;  %v1804_v31 = vrot.slane %v7394_v46, 2 }
 0x148   : > { %v1635_v17 = vpop.f32.mrf.mxu0  ;;  %1946 = vst.msk [vmem:[#allocation3 + $0x30] sm:$0xff] %vm1939_vm13, %v1897_v61  ;;  %v1895_v36 = vadd.f32 %v1885_v59, %v1390_v0  ;;  %v1401_v54 = vadd.f32 %v5851_v29, %v1327_v58  ;;  %v1249_v33 = vrot.slane %v7205_v45, 1  ;;  %v1324_v55 = vsel %vm1287_vm11, %v1247_v6, %v1248_v19 }
 0x149   : > { %v1802_v30 = vrot.slane %v1635_v17, 2  ;;  %v1392_v21 = vpop.f32.mrf.mxu1  ;;  %v1326_v45 = vsel %vm1287_vm11, %v1245_v56, %v1246_v48 }
 0x14a   : > { %v5905_v47 = vpop.f32.mrf.mxu0  ;;  %1944 = vst.msk [vmem:[#allocation3 + $0x20] sm:$0xff] %vm1939_vm13, %v1895_v36  ;;  %v1393_v24 = vadd.f32 %v1392_v21, %v1329_v23  ;;  %v1323_v36 = vsel %vm1287_vm11, %v1248_v19, %v1249_v33 }
 0x14b   : > { %v1882_v12 = vsel %vm1842_vm12, %v1801_v44, %v1802_v30  ;;  %v1805_v5 = vrot.slane %v5905_v47, 2  ;;  %v5854_v27 = vpop.f32.mrf.mxu1  ;;  %6053 = vmatmul.mubr.msk.bf16.gmra.mxu1 %vm932_vm4, %v7045_v4 }
 0x14c   : > { %v1898_v39 = vadd.f32 %v1882_v12, %v1401_v54  ;;  %v1638_v32 = vpop.f32.mrf.mxu0  ;;  %v1896_v10 = vadd.f32 %v1884_v7, %v1393_v24  ;;  %v1414_v0 = vadd.f32 %v5854_v27, %v1324_v55  ;;  %6056 = vmatprep.mubr.msk.bf16.mxu1 %vm932_vm4, %v7047_v42  ;;  %v1252_v42 = vrot.slane %v7219_v52, 1  ;;  %v7452_v55 = vld [vmem:[#allocation2 + $0x60] sm:$0xff]  }
 0x14d   : > { %v1879_v46 = vsel %vm1842_vm12, %v1804_v31, %v1805_v5  ;;  %v1803_v44 = vrot.slane %v1638_v32, 2  ;;  %v1405_v61 = vpop.f32.mrf.mxu1  ;;  %v1325_v54 = vsel %vm1287_vm11, %v1246_v48, %v1247_v6  ;;  %v1251_v7 = vrot.slane %v7193_v25, 1  ;;  %v7458_v25 = vld [vmem:[#allocation2 + $0x68] sm:$0xff]  }
 0x14e   : > { %1947 = vst.msk [vmem:[#allocation3 + $0x38] sm:$0xff] %vm1939_vm13, %v1898_v39  ;;  %v7433_v59 = vpop.f32.mrf.mxu0  ;;  %6107 = vmatmul.mubr.msk.bf16.gmra.mxu0 %vm932_vm4, %v7413_v53  ;;  %1945 = vst.msk [vmem:[#allocation3 + $0x28] sm:$0xff] %vm1939_vm13, %v1896_v10  ;;  %v1406_v4 = vadd.f32 %v1405_v61, %v1326_v45  ;;  %v1901_v29 = vadd.f32 %v1879_v46, %v1414_v0 }
 0x14f   : > { %v1881_v17 = vsel %vm1842_vm12, %v1802_v30, %v1803_v44  ;;  %6110 = vmatprep.mubr.msk.bf16.mxu0 %vm932_vm4, %v7419_v50  ;;  %v5855_v58 = vpop.f32.mrf.mxu1  ;;  %v1250_v30 = vrot.slane %v7223_v28, 1  ;;  %v1880_v52 = vsel %vm1842_vm12, %v1803_v44, %v1804_v31  ;;  %v1808_v27 = vrot.slane %v7433_v59, 2 }
 0x150   : > { %v1651_v56 = vpop.f32.mrf.mxu0  ;;  %1950 = vst.msk [vmem:[#allocation3 + $0x50] sm:$0xff] %vm1939_vm13, %v1901_v29  ;;  %v1899_v23 = vadd.f32 %v1881_v17, %v1406_v4  ;;  %v1417_v47 = vadd.f32 %v5855_v58, %v1323_v36  ;;  %v1253_v28 = vrot.slane %v7241_v49, 1  ;;  %v1320_v39 = vsel %vm1287_vm11, %v1251_v7, %v1252_v42 }
 0x151   : > { %v1806_v21 = vrot.slane %v1651_v56, 2  ;;  %v1408_v24 = vpop.f32.mrf.mxu1  ;;  %v1322_v49 = vsel %vm1287_vm11, %v1249_v33, %v1250_v30  ;;  %v1321_v56 = vsel %vm1287_vm11, %v1250_v30, %v1251_v7 }
 0x152   : > { %v5909_v12 = vpop.f32.mrf.mxu0  ;;  %1948 = vst.msk [vmem:[#allocation3 + $0x40] sm:$0xff] %vm1939_vm13, %v1899_v23  ;;  %v1409_v19 = vadd.f32 %v1408_v24, %v1325_v54  ;;  %v1319_v17 = vsel %vm1287_vm11, %v1252_v42, %v1253_v28  ;;  %v1255_v23 = vrot.slane %v7231_v11, 1  ;;  %v1254_v54 = vrot.slane %v7261_v22, 1  ;;  %v7497_v11 = vld [vmem:[#allocation2 + $0x78] sm:$0xff]  }
 0x153   : > { %v1878_v6 = vsel %vm1842_vm12, %v1805_v5, %v1806_v21  ;;  %v1809_v48 = vrot.slane %v5909_v12, 2  ;;  %v5858_v31 = vpop.f32.mrf.mxu1  ;;  %6057 = vmatmul.mubr.msk.bf16.gmra.mxu1 %vm932_vm4, %v7057_v60  ;;  %v1257_v22 = vrot.slane %v7279_v18, 1 }
 0x154   : > { %v1902_v32 = vadd.f32 %v1878_v6, %v1417_v47  ;;  %v1654_v10 = vpop.f32.mrf.mxu0  ;;  %v1900_v0 = vadd.f32 %v1880_v52, %v1409_v19  ;;  %v1430_v46 = vadd.f32 %v5858_v31, %v1320_v39  ;;  %6060 = vmatprep.mubr.msk.bf16.mxu1 %vm932_vm4, %v7059_v62  ;;  %v1256_v62 = vrot.slane %v7249_v57, 1  ;;  %v7491_v52 = vld [vmem:[#allocation2 + $0x70] sm:$0xff]  }
 0x155   : > { %v1875_v44 = vsel %vm1842_vm12, %v1808_v27, %v1809_v48  ;;  %v1807_v5 = vrot.slane %v1654_v10, 2  ;;  %v1421_v45 = vpop.f32.mrf.mxu1  ;;  %v1318_v18 = vsel %vm1287_vm11, %v1253_v28, %v1254_v54 }
 0x156   : > { %1951 = vst.msk [vmem:[#allocation3 + $0x58] sm:$0xff] %vm1939_vm13, %v1902_v32  ;;  %v7472_v61 = vpop.f32.mrf.mxu0  ;;  %6111 = vmatmul.mubr.msk.bf16.gmra.mxu0 %vm932_vm4, %v7452_v55  ;;  %1949 = vst.msk [vmem:[#allocation3 + $0x48] sm:$0xff] %vm1939_vm13, %v1900_v0  ;;  %v1422_v60 = vadd.f32 %v1421_v45, %v1322_v49  ;;  %v1905_v59 = vadd.f32 %v1875_v44, %v1430_v46  ;;  %v1316_v19 = vsel %vm1287_vm11, %v1255_v23, %v1256_v62 }
 0x157   : > { %v1877_v4 = vsel %vm1842_vm12, %v1806_v21, %v1807_v5  ;;  %6114 = vmatprep.mubr.msk.bf16.mxu0 %vm932_vm4, %v7458_v25  ;;  %v5859_v29 = vpop.f32.mrf.mxu1  ;;  %v1876_v57 = vsel %vm1842_vm12, %v1807_v5, %v1808_v27  ;;  %v1812_v12 = vrot.slane %v7472_v61, 2  ;;  %v1315_v28 = vsel %vm1287_vm11, %v1256_v62, %v1257_v22 }
 0x158   : > { %v1667_v33 = vpop.f32.mrf.mxu0  ;;  %1954 = vst.msk [vmem:[#allocation3 + $0x70] sm:$0xff] %vm1939_vm13, %v1905_v59  ;;  %v1903_v58 = vadd.f32 %v1877_v4, %v1422_v60  ;;  %v1433_v21 = vadd.f32 %v5859_v29, %v1319_v17  ;;  %v1317_v60 = vsel %vm1287_vm11, %v1254_v54, %v1255_v23  ;;  %v1259_v4 = vrot.slane %v7269_v40, 1 }
 0x159   : > { %v1810_v36 = vrot.slane %v1667_v33, 2  ;;  %v1424_v47 = vpop.f32.mrf.mxu1  ;;  %v1258_v29 = vrot.slane %v7301_v2, 1 }
 0x15a   : > { %v5913_v24 = vpop.f32.mrf.mxu0  ;;  %1952 = vst.msk [vmem:[#allocation3 + $0x60] sm:$0xff] %vm1939_vm13, %v1903_v58  ;;  %v1425_v42 = vadd.f32 %v1424_v47, %v1321_v56  ;;  %v7528_v56 = vld [vmem:[#allocation2 + $0x80] sm:$0xff]  }
 0x15b   : > { %v1874_v7 = vsel %vm1842_vm12, %v1809_v48, %v1810_v36  ;;  %v1813_v30 = vrot.slane %v5913_v24, 2  ;;  %v5862_v27 = vpop.f32.mrf.mxu1  ;;  %6061 = vmatmul.mubr.msk.bf16.gmra.mxu1 %vm932_vm4, %v7069_v63 }
 0x15c   : > { %v1906_v6 = vadd.f32 %v1874_v7, %v1433_v21  ;;  %v1670_v39 = vpop.f32.mrf.mxu0  ;;  %v1904_v31 = vadd.f32 %v1876_v57, %v1425_v42  ;;  %v1446_v32 = vadd.f32 %v5862_v27, %v1316_v19  ;;  %6064 = vmatprep.mubr.msk.bf16.mxu1 %vm932_vm4, %v7071_v1  ;;  %v1260_v1 = vrot.slane %v7285_v51, 1  ;;  %v7533_v21 = vld [vmem:[#allocation2 + $0x88] sm:$0xff]  }
 0x15d   : > { %v1871_v10 = vsel %vm1842_vm12, %v1812_v12, %v1813_v30  ;;  %v1811_v48 = vrot.slane %v1670_v39, 2  ;;  %v1437_v0 = vpop.f32.mrf.mxu1 }
 0x15e   : > { %1955 = vst.msk [vmem:[#allocation3 + $0x78] sm:$0xff] %vm1939_vm13, %v1906_v6  ;;  %v5916_v46 = vpop.f32.mrf.mxu0  ;;  %6115 = vmatmul.mubr.msk.bf16.gmra.mxu0 %vm932_vm4, %v7491_v52  ;;  %1953 = vst.msk [vmem:[#allocation3 + $0x68] sm:$0xff] %vm1939_vm13, %v1904_v31  ;;  %v1438_v63 = vadd.f32 %v1437_v0, %v1318_v18  ;;  %v1909_v44 = vadd.f32 %v1871_v10, %v1446_v32  ;;  %v1312_v40 = vsel %vm1287_vm11, %v1259_v4, %v1260_v1 }
 0x15f   : > { %v1873_v5 = vsel %vm1842_vm12, %v1810_v36, %v1811_v48  ;;  %6118 = vmatprep.mubr.msk.bf16.mxu0 %vm932_vm4, %v7497_v11  ;;  %v5863_v49 = vpop.f32.mrf.mxu1  ;;  %v1872_v51 = vsel %vm1842_vm12, %v1811_v48, %v1812_v12  ;;  %v1816_v36 = vrot.slane %v5916_v46, 2  ;;  %v1313_v0 = vsel %vm1287_vm11, %v1258_v29, %v1259_v4 }
 0x160   : > { %v1683_v45 = vpop.f32.mrf.mxu0  ;;  %1958 = vst.msk [vmem:[#allocation3 + $0x90] sm:$0xff] %vm1939_vm13, %v1909_v44  ;;  %v1907_v61 = vadd.f32 %v1873_v5, %v1438_v63  ;;  %v1449_v33 = vadd.f32 %v5863_v49, %v1315_v28  ;;  %v7562_v5 = vld [vmem:[#allocation2 + $0x90] sm:$0xff]   ;;  %v7567_v28 = vld [vmem:[#allocation2 + $0x98] sm:$0xff]  }
 0x161   : > { %v1814_v59 = vrot.slane %v1683_v45, 2  ;;  %v1440_v17 = vpop.f32.mrf.mxu1 }
 0x162   : > { %v5917_v58 = vpop.f32.mrf.mxu0  ;;  %1956 = vst.msk [vmem:[#allocation3 + $0x80] sm:$0xff] %vm1939_vm13, %v1907_v61  ;;  %v1441_v62 = vadd.f32 %v1440_v17, %v1317_v60 }
 0x163   : > { %v1870_v23 = vsel %vm1842_vm12, %v1813_v30, %v1814_v59  ;;  %v1817_v54 = vrot.slane %v5917_v58, 2  ;;  %v5866_v2 = vpop.f32.mrf.mxu1  ;;  %6065 = vmatmul.mubr.msk.bf16.gmra.mxu1 %vm932_vm4, %v7081_v3  ;;  %v1314_v30 = vsel %vm1287_vm11, %v1257_v22, %v1258_v29  ;;  %v8899_v22 = vrot.slane %v7103_v15, 1 }
 0x164   : > { %v1910_v47 = vadd.f32 %v1870_v23, %v1449_v33  ;;  %v1686_v57 = vpop.f32.mrf.mxu0  ;;  %v1908_v24 = vadd.f32 %v1872_v51, %v1441_v62  ;;  %v1462_v42 = vadd.f32 %v5866_v2, %v1312_v40  ;;  %6068 = vmatprep.mubr.msk.bf16.mxu1 %vm932_vm4, %v7083_v9 }
 0x165   : > { %v1867_v12 = vsel %vm1842_vm12, %v1816_v36, %v1817_v54  ;;  %v1815_v7 = vrot.slane %v1686_v57, 2  ;;  %v1453_v19 = vpop.f32.mrf.mxu1  ;;  %v1311_v32 = vsel %vm1287_vm11, %v1260_v1, %v8899_v22  ;;  %v7589_v57 = vld [vmem:[#allocation2 + $0xa0] sm:$0xff]  }
 0x166   : > { %1959 = vst.msk [vmem:[#allocation3 + $0x98] sm:$0xff] %vm1939_vm13, %v1910_v47  ;;  %v5920_v27 = vpop.f32.mrf.mxu0  ;;  %6119 = vmatmul.mubr.msk.bf16.gmra.mxu0 %vm932_vm4, %v7528_v56  ;;  %1957 = vst.msk [vmem:[#allocation3 + $0x88] sm:$0xff] %vm1939_vm13, %v1908_v24  ;;  %v1454_v3 = vadd.f32 %v1453_v19, %v1314_v30  ;;  %v1913_v6 = vadd.f32 %v1867_v12, %v1462_v42  ;;  %v7595_v30 = vld [vmem:[#allocation2 + $0xa8] sm:$0xff]  }
 0x167   : > { %v1869_v39 = vsel %vm1842_vm12, %v1814_v59, %v1815_v7  ;;  %6122 = vmatprep.mubr.msk.bf16.mxu0 %vm932_vm4, %v7533_v21  ;;  %v5867_v9 = vpop.f32.mrf.mxu1  ;;  %v1868_v63 = vsel %vm1842_vm12, %v1815_v7, %v1816_v36  ;;  %v1820_v15 = vrot.slane %v5920_v27, 2 }
 0x168   : > { %v1699_v31 = vpop.f32.mrf.mxu0  ;;  %1962 = vst.msk [vmem:[#allocation3 + $0xb0] sm:$0xff] %vm1939_vm13, %v1913_v6  ;;  %v1911_v10 = vadd.f32 %v1869_v39, %v1454_v3  ;;  %v1465_v18 = vadd.f32 %v5867_v9, %v1311_v32  ;;  %v8900_v6 = vld [vmem:[#allocation9_spill] sm:$0xff] }
 0x169   : > { %v1818_v48 = vrot.slane %v1699_v31, 2  ;;  %v1456_v46 = vpop.f32.mrf.mxu1  ;;  %v8901_v31 = vld [vmem:[#allocation7_spill] sm:$0xff] }
 0x16a   : > { %v5921_v44 = vpop.f32.mrf.mxu0  ;;  %1960 = vst.msk [vmem:[#allocation3 + $0xa0] sm:$0xff] %vm1939_vm13, %v1911_v10  ;;  %v1457_v49 = vadd.f32 %v1456_v46, %v1313_v0 }
 0x16b   : > { %v1866_v1 = vsel %vm1842_vm12, %v1817_v54, %v1818_v48  ;;  %v1821_v45 = vrot.slane %v5921_v44, 2  ;;  %v5870_v61 = vpop.f32.mrf.mxu1  ;;  %6069 = vmatmul.mubr.msk.bf16.gmra.mxu1 %vm932_vm4, %v7101_v14 }
 0x16c   : > { %v1914_v60 = vadd.f32 %v1866_v1, %v1465_v18  ;;  %v1702_v59 = vpop.f32.mrf.mxu0  ;;  %v1912_v4 = vadd.f32 %v1868_v63, %v1457_v49  ;;  %v1478_v29 = vadd.f32 %v5870_v61, %v7125_v35  ;;  %6072 = vmatprep.mubr.msk.bf16.mxu1 %vm932_vm4, %v7107_v20  ;;  %v8903_v49 = vld [vmem:[#allocation13_spill] sm:$0xff] }
 0x16d   : > { %v1863_v33 = vsel %vm1842_vm12, %v1820_v15, %v1821_v45  ;;  %v1819_v17 = vrot.slane %v1702_v59, 2  ;;  %v1469_v51 = vpop.f32.mrf.mxu1  ;;  %v8904_v59 = vld [vmem:[#allocation12_spill] sm:$0xff] }
 0x16e   : > { %1963 = vst.msk [vmem:[#allocation3 + $0xb8] sm:$0xff] %vm1939_vm13, %v1914_v60  ;;  %v5924_v58 = vpop.f32.mrf.mxu0  ;;  %6123 = vmatmul.mubr.msk.bf16.gmra.mxu0 %vm932_vm4, %v7562_v5  ;;  %1961 = vst.msk [vmem:[#allocation3 + $0xa8] sm:$0xff] %vm1939_vm13, %v1912_v4  ;;  %v1470_v14 = vadd.f32 %v1469_v51, %v7133_v38  ;;  %v1917_v62 = vadd.f32 %v1863_v33, %v1478_v29  ;;  %v7617_v60 = vld [vmem:[#allocation2 + $0xb0] sm:$0xff]   ;;  %v7623_v51 = vld [vmem:[#allocation2 + $0xb8] sm:$0xff]  }
 0x16f   : > { %v1865_v35 = vsel %vm1842_vm12, %v1818_v48, %v1819_v17  ;;  %6126 = vmatprep.mubr.msk.bf16.mxu0 %vm932_vm4, %v7567_v28  ;;  %v5871_v36 = vpop.f32.mrf.mxu1  ;;  %v1864_v47 = vsel %vm1842_vm12, %v1819_v17, %v1820_v15  ;;  %v1824_v42 = vrot.slane %v5924_v58, 2 }
 0x170   : > { %v1715_v20 = vpop.f32.mrf.mxu0  ;;  %1966 = vst.msk [vmem:[#allocation3 + $0xd0] sm:$0xff] %vm1939_vm13, %v1917_v62  ;;  %v1915_v23 = vadd.f32 %v1865_v35, %v1470_v14  ;;  %v1481_v40 = vadd.f32 %v5871_v36, %v7159_v37  ;;  %v8905_v14 = vld [vmem:[#allocation8_spill] sm:$0xff] }
 0x171   : > { %v1822_v54 = vrot.slane %v1715_v20, 2  ;;  %v1472_v2 = vpop.f32.mrf.mxu1  ;;  %v8906_v20 = vld [vmem:[#allocation15_spill] sm:$0xff] }
 0x172   : > { %v5925_v38 = vpop.f32.mrf.mxu0  ;;  %1964 = vst.msk [vmem:[#allocation3 + $0xc0] sm:$0xff] %vm1939_vm13, %v1915_v23  ;;  %v1473_v24 = vadd.f32 %v1472_v2, %v7137_v41  ;;  %v8907_v2 = vld [vmem:[#allocation10_spill] sm:$0xff] }
 0x173   : > { %v1862_v12 = vsel %vm1842_vm12, %v1821_v45, %v1822_v54  ;;  %v1825_v7 = vrot.slane %v5925_v38, 2  ;;  %v5874_v19 = vpop.f32.mrf.mxu1  ;;  %6073 = vmatmul.mubr.msk.bf16.gmra.mxu1 %vm932_vm4, %v7139_v43  ;;  %v8902_v43 = vld [vmem:[#allocation11_spill] sm:$0xff] }
 0x174   : > { %v1918_v37 = vadd.f32 %v1862_v12, %v1481_v40  ;;  %v1718_v27 = vpop.f32.mrf.mxu0  ;;  %v1916_v3 = vadd.f32 %v1864_v47, %v1473_v24  ;;  %v1494_v39 = vadd.f32 %v5874_v19, %v8900_v6  ;;  %6076 = vmatprep.mubr.msk.bf16.mxu1 %vm932_vm4, %v8901_v31  ;;  %v8908_v24 = vld [vmem:[#allocation17_spill] sm:$0xff] }
 0x175   : > { %v1859_v9 = vsel %vm1842_vm12, %v1824_v42, %v1825_v7  ;;  %v1823_v41 = vrot.slane %v1718_v27, 2  ;;  %v1485_v22 = vpop.f32.mrf.mxu1  ;;  %v8909_v6 = vld [vmem:[#allocation21_spill] sm:$0xff] }
 0x176   : > { %1967 = vst.msk [vmem:[#allocation3 + $0xd8] sm:$0xff] %vm1939_vm13, %v1918_v37  ;;  %v5928_v32 = vpop.f32.mrf.mxu0  ;;  %6127 = vmatmul.mubr.msk.bf16.gmra.mxu0 %vm932_vm4, %v7589_v57  ;;  %1965 = vst.msk [vmem:[#allocation3 + $0xc8] sm:$0xff] %vm1939_vm13, %v1916_v3  ;;  %v1486_v10 = vadd.f32 %v1485_v22, %v8902_v43  ;;  %v1921_v48 = vadd.f32 %v1859_v9, %v1494_v39  ;;  %v7645_v22 = vld [vmem:[#allocation2 + $0xc0] sm:$0xff]  }
 0x177   : > { %v1861_v18 = vsel %vm1842_vm12, %v1822_v54, %v1823_v41  ;;  %6130 = vmatprep.mubr.msk.bf16.mxu0 %vm932_vm4, %v7595_v30  ;;  %v5875_v0 = vpop.f32.mrf.mxu1  ;;  %v1860_v45 = vsel %vm1842_vm12, %v1823_v41, %v1824_v42  ;;  %v1828_v29 = vrot.slane %v5928_v32, 2  ;;  %v8910_v32 = vld [vmem:[#allocation18_spill] sm:$0xff] }
 0x178   : > { %v1731_v46 = vpop.f32.mrf.mxu0  ;;  %1970 = vst.msk [vmem:[#allocation3 + $0xf0] sm:$0xff] %vm1939_vm13, %v1921_v48  ;;  %v1919_v63 = vadd.f32 %v1861_v18, %v1486_v10  ;;  %v1497_v15 = vadd.f32 %v5875_v0, %v8903_v49  ;;  %v7651_v0 = vld [vmem:[#allocation2 + $0xc8] sm:$0xff]  }
 0x179   : > { %v1826_v44 = vrot.slane %v1731_v46, 2  ;;  %v1488_v1 = vpop.f32.mrf.mxu1 }
 0x17a   : > { %v5929_v61 = vpop.f32.mrf.mxu0  ;;  %1968 = vst.msk [vmem:[#allocation3 + $0xe0] sm:$0xff] %vm1939_vm13, %v1919_v63  ;;  %v1489_v4 = vadd.f32 %v1488_v1, %v8904_v59  ;;  %v8911_v63 = vld [vmem:[#allocation14_spill] sm:$0xff] }
 0x17b   : > { %v1858_v33 = vsel %vm1842_vm12, %v1825_v7, %v1826_v44  ;;  %v1829_v17 = vrot.slane %v5929_v61, 2  ;;  %v5878_v58 = vpop.f32.mrf.mxu1  ;;  %6077 = vmatmul.mubr.msk.bf16.gmra.mxu1 %vm932_vm4, %v8905_v14  ;;  %v8912_v1 = vld [vmem:[#allocation22_spill] sm:$0xff] }
 0x17c   : > { %v1922_v62 = vadd.f32 %v1858_v33, %v1497_v15  ;;  %v1734_v35 = vpop.f32.mrf.mxu0  ;;  %v1920_v36 = vadd.f32 %v1860_v45, %v1489_v4  ;;  %v1510_v23 = vadd.f32 %v5878_v58, %v8906_v20  ;;  %6080 = vmatprep.mubr.msk.bf16.mxu1 %vm932_vm4, %v8907_v2  ;;  %v8913_v4 = vld [vmem:[#allocation16_spill] sm:$0xff] }
 0x17d   : > { %v1855_v54 = vsel %vm1842_vm12, %v1828_v29, %v1829_v17  ;;  %v1827_v40 = vrot.slane %v1734_v35, 2  ;;  %v1501_v47 = vpop.f32.mrf.mxu1 }
 0x17e   : > { %1971 = vst.msk [vmem:[#allocation3 + $0xf8] sm:$0xff] %vm1939_vm13, %v1922_v62  ;;  %v5932_v38 = vpop.f32.mrf.mxu0  ;;  %6131 = vmatmul.mubr.msk.bf16.gmra.mxu0 %vm932_vm4, %v7617_v60  ;;  %1969 = vst.msk [vmem:[#allocation3 + $0xe8] sm:$0xff] %vm1939_vm13, %v1920_v36  ;;  %v1502_v42 = vadd.f32 %v1501_v47, %v8908_v24  ;;  %v1925_v12 = vadd.f32 %v1855_v54, %v1510_v23  ;;  %v8915_v54 = vld [vmem:[#allocation27_spill] sm:$0xff]  ;;  %v7673_v24 = vld [vmem:[#allocation2 + $0xd0] sm:$0xff]  }
 0x17f   : > { %v1857_v7 = vsel %vm1842_vm12, %v1826_v44, %v1827_v40  ;;  %6134 = vmatprep.mubr.msk.bf16.mxu0 %vm932_vm4, %v7623_v51  ;;  %v5879_v19 = vpop.f32.mrf.mxu1  ;;  %v1856_v41 = vsel %vm1842_vm12, %v1827_v40, %v1828_v29  ;;  %v1832_v10 = vrot.slane %v5932_v38, 2 }
 0x180   : > { %v1747_v37 = vpop.f32.mrf.mxu0  ;;  %1974 = vst.msk [vmem:[#allocation3 + $0x110] sm:$0xff] %vm1939_vm13, %v1925_v12  ;;  %v1923_v27 = vadd.f32 %v1857_v7, %v1502_v42  ;;  %v1513_v39 = vadd.f32 %v5879_v19, %v8909_v6  ;;  %v8916_v42 = vld [vmem:[#allocation24_spill] sm:$0xff] }
 0x181   : > { %v1830_v3 = vrot.slane %v1747_v37, 2  ;;  %v1504_v9 = vpop.f32.mrf.mxu1 }
 0x182   : > { %v5933_v31 = vpop.f32.mrf.mxu0  ;;  %1972 = vst.msk [vmem:[#allocation3 + $0x100] sm:$0xff] %vm1939_vm13, %v1923_v27  ;;  %v1505_v43 = vadd.f32 %v1504_v9, %v8910_v32 }
 0x183   : > { %v1854_v48 = vsel %vm1842_vm12, %v1829_v17, %v1830_v3  ;;  %v1833_v18 = vrot.slane %v5933_v31, 2  ;;  %v5882_v46 = vpop.f32.mrf.mxu1  ;;  %6081 = vmatmul.mubr.msk.bf16.gmra.mxu1 %vm932_vm4, %v8911_v63  ;;  %v8914_v17 = vld [vmem:[#allocation23_spill] sm:$0xff] }
 0x184   : > { %v1926_v44 = vadd.f32 %v1854_v48, %v1513_v39  ;;  %v1750_v49 = vpop.f32.mrf.mxu0  ;;  %v1924_v15 = vadd.f32 %v1856_v41, %v1505_v43  ;;  %v1526_v45 = vadd.f32 %v5882_v46, %v8912_v1  ;;  %6084 = vmatprep.mubr.msk.bf16.mxu1 %vm932_vm4, %v8913_v4  ;;  %v8918_v41 = vld [vmem:[#allocation28_spill] sm:$0xff]  ;;  %v8920_v46 = vld [vmem:[#allocation31_spill] sm:$0xff] }
 0x185   : > { %v1851_v61 = vsel %vm1842_vm12, %v1832_v10, %v1833_v18  ;;  %v1831_v59 = vrot.slane %v1750_v49, 2  ;;  %v1517_v29 = vpop.f32.mrf.mxu1 }
 0x186   : > { %1975 = vst.msk [vmem:[#allocation3 + $0x118] sm:$0xff] %vm1939_vm13, %v1926_v44  ;;  %v5936_v33 = vpop.f32.mrf.mxu0  ;;  %6135 = vmatmul.mubr.msk.bf16.gmra.mxu0 %vm932_vm4, %v7645_v22  ;;  %1973 = vst.msk [vmem:[#allocation3 + $0x108] sm:$0xff] %vm1939_vm13, %v1924_v15  ;;  %v1518_v58 = vadd.f32 %v1517_v29, %v8914_v17  ;;  %v1929_v14 = vadd.f32 %v1851_v61, %v1526_v45  ;;  %v8921_v15 = vld [vmem:[#allocation26_spill] sm:$0xff] }
 0x187   : > { %v1853_v62 = vsel %vm1842_vm12, %v1830_v3, %v1831_v59  ;;  %6138 = vmatprep.mubr.msk.bf16.mxu0 %vm932_vm4, %v7651_v0  ;;  %v5883_v35 = vpop.f32.mrf.mxu1  ;;  %v1852_v47 = vsel %vm1842_vm12, %v1831_v59, %v1832_v10  ;;  %v1836_v7 = vrot.slane %v5936_v33, 2  ;;  %v8917_v3 = vld [vmem:[#allocation19_spill] sm:$0xff]  ;;  %v8919_v10 = vld [vmem:[#allocation20_spill] sm:$0xff] }
 0x188   : > { %v1763_v36 = vpop.f32.mrf.mxu0  ;;  %1978 = vst.msk [vmem:[#allocation3 + $0x130] sm:$0xff] %vm1939_vm13, %v1929_v14  ;;  %v1927_v20 = vadd.f32 %v1853_v62, %v1518_v58  ;;  %v1529_v40 = vadd.f32 %v5883_v35, %v8915_v54  ;;  %v8922_v58 = vld [vmem:[#allocation32_spill] sm:$0xff] }
 0x189   : > { %v1834_v23 = vrot.slane %v1763_v36, 2  ;;  %v1520_v2 = vpop.f32.mrf.mxu1 }
 0x18a   : > { %v5937_v38 = vpop.f32.mrf.mxu0  ;;  %1976 = vst.msk [vmem:[#allocation3 + $0x120] sm:$0xff] %vm1939_vm13, %v1927_v20  ;;  %v1521_v12 = vadd.f32 %v1520_v2, %v8916_v42  ;;  %v8924_v2 = vld [vmem:[#allocation35_spill] sm:$0xff] }
 0x18b   : > { %v1850_v19 = vsel %vm1842_vm12, %v1833_v18, %v1834_v23  ;;  %v1837_v37 = vrot.slane %v5937_v38, 2  ;;  %v5886_v27 = vpop.f32.mrf.mxu1  ;;  %6085 = vmatmul.mubr.msk.bf16.gmra.mxu1 %vm932_vm4, %v8917_v3 }
 0x18c   : > { %v1930_v6 = vadd.f32 %v1850_v19, %v1529_v40  ;;  %v1766_v39 = vpop.f32.mrf.mxu0  ;;  %v1928_v9 = vadd.f32 %v1852_v47, %v1521_v12  ;;  %v1542_v31 = vadd.f32 %v5886_v27, %v8918_v41  ;;  %6088 = vmatprep.mubr.msk.bf16.mxu1 %vm932_vm4, %v8919_v10  ;;  %v8925_v19 = vld [vmem:[#allocation29_spill] sm:$0xff] }
 0x18d   : > { %v1847_v32 = vsel %vm1842_vm12, %v1836_v7, %v1837_v37  ;;  %v1835_v43 = vrot.slane %v1766_v39, 2  ;;  %v1533_v48 = vpop.f32.mrf.mxu1 }
 0x18e   : > { %1979 = vst.msk [vmem:[#allocation3 + $0x138] sm:$0xff] %vm1939_vm13, %v1930_v6  ;;  %v5940_v18 = vpop.f32.mrf.mxu0  ;;  %6139 = vmatmul.mubr.msk.bf16.gmra.mxu0 %vm932_vm4, %v7673_v24  ;;  %1977 = vst.msk [vmem:[#allocation3 + $0x128] sm:$0xff] %vm1939_vm13, %v1928_v9  ;;  %v1534_v63 = vadd.f32 %v1533_v48, %v8920_v46  ;;  %v1933_v44 = vadd.f32 %v1847_v32, %v1542_v31  ;;  %v8927_v6 = vld [vmem:[#allocation30_spill] sm:$0xff]  ;;  %v8928_v9 = vrot.slane %v7311_v26, 2 }
 0x18f   : > { %v1849_v49 = vsel %vm1842_vm12, %v1834_v23, %v1835_v43  ;;  %6194 = vmatprep.mubr.msk.bf16.mxu0 %vm932_vm4, %v8921_v15  ;;  %v5887_v1 = vpop.f32.mrf.mxu1  ;;  %v1848_v33 = vsel %vm1842_vm12, %v1835_v43, %v1836_v7  ;;  %v1840_v62 = vrot.slane %v5940_v18, 2  ;;  %v8923_v23 = vld [vmem:[#allocation25_spill] sm:$0xff]  ;;  %v8929_v43 = vld [vmem:[#allocation36_spill] sm:$0xff]  ;;  %v8930_v26 = vld [vmem:[#allocation38_spill] sm:$0xff] }
 0x190   : > { %v1779_v45 = vpop.f32.mrf.mxu0  ;;  %1982 = vst.msk [vmem:[#allocation3 + $0x150] sm:$0xff] %vm1939_vm13, %v1933_v44  ;;  %v1931_v61 = vadd.f32 %v1849_v49, %v1534_v63  ;;  %v1545_v4 = vadd.f32 %v5887_v1, %v7316_v8 }
 0x191   : > { %v1838_v59 = vrot.slane %v1779_v45, 2  ;;  %v1536_v29 = vpop.f32.mrf.mxu1 }
 0x192   : > { %v5941_v17 = vpop.f32.mrf.mxu0  ;;  %1980 = vst.msk [vmem:[#allocation3 + $0x140] sm:$0xff] %vm1939_vm13, %v1931_v61  ;;  %v1537_v14 = vadd.f32 %v1536_v29, %v8922_v58  ;;  %v8932_v29 = vld [vmem:[#allocation34_spill] sm:$0xff] }
 0x193   : > { %v1846_v35 = vsel %vm1842_vm12, %v1837_v37, %v1838_v59  ;;  %v1841_v36 = vrot.slane %v5941_v17, 2  ;;  %v5890_v20 = vpop.f32.mrf.mxu1  ;;  %6089 = vmatmul.mubr.msk.bf16.gmra.mxu1 %vm932_vm4, %v8923_v23  ;;  %v8926_v37 = vld [vmem:[#allocation37_spill] sm:$0xff] }
 0x194   : > { %v1934_v54 = vadd.f32 %v1846_v35, %v1545_v4  ;;  %v1782_v8 = vpop.f32.mrf.mxu0  ;;  %v1932_v40 = vadd.f32 %v1848_v33, %v1537_v14  ;;  %v1558_v47 = vadd.f32 %v5890_v20, %v8924_v2  ;;  %6144 = vmatprep.mubr.msk.bf16.mxu1 %vm932_vm4, %v8921_v15  ;;  %v8931_v4 = vld [vmem:[#allocation33_spill] sm:$0xff] }
 0x195   : > { %v1843_v38 = vsel %vm1842_vm12, %v1840_v62, %v1841_v36  ;;  %v1549_v42 = vpop.f32.mrf.mxu1  ;;  %v1839_v12 = vrot.slane %v1782_v8, 2  ;;  %v1890_v41 = vsel %vm1842_vm12, %v1841_v36, %v8928_v9 }
 0x196   : > { %1983 = vst.msk [vmem:[#allocation3 + $0x158] sm:$0xff] %vm1939_vm13, %v1934_v54  ;;  %v5996_v7 = vpop.f32.mrf.mxu0  ;;  %6195 = vmatmul.mubr.msk.bf16.vlgmr.msra.gmra.mxu0 %vm932_vm4, %v8925_v19  ;;  %1981 = vst.msk [vmem:[#allocation3 + $0x148] sm:$0xff] %vm1939_vm13, %v1932_v40  ;;  %v1550_v27 = vadd.f32 %v1549_v42, %v8926_v37  ;;  %v1937_v3 = vadd.f32 %v1843_v38, %v1558_v47 }
 0x197   : > { %6198 = vmatprep.mubr.msk.bf16.mxu0 %vm932_vm4, %v8927_v6  ;;  %v5891_v39 = vpop.f32.mrf.mxu1  ;;  %v1845_v31 = vsel %vm1842_vm12, %v1838_v59, %v1839_v12  ;;  %v1844_v46 = vsel %vm1842_vm12, %v1839_v12, %v1840_v62 }
 0x198   : > { %v2593_v32 = vpop.f32.mrf.mxu0  ;;  %1986 = vst.msk [vmem:[#allocation3 + $0x170] sm:$0xff] %vm1939_vm13, %v1937_v3  ;;  %v1561_v10 = vadd.f32 %v5891_v39, %v8929_v43  ;;  %v1935_v48 = vadd.f32 %v1845_v31, %v1550_v27 }
 0x199   : > { %v1552_v18 = vpop.f32.mrf.mxu1 }
 0x19a   : > { %v5997_v63 = vpop.f32.mrf.mxu0  ;;  %v1938_v44 = vadd.f32 %v1890_v41, %v1561_v10  ;;  %1984 = vst.msk [vmem:[#allocation3 + $0x160] sm:$0xff] %vm1939_vm13, %v1935_v48  ;;  %v1553_v49 = vadd.f32 %v1552_v18, %v8930_v26 }
 0x19b   : > { %v5946_v15 = vpop.f32.mrf.mxu1  ;;  %6145 = vmatmul.mubr.msk.bf16.vlgmr.msra.gmra.mxu1 %vm932_vm4, %v8925_v19 }
 0x19c   : > { %v2596_v1 = vpop.f32.mrf.mxu0  ;;  %1987 = vst.msk [vmem:[#allocation3 + $0x178] sm:$0xff] %vm1939_vm13, %v1938_v44  ;;  %v1936_v45 = vadd.f32 %v1844_v46, %v1553_v49  ;;  %6148 = vmatprep.mubr.msk.bf16.mxu1 %vm932_vm4, %v8927_v6  ;;  %v2462_v58 = vrot.slane %v5946_v15, 1 }
 0x19d   : > { %v7734_v61 = vpop.f32.mrf.mxu1 }
 0x19e   : > { %v6000_v59 = vpop.f32.mrf.mxu0  ;;  %6199 = vmatmul.mubr.msk.bf16.gmra.mxu0 %vm932_vm4, %v8931_v4  ;;  %1985 = vst.msk [vmem:[#allocation3 + $0x168] sm:$0xff] %vm1939_vm13, %v1936_v45  ;;  %v8852_v36 = vrot.slane %v7734_v61, 1 }
 0x19f   : > { %6202 = vmatprep.mubr.msk.bf16.mxu0 %vm932_vm4, %v8932_v29  ;;  %v5947_v33 = vpop.f32.mrf.mxu1 }
 0x1a0   : > { %v2609_v17 = vpop.f32.mrf.mxu0  ;;  %v2463_v14 = vrot.slane %v5947_v33, 1 }
 0x1a1   : > { %v2272_v62 = vpop.f32.mrf.mxu1 }
 0x1a2   : > { %v6001_v35 = vpop.f32.mrf.mxu0  ;;  %v2552_v20 = vsel %vm1287_vm11, %v2462_v58, %v2463_v14  ;;  %v2461_v23 = vrot.slane %v2272_v62, 1 }
 0x1a3   : > { %v7744_v54 = vadd.f32 %v5996_v7, %v2552_v20  ;;  %v5950_v8 = vpop.f32.mrf.mxu1  ;;  %6149 = vmatmul.mubr.msk.bf16.gmra.mxu1 %vm932_vm4, %v8931_v4 }
 0x1a4   : > { %v2612_v40 = vpop.f32.mrf.mxu0  ;;  %v2553_v2 = vsel %vm1287_vm11, %v2461_v23, %v2462_v58  ;;  %v2554_v47 = vsel %vm1287_vm11, %v8852_v36, %v2461_v23  ;;  %6152 = vmatprep.mubr.msk.bf16.mxu1 %vm932_vm4, %v8932_v29  ;;  %v2466_v3 = vrot.slane %v5950_v8, 1 }
 0x1a5   : > { %v7756_v38 = vadd.f32 %v2593_v32, %v2554_v47  ;;  %v7758_v42 = vadd.f32 %v2596_v1, %v2553_v2  ;;  %v2285_v12 = vpop.f32.mrf.mxu1 }
 0x1a6   : > { %v6004_v7 = vpop.f32.mrf.mxu0  ;;  %6203 = vmatmul.mubr.msk.bf16.gmra.mxu0 %vm932_vm4, %v7374_v16  ;;  %v2464_v19 = vrot.slane %v2285_v12, 1 }
 0x1a7   : > { %6206 = vmatprep.mubr.msk.bf16.mxu0 %vm932_vm4, %v7380_v34  ;;  %v5951_v37 = vpop.f32.mrf.mxu1 }
 0x1a8   : > { %v2625_v27 = vpop.f32.mrf.mxu0  ;;  %v2551_v6 = vsel %vm1287_vm11, %v2463_v14, %v2464_v19  ;;  %v2467_v39 = vrot.slane %v5951_v37, 1 }
 0x1a9   : > { %v7766_v9 = vadd.f32 %v5997_v63, %v2551_v6  ;;  %v2288_v41 = vpop.f32.mrf.mxu1 }
 0x1aa   : > { %v6005_v31 = vpop.f32.mrf.mxu0  ;;  %v2548_v32 = vsel %vm1287_vm11, %v2466_v3, %v2467_v39  ;;  %v2465_v43 = vrot.slane %v2288_v41, 1 }
 0x1ab   : > { %v7770_v10 = vadd.f32 %v6000_v59, %v2548_v32  ;;  %v5954_v48 = vpop.f32.mrf.mxu1  ;;  %6153 = vmatmul.mubr.msk.bf16.gmra.mxu1 %vm932_vm4, %v7374_v16 }
 0x1ac   : > { %v2628_v18 = vpop.f32.mrf.mxu0  ;;  %v2549_v46 = vsel %vm1287_vm11, %v2465_v43, %v2466_v3  ;;  %v2550_v63 = vsel %vm1287_vm11, %v2464_v19, %v2465_v43  ;;  %6156 = vmatprep.mubr.msk.bf16.mxu1 %vm932_vm4, %v7380_v34  ;;  %v2470_v59 = vrot.slane %v5954_v48, 1 }
 0x1ad   : > { %v7780_v44 = vadd.f32 %v2609_v17, %v2550_v63  ;;  %v7782_v26 = vadd.f32 %v2612_v40, %v2549_v46  ;;  %v2301_v49 = vpop.f32.mrf.mxu1 }
 0x1ae   : > { %v6008_v15 = vpop.f32.mrf.mxu0  ;;  %6207 = vmatmul.mubr.msk.bf16.gmra.mxu0 %vm932_vm4, %v7413_v53  ;;  %v2468_v16 = vrot.slane %v2301_v49, 1 }
 0x1af   : > { %6210 = vmatprep.mubr.msk.bf16.mxu0 %vm932_vm4, %v7419_v50  ;;  %v5955_v1 = vpop.f32.mrf.mxu1 }
 0x1b0   : > { %v2641_v45 = vpop.f32.mrf.mxu0  ;;  %v2547_v4 = vsel %vm1287_vm11, %v2467_v39, %v2468_v16  ;;  %v2471_v34 = vrot.slane %v5955_v1, 1 }
 0x1b1   : > { %v7790_v29 = vadd.f32 %v6001_v35, %v2547_v4  ;;  %v2304_v33 = vpop.f32.mrf.mxu1 }
 0x1b2   : > { %v6009_v17 = vpop.f32.mrf.mxu0  ;;  %v2544_v58 = vsel %vm1287_vm11, %v2470_v59, %v2471_v34  ;;  %v2469_v14 = vrot.slane %v2304_v33, 1 }
 0x1b3   : > { %v7794_v62 = vadd.f32 %v6004_v7, %v2544_v58  ;;  %v5958_v20 = vpop.f32.mrf.mxu1  ;;  %6157 = vmatmul.mubr.msk.bf16.gmra.mxu1 %vm932_vm4, %v7413_v53 }
 0x1b4   : > { %v2644_v23 = vpop.f32.mrf.mxu0  ;;  %v2545_v8 = vsel %vm1287_vm11, %v2469_v14, %v2470_v59  ;;  %v2546_v35 = vsel %vm1287_vm11, %v2468_v16, %v2469_v14  ;;  %6160 = vmatprep.mubr.msk.bf16.mxu1 %vm932_vm4, %v7419_v50  ;;  %v2474_v37 = vrot.slane %v5958_v20, 1 }
 0x1b5   : > { %v7804_v40 = vadd.f32 %v2625_v27, %v2546_v35  ;;  %v7806_v2 = vadd.f32 %v2628_v18, %v2545_v8  ;;  %v2317_v47 = vpop.f32.mrf.mxu1 }
 0x1b6   : > { %v6012_v12 = vpop.f32.mrf.mxu0  ;;  %6211 = vmatmul.mubr.msk.bf16.gmra.mxu0 %vm932_vm4, %v7452_v55  ;;  %v2472_v53 = vrot.slane %v2317_v47, 1 }
 0x1b7   : > { %6214 = vmatprep.mubr.msk.bf16.mxu0 %vm932_vm4, %v7458_v25  ;;  %v5959_v7 = vpop.f32.mrf.mxu1 }
 0x1b8   : > { %v2657_v19 = vpop.f32.mrf.mxu0  ;;  %v2543_v3 = vsel %vm1287_vm11, %v2471_v34, %v2472_v53  ;;  %v2475_v50 = vrot.slane %v5959_v7, 1 }
 0x1b9   : > { %v7814_v27 = vadd.f32 %v6005_v31, %v2543_v3  ;;  %v2320_v6 = vpop.f32.mrf.mxu1 }
 0x1ba   : > { %v6013_v39 = vpop.f32.mrf.mxu0  ;;  %v2540_v41 = vsel %vm1287_vm11, %v2474_v37, %v2475_v50  ;;  %v2473_v32 = vrot.slane %v2320_v6, 1 }
 0x1bb   : > { %v7818_v43 = vadd.f32 %v6008_v15, %v2540_v41  ;;  %v5962_v48 = vpop.f32.mrf.mxu1  ;;  %6161 = vmatmul.mubr.msk.bf16.gmra.mxu1 %vm932_vm4, %v7452_v55 }
 0x1bc   : > { %v2660_v18 = vpop.f32.mrf.mxu0  ;;  %v2541_v46 = vsel %vm1287_vm11, %v2473_v32, %v2474_v37  ;;  %v2542_v31 = vsel %vm1287_vm11, %v2472_v53, %v2473_v32  ;;  %6164 = vmatprep.mubr.msk.bf16.mxu1 %vm932_vm4, %v7458_v25  ;;  %v2478_v4 = vrot.slane %v5962_v48, 1 }
 0x1bd   : > { %v7828_v63 = vadd.f32 %v2641_v45, %v2542_v31  ;;  %v7830_v49 = vadd.f32 %v2644_v23, %v2541_v46  ;;  %v2333_v15 = vpop.f32.mrf.mxu1 }
 0x1be   : > { %v6016_v16 = vpop.f32.mrf.mxu0  ;;  %6215 = vmatmul.mubr.msk.bf16.gmra.mxu0 %vm932_vm4, %v7491_v52  ;;  %v2476_v55 = vrot.slane %v2333_v15, 1 }
 0x1bf   : > { %6218 = vmatprep.mubr.msk.bf16.mxu0 %vm932_vm4, %v7497_v11  ;;  %v5963_v1 = vpop.f32.mrf.mxu1 }
 0x1c0   : > { %v2673_v59 = vpop.f32.mrf.mxu0  ;;  %v2539_v34 = vsel %vm1287_vm11, %v2475_v50, %v2476_v55  ;;  %v2479_v25 = vrot.slane %v5963_v1, 1 }
 0x1c1   : > { %v7838_v45 = vadd.f32 %v6009_v17, %v2539_v34  ;;  %v2336_v33 = vpop.f32.mrf.mxu1 }
 0x1c2   : > { %v6017_v58 = vpop.f32.mrf.mxu0  ;;  %v2536_v14 = vsel %vm1287_vm11, %v2478_v4, %v2479_v25  ;;  %v2477_v20 = vrot.slane %v2336_v33, 1 }
 0x1c3   : > { %v7842_v23 = vadd.f32 %v6012_v12, %v2536_v14  ;;  %v5966_v8 = vpop.f32.mrf.mxu1  ;;  %6165 = vmatmul.mubr.msk.bf16.gmra.mxu1 %vm932_vm4, %v7491_v52 }
 0x1c4   : > { %v2676_v35 = vpop.f32.mrf.mxu0  ;;  %v2537_v47 = vsel %vm1287_vm11, %v2477_v20, %v2478_v4  ;;  %v2538_v17 = vsel %vm1287_vm11, %v2476_v55, %v2477_v20  ;;  %6168 = vmatprep.mubr.msk.bf16.mxu1 %vm932_vm4, %v7497_v11  ;;  %v2482_v6 = vrot.slane %v5966_v8, 1 }
 0x1c5   : > { %v7852_v53 = vadd.f32 %v2657_v19, %v2538_v17  ;;  %v7854_v7 = vadd.f32 %v2660_v18, %v2537_v47  ;;  %v2349_v12 = vpop.f32.mrf.mxu1 }
 0x1c6   : > { %v6020_v37 = vpop.f32.mrf.mxu0  ;;  %6219 = vmatmul.mubr.msk.bf16.gmra.mxu0 %vm932_vm4, %v7528_v56  ;;  %v2480_v52 = vrot.slane %v2349_v12, 1 }
 0x1c7   : > { %6222 = vmatprep.mubr.msk.bf16.mxu0 %vm932_vm4, %v7533_v21  ;;  %v5967_v3 = vpop.f32.mrf.mxu1 }
 0x1c8   : > { %v2689_v50 = vpop.f32.mrf.mxu0  ;;  %v2535_v41 = vsel %vm1287_vm11, %v2479_v25, %v2480_v52  ;;  %v2483_v11 = vrot.slane %v5967_v3, 1 }
 0x1c9   : > { %v7862_v19 = vadd.f32 %v6013_v39, %v2535_v41  ;;  %v2352_v32 = vpop.f32.mrf.mxu1 }
 0x1ca   : > { %v6021_v48 = vpop.f32.mrf.mxu0  ;;  %v2532_v18 = vsel %vm1287_vm11, %v2482_v6, %v2483_v11  ;;  %v2481_v46 = vrot.slane %v2352_v32, 1 }
 0x1cb   : > { %v7866_v31 = vadd.f32 %v6016_v16, %v2532_v18  ;;  %v5970_v15 = vpop.f32.mrf.mxu1  ;;  %6169 = vmatmul.mubr.msk.bf16.gmra.mxu1 %vm932_vm4, %v7528_v56 }
 0x1cc   : > { %v2692_v55 = vpop.f32.mrf.mxu0  ;;  %v2533_v1 = vsel %vm1287_vm11, %v2481_v46, %v2482_v6  ;;  %v2534_v39 = vsel %vm1287_vm11, %v2480_v52, %v2481_v46  ;;  %6172 = vmatprep.mubr.msk.bf16.mxu1 %vm932_vm4, %v7533_v21  ;;  %v2486_v20 = vrot.slane %v5970_v15, 1 }
 0x1cd   : > { %v7876_v4 = vadd.f32 %v2673_v59, %v2534_v39  ;;  %v7878_v34 = vadd.f32 %v2676_v35, %v2533_v1  ;;  %v2365_v16 = vpop.f32.mrf.mxu1 }
 0x1ce   : > { %v6024_v25 = vpop.f32.mrf.mxu0  ;;  %6223 = vmatmul.mubr.msk.bf16.gmra.mxu0 %vm932_vm4, %v7562_v5  ;;  %v2484_v56 = vrot.slane %v2365_v16, 1 }
 0x1cf   : > { %6226 = vmatprep.mubr.msk.bf16.mxu0 %vm932_vm4, %v7567_v28  ;;  %v5971_v33 = vpop.f32.mrf.mxu1 }
 0x1d0   : > { %v2705_v14 = vpop.f32.mrf.mxu0  ;;  %v2531_v8 = vsel %vm1287_vm11, %v2483_v11, %v2484_v56  ;;  %v2487_v21 = vrot.slane %v5971_v33, 1 }
 0x1d1   : > { %v7886_v59 = vadd.f32 %v6017_v58, %v2531_v8  ;;  %v2368_v35 = vpop.f32.mrf.mxu1 }
 0x1d2   : > { %v6025_v47 = vpop.f32.mrf.mxu0  ;;  %v2528_v17 = vsel %vm1287_vm11, %v2486_v20, %v2487_v21  ;;  %v2485_v12 = vrot.slane %v2368_v35, 1 }
 0x1d3   : > { %v7890_v52 = vadd.f32 %v6020_v37, %v2528_v17  ;;  %v5974_v3 = vpop.f32.mrf.mxu1  ;;  %6173 = vmatmul.mubr.msk.bf16.gmra.mxu1 %vm932_vm4, %v7562_v5 }
 0x1d4   : > { %v2708_v6 = vpop.f32.mrf.mxu0  ;;  %v2529_v41 = vsel %vm1287_vm11, %v2485_v12, %v2486_v20  ;;  %v2530_v58 = vsel %vm1287_vm11, %v2484_v56, %v2485_v12  ;;  %6176 = vmatprep.mubr.msk.bf16.mxu1 %vm932_vm4, %v7567_v28  ;;  %v2490_v1 = vrot.slane %v5974_v3, 1 }
 0x1d5   : > { %v7900_v11 = vadd.f32 %v2689_v50, %v2530_v58  ;;  %v7902_v32 = vadd.f32 %v2692_v55, %v2529_v41  ;;  %v2381_v37 = vpop.f32.mrf.mxu1 }
 0x1d6   : > { %v6028_v18 = vpop.f32.mrf.mxu0  ;;  %6227 = vmatmul.mubr.msk.bf16.gmra.mxu0 %vm932_vm4, %v7589_v57  ;;  %v2488_v5 = vrot.slane %v2381_v37, 1 }
 0x1d7   : > { %6230 = vmatprep.mubr.msk.bf16.mxu0 %vm932_vm4, %v7595_v30  ;;  %v5975_v46 = vpop.f32.mrf.mxu1 }
 0x1d8   : > { %v2721_v15 = vpop.f32.mrf.mxu0  ;;  %v2527_v39 = vsel %vm1287_vm11, %v2487_v21, %v2488_v5  ;;  %v2491_v28 = vrot.slane %v5975_v46, 1 }
 0x1d9   : > { %v7910_v50 = vadd.f32 %v6021_v48, %v2527_v39  ;;  %v2384_v55 = vpop.f32.mrf.mxu1 }
 0x1da   : > { %v6029_v16 = vpop.f32.mrf.mxu0  ;;  %v2524_v56 = vsel %vm1287_vm11, %v2490_v1, %v2491_v28  ;;  %v2489_v33 = vrot.slane %v2384_v55, 1 }
 0x1db   : > { %v7914_v20 = vadd.f32 %v6024_v25, %v2524_v56  ;;  %v5978_v8 = vpop.f32.mrf.mxu1  ;;  %6177 = vmatmul.mubr.msk.bf16.gmra.mxu1 %vm932_vm4, %v7589_v57 }
 0x1dc   : > { %v2724_v35 = vpop.f32.mrf.mxu0  ;;  %v2525_v17 = vsel %vm1287_vm11, %v2489_v33, %v2490_v1  ;;  %v2526_v48 = vsel %vm1287_vm11, %v2488_v5, %v2489_v33  ;;  %6180 = vmatprep.mubr.msk.bf16.mxu1 %vm932_vm4, %v7595_v30  ;;  %v2494_v37 = vrot.slane %v5978_v8, 1 }
 0x1dd   : > { %v7924_v21 = vadd.f32 %v2705_v14, %v2526_v48  ;;  %v7926_v12 = vadd.f32 %v2708_v6, %v2525_v17  ;;  %v2397_v25 = vpop.f32.mrf.mxu1 }
 0x1de   : > { %v6032_v3 = vpop.f32.mrf.mxu0  ;;  %6231 = vmatmul.mubr.msk.bf16.gmra.mxu0 %vm932_vm4, %v7617_v60  ;;  %v2492_v57 = vrot.slane %v2397_v25, 1 }
 0x1df   : > { %6234 = vmatprep.mubr.msk.bf16.mxu0 %vm932_vm4, %v7623_v51  ;;  %v5979_v41 = vpop.f32.mrf.mxu1 }
 0x1e0   : > { %v2737_v58 = vpop.f32.mrf.mxu0  ;;  %v2523_v5 = vsel %vm1287_vm11, %v2491_v28, %v2492_v57  ;;  %v2495_v30 = vrot.slane %v5979_v41, 1 }
 0x1e1   : > { %v7934_v14 = vadd.f32 %v6025_v47, %v2523_v5  ;;  %v2400_v6 = vpop.f32.mrf.mxu1 }
 0x1e2   : > { %v6033_v46 = vpop.f32.mrf.mxu0  ;;  %v2520_v1 = vsel %vm1287_vm11, %v2494_v37, %v2495_v30  ;;  %v2493_v39 = vrot.slane %v2400_v6, 1 }
 0x1e3   : > { %v7938_v55 = vadd.f32 %v6028_v18, %v2520_v1  ;;  %v5982_v56 = vpop.f32.mrf.mxu1  ;;  %6181 = vmatmul.mubr.msk.bf16.gmra.mxu1 %vm932_vm4, %v7617_v60 }
 0x1e4   : > { %v2740_v33 = vpop.f32.mrf.mxu0  ;;  %v2521_v8 = vsel %vm1287_vm11, %v2493_v39, %v2494_v37  ;;  %v2522_v47 = vsel %vm1287_vm11, %v2492_v57, %v2493_v39  ;;  %6184 = vmatprep.mubr.msk.bf16.mxu1 %vm932_vm4, %v7623_v51  ;;  %v2498_v37 = vrot.slane %v5982_v56, 1 }
 0x1e5   : > { %v7948_v28 = vadd.f32 %v2721_v15, %v2522_v47  ;;  %v7950_v17 = vadd.f32 %v2724_v35, %v2521_v8  ;;  %v2413_v18 = vpop.f32.mrf.mxu1 }
 0x1e6   : > { %v6036_v48 = vpop.f32.mrf.mxu0  ;;  %6235 = vmatmul.mubr.msk.bf16.gmra.mxu0 %vm932_vm4, %v7645_v22  ;;  %v2496_v60 = vrot.slane %v2413_v18, 1 }
 0x1e7   : > { %6238 = vmatprep.mubr.msk.bf16.mxu0 %vm932_vm4, %v7651_v0  ;;  %v5983_v25 = vpop.f32.mrf.mxu1 }
 0x1e8   : > { %v2753_v41 = vpop.f32.mrf.mxu0  ;;  %v2519_v57 = vsel %vm1287_vm11, %v2495_v30, %v2496_v60  ;;  %v2499_v51 = vrot.slane %v5983_v25, 1 }
 0x1e9   : > { %v7958_v15 = vadd.f32 %v6029_v16, %v2519_v57  ;;  %v2416_v35 = vpop.f32.mrf.mxu1 }
 0x1ea   : > { %v6037_v5 = vpop.f32.mrf.mxu0  ;;  %v2516_v6 = vsel %vm1287_vm11, %v2498_v37, %v2499_v51  ;;  %v2497_v1 = vrot.slane %v2416_v35, 1 }
 0x1eb   : > { %v7962_v39 = vadd.f32 %v6032_v3, %v2516_v6  ;;  %v5986_v8 = vpop.f32.mrf.mxu1  ;;  %6185 = vmatmul.mubr.msk.bf16.gmra.mxu1 %vm932_vm4, %v7645_v22 }
 0x1ec   : > { %v2756_v47 = vpop.f32.mrf.mxu0  ;;  %v2517_v56 = vsel %vm1287_vm11, %v2497_v1, %v2498_v37  ;;  %v2518_v16 = vsel %vm1287_vm11, %v2496_v60, %v2497_v1  ;;  %6188 = vmatprep.mubr.msk.bf16.mxu1 %vm932_vm4, %v7651_v0  ;;  %v2502_v6 = vrot.slane %v5986_v8, 1 }
 0x1ed   : > { %8933 = vst [vmem:[#allocation9_spill] sm:$0xff] %v7962_v39  ;;  %v7972_v30 = vadd.f32 %v2737_v58, %v2518_v16  ;;  %v7974_v18 = vadd.f32 %v2740_v33, %v2517_v56  ;;  %v2429_v3 = vpop.f32.mrf.mxu1 }
 0x1ee   : > { %v6040_v25 = vpop.f32.mrf.mxu0  ;;  %6239 = vmatmul.mubr.msk.bf16.gmra.mxu0 %vm932_vm4, %v7673_v24  ;;  %v2500_v22 = vrot.slane %v2429_v3, 1 }
 0x1ef   : > { %8934 = vst [vmem:[#allocation7_spill] sm:$0xff] %v7972_v30  ;;  %8935 = vst [vmem:[#allocation11_spill] sm:$0xff] %v7974_v18  ;;  %v5987_v57 = vpop.f32.mrf.mxu1 }
 0x1f0   : > { %v2769_v35 = vpop.f32.mrf.mxu0  ;;  %v2515_v37 = vsel %vm1287_vm11, %v2499_v51, %v2500_v22  ;;  %v2503_v60 = vrot.slane %v5987_v57, 1 }
 0x1f1   : > { %v7980_v1 = vadd.f32 %v6033_v46, %v2515_v37  ;;  %v2432_v0 = vpop.f32.mrf.mxu1 }
 0x1f2   : > { %v6041_v58 = vpop.f32.mrf.mxu0  ;;  %v2512_v33 = vsel %vm1287_vm11, %v2502_v6, %v2503_v60  ;;  %v2501_v56 = vrot.slane %v2432_v0, 1 }
 0x1f3   : > { %8936 = vst [vmem:[#allocation13_spill] sm:$0xff] %v7980_v1  ;;  %v7984_v16 = vadd.f32 %v6036_v48, %v2512_v33  ;;  %v5990_v36 = vpop.f32.mrf.mxu1  ;;  %6189 = vmatmul.mubr.msk.bf16.gmra.mxu1 %vm932_vm4, %v7673_v24 }
 0x1f4   : > { %v2772_v3 = vpop.f32.mrf.mxu0  ;;  %v2513_v8 = vsel %vm1287_vm11, %v2501_v56, %v2502_v6  ;;  %v2514_v46 = vsel %vm1287_vm11, %v2500_v22, %v2501_v56 }
 0x1f5   : > { %8937 = vst [vmem:[#allocation12_spill] sm:$0xff] %v7984_v16  ;;  %v7992_v51 = vadd.f32 %v2753_v41, %v2514_v46  ;;  %v7994_v57 = vadd.f32 %v2756_v47, %v2513_v8  ;;  %v2445_v37 = vpop.f32.mrf.mxu1  ;;  %v2506_v16 = vrot.slane %v5990_v36, 1  ;;  %v8939_v47 = vrot.slane %v7734_v61, 1 }
 0x1f6   : > { %v6096_v1 = vpop.f32.mrf.mxu0  ;;  %v2504_v0 = vrot.slane %v2445_v37, 1 }
 0x1f7   : > { %v5991_v48 = vpop.f32.mrf.mxu1 }
 0x1f8   : > { %v7996_v33 = vpop.f32.mrf.mxu0  ;;  %v2511_v24 = vsel %vm1287_vm11, %v2503_v60, %v2504_v0  ;;  %v2507_v18 = vrot.slane %v5991_v48, 1  ;;  %v3776_v60 = vrot.slane %v6096_v1, 1 }
 0x1f9   : > { %8938 = vst [vmem:[#allocation8_spill] sm:$0xff] %v7996_v33  ;;  %v8000_v30 = vadd.f32 %v6037_v5, %v2511_v24  ;;  %v2448_v6 = vpop.f32.mrf.mxu1 }
 0x1fa   : > { %v6097_v39 = vpop.f32.mrf.mxu0  ;;  %v2508_v41 = vsel %vm1287_vm11, %v2506_v16, %v2507_v18  ;;  %v2555_v22 = vsel %vm1287_vm11, %v2507_v18, %v8939_v47  ;;  %v2505_v56 = vrot.slane %v2448_v6, 1 }
 0x1fb   : > { %v3777_v8 = vrot.slane %v6097_v39, 1  ;;  %v8008_v46 = vadd.f32 %v6040_v25, %v2508_v41  ;;  %v8010_v36 = vadd.f32 %v6041_v58, %v2555_v22  ;;  %v6046_v37 = vpop.f32.mrf.mxu1 }
 0x1fc   : > { %v8012_v5 = vpop.f32.mrf.mxu0  ;;  %v2509_v48 = vsel %vm1287_vm11, %v2505_v56, %v2506_v16  ;;  %v2510_v24 = vsel %vm1287_vm11, %v2504_v0, %v2505_v56  ;;  %v3016_v6 = vrot.slane %v6046_v37, 2 }
 0x1fd   : > { %8940 = vst [vmem:[#allocation15_spill] sm:$0xff] %v8010_v36  ;;  %8941 = vst [vmem:[#allocation10_spill] sm:$0xff] %v8012_v5  ;;  %v8855_v61 = vrot.slane %v8012_v5, 1  ;;  %v8019_v33 = vadd.f32 %v2769_v35, %v2510_v24  ;;  %v8021_v18 = vadd.f32 %v2772_v3, %v2509_v48  ;;  %v8023_v39 = vpop.f32.mrf.mxu1  ;;  %v8027_v1 = vsel %vm1287_vm11, %v3776_v60, %v3777_v8 }
 0x1fe   : > { %v6100_v25 = vpop.f32.mrf.mxu0  ;;  %8944 = vst [vmem:[#allocation18_spill] sm:$0xff] %v8027_v1  ;;  %v8856_v3 = vrot.slane %v8023_v39, 2  ;;  %v3159_v1 = vld [vmem:[#allocation3 + $0x8] sm:$0xff] }
 0x1ff   : > { %8942 = vst [vmem:[#allocation17_spill] sm:$0xff] %v8019_v33  ;;  %8943 = vst [vmem:[#allocation21_spill] sm:$0xff] %v8021_v18  ;;  %v8033_v58 = vsel %vm1287_vm11, %v8855_v61, %v3776_v60  ;;  %v6047_v16 = vpop.f32.mrf.mxu1  ;;  %v3780_v61 = vrot.slane %v6100_v25, 1 }
 0x200   : > { %8945 = vst [vmem:[#allocation14_spill] sm:$0xff] %v8033_v58  ;;  %v3599_v0 = vpop.f32.mrf.mxu0  ;;  %v3017_v35 = vrot.slane %v6047_v16, 2  ;;  %v3160_v16 = vld [vmem:[#allocation3 + $0x10] sm:$0xff] }
 0x201   : > { %v3778_v41 = vrot.slane %v3599_v0, 1  ;;  %v2826_v47 = vpop.f32.mrf.mxu1 }
 0x202   : > { %v6101_v22 = vpop.f32.mrf.mxu0  ;;  %v3106_v56 = vsel %vm1842_vm12, %v3016_v6, %v3017_v35  ;;  %v3015_v48 = vrot.slane %v2826_v47, 2 }
 0x203   : > { %v3781_v24 = vrot.slane %v6101_v22, 1  ;;  %v8040_v5 = vsel %vm1287_vm11, %v3777_v8, %v3778_v41  ;;  %v3112_v60 = vadd.f32 %v3106_v56, %v7744_v54  ;;  %v6050_v58 = vpop.f32.mrf.mxu1  ;;  %v3158_v56 = vld [vmem:[#allocation3] sm:$0xff] }
 0x204   : > { %8946 = vst [vmem:[#allocation22_spill] sm:$0xff] %v8040_v5  ;;  %v3602_v37 = vpop.f32.mrf.mxu0  ;;  %v3107_v0 = vsel %vm1842_vm12, %v3015_v48, %v3016_v6  ;;  %v3108_v18 = vsel %vm1842_vm12, %v8856_v3, %v3015_v48  ;;  %v3161_v3 = vld [vmem:[#allocation3 + $0x18] sm:$0xff] }
 0x205   : > { %v3779_v47 = vrot.slane %v3602_v37, 1  ;;  %v3208_v22 = vadd.f32 %v3160_v16, %v3112_v60  ;;  %v3110_v33 = vadd.f32 %v3108_v18, %v7756_v38  ;;  %v3111_v8 = vadd.f32 %v3107_v0, %v7758_v42  ;;  %v2839_v5 = vpop.f32.mrf.mxu1 }
 0x206   : > { %v6104_v54 = vpop.f32.mrf.mxu0  ;;  %v8053_v25 = vsel %vm1287_vm11, %v3780_v61, %v3781_v24  ;;  %v3018_v6 = vrot.slane %v2839_v5, 2  ;;  %v3020_v37 = vrot.slane %v6050_v58, 2 }
 0x207   : > { %v8057_v36 = vsel %vm1287_vm11, %v3778_v41, %v3779_v47  ;;  %v8061_v48 = vsel %vm1287_vm11, %v3779_v47, %v3780_v61  ;;  %3256 = vst.msk [vmem:[#allocation3 + $0x10] sm:$0xff] %vm1939_vm13, %v3208_v22  ;;  %v3206_v38 = vadd.f32 %v3158_v56, %v3110_v33  ;;  %v3207_v42 = vadd.f32 %v3159_v1, %v3111_v8  ;;  %v6051_v18 = vpop.f32.mrf.mxu1 }
 0x208   : > { %v3615_v60 = vpop.f32.mrf.mxu0  ;;  %v3105_v16 = vsel %vm1842_vm12, %v3017_v35, %v3018_v6  ;;  %v3021_v0 = vrot.slane %v6051_v18, 2  ;;  %v3784_v56 = vrot.slane %v6104_v54, 1  ;;  %v3164_v18 = vld [vmem:[#allocation3 + $0x30] sm:$0xff] }
 0x209   : > { %v3782_v5 = vrot.slane %v3615_v60, 1  ;;  %3254 = vst.msk [vmem:[#allocation3] sm:$0xff] %vm1939_vm13, %v3206_v38  ;;  %3255 = vst.msk [vmem:[#allocation3 + $0x8] sm:$0xff] %vm1939_vm13, %v3207_v42  ;;  %v3113_v41 = vadd.f32 %v3105_v16, %v7766_v9  ;;  %v2842_v61 = vpop.f32.mrf.mxu1 }
 0x20a   : > { %v6105_v47 = vpop.f32.mrf.mxu0  ;;  %v3102_v33 = vsel %vm1842_vm12, %v3020_v37, %v3021_v0  ;;  %v3019_v1 = vrot.slane %v2842_v61, 2 }
 0x20b   : > { %v3785_v22 = vrot.slane %v6105_v47, 1  ;;  %v8073_v58 = vsel %vm1287_vm11, %v3781_v24, %v3782_v5  ;;  %v3209_v35 = vadd.f32 %v3161_v3, %v3113_v41  ;;  %v3116_v8 = vadd.f32 %v3102_v33, %v7770_v10  ;;  %v6054_v38 = vpop.f32.mrf.mxu1  ;;  %v3162_v47 = vld [vmem:[#allocation3 + $0x20] sm:$0xff]  ;;  %v3163_v33 = vld [vmem:[#allocation3 + $0x28] sm:$0xff] }
 0x20c   : > { %v3618_v42 = vpop.f32.mrf.mxu0  ;;  %v3103_v9 = vsel %vm1842_vm12, %v3019_v1, %v3020_v37  ;;  %v3104_v60 = vsel %vm1842_vm12, %v3018_v6, %v3019_v1 }
 0x20d   : > { %v3783_v16 = vrot.slane %v3618_v42, 1  ;;  %3257 = vst.msk [vmem:[#allocation3 + $0x18] sm:$0xff] %vm1939_vm13, %v3209_v35  ;;  %v3212_v61 = vadd.f32 %v3164_v18, %v3116_v8  ;;  %v3114_v24 = vadd.f32 %v3104_v60, %v7780_v44  ;;  %v3115_v3 = vadd.f32 %v3103_v9, %v7782_v26  ;;  %v2855_v41 = vpop.f32.mrf.mxu1 }
 0x20e   : > { %v6108_v10 = vpop.f32.mrf.mxu0  ;;  %v8085_v54 = vsel %vm1287_vm11, %v3784_v56, %v3785_v22  ;;  %v3022_v37 = vrot.slane %v2855_v41, 2  ;;  %v3024_v42 = vrot.slane %v6054_v38, 2  ;;  %v3165_v41 = vld [vmem:[#allocation3 + $0x38] sm:$0xff] }
 0x20f   : > { %v8089_v6 = vsel %vm1287_vm11, %v3782_v5, %v3783_v16  ;;  %v8093_v1 = vsel %vm1287_vm11, %v3783_v16, %v3784_v56  ;;  %3260 = vst.msk [vmem:[#allocation3 + $0x30] sm:$0xff] %vm1939_vm13, %v3212_v61  ;;  %v3210_v44 = vadd.f32 %v3162_v47, %v3114_v24  ;;  %v3211_v26 = vadd.f32 %v3163_v33, %v3115_v3  ;;  %v6055_v35 = vpop.f32.mrf.mxu1 }
 0x210   : > { %v3631_v8 = vpop.f32.mrf.mxu0  ;;  %v3101_v18 = vsel %vm1842_vm12, %v3021_v0, %v3022_v37  ;;  %v3025_v9 = vrot.slane %v6055_v35, 2  ;;  %v3788_v33 = vrot.slane %v6108_v10, 1  ;;  %v3168_v35 = vld [vmem:[#allocation3 + $0x50] sm:$0xff] }
 0x211   : > { %v3786_v60 = vrot.slane %v3631_v8, 1  ;;  %3258 = vst.msk [vmem:[#allocation3 + $0x20] sm:$0xff] %vm1939_vm13, %v3210_v44  ;;  %3259 = vst.msk [vmem:[#allocation3 + $0x28] sm:$0xff] %vm1939_vm13, %v3211_v26  ;;  %v3117_v5 = vadd.f32 %v3101_v18, %v7790_v29  ;;  %v2858_v56 = vpop.f32.mrf.mxu1 }
 0x212   : > { %v6109_v16 = vpop.f32.mrf.mxu0  ;;  %v3098_v61 = vsel %vm1842_vm12, %v3024_v42, %v3025_v9  ;;  %v3023_v24 = vrot.slane %v2858_v56, 2 }
 0x213   : > { %v3789_v3 = vrot.slane %v6109_v16, 1  ;;  %v8105_v38 = vsel %vm1287_vm11, %v3785_v22, %v3786_v60  ;;  %v3213_v0 = vadd.f32 %v3165_v41, %v3117_v5  ;;  %v3120_v47 = vadd.f32 %v3098_v61, %v7794_v62  ;;  %v6058_v44 = vpop.f32.mrf.mxu1  ;;  %v3166_v41 = vld [vmem:[#allocation3 + $0x40] sm:$0xff]  ;;  %v3167_v61 = vld [vmem:[#allocation3 + $0x48] sm:$0xff] }
 0x214   : > { %v3634_v26 = vpop.f32.mrf.mxu0  ;;  %v3099_v29 = vsel %vm1842_vm12, %v3023_v24, %v3024_v42  ;;  %v3100_v8 = vsel %vm1842_vm12, %v3022_v37, %v3023_v24 }
 0x215   : > { %v3787_v18 = vrot.slane %v3634_v26, 1  ;;  %3261 = vst.msk [vmem:[#allocation3 + $0x38] sm:$0xff] %vm1939_vm13, %v3213_v0  ;;  %v3216_v56 = vadd.f32 %v3168_v35, %v3120_v47  ;;  %v3118_v22 = vadd.f32 %v3100_v8, %v7804_v40  ;;  %v3119_v5 = vadd.f32 %v3099_v29, %v7806_v2  ;;  %v2871_v16 = vpop.f32.mrf.mxu1 }
 0x216   : > { %v6112_v62 = vpop.f32.mrf.mxu0  ;;  %v8117_v10 = vsel %vm1287_vm11, %v3788_v33, %v3789_v3  ;;  %v3026_v42 = vrot.slane %v2871_v16, 2  ;;  %v3028_v26 = vrot.slane %v6058_v44, 2  ;;  %v3169_v16 = vld [vmem:[#allocation3 + $0x58] sm:$0xff] }
 0x217   : > { %v8121_v37 = vsel %vm1287_vm11, %v3786_v60, %v3787_v18  ;;  %v8125_v24 = vsel %vm1287_vm11, %v3787_v18, %v3788_v33  ;;  %3264 = vst.msk [vmem:[#allocation3 + $0x50] sm:$0xff] %vm1939_vm13, %v3216_v56  ;;  %v3214_v40 = vadd.f32 %v3166_v41, %v3118_v22  ;;  %v3215_v2 = vadd.f32 %v3167_v61, %v3119_v5  ;;  %v6059_v0 = vpop.f32.mrf.mxu1 }
 0x218   : > { %v3647_v47 = vpop.f32.mrf.mxu0  ;;  %v3097_v35 = vsel %vm1842_vm12, %v3025_v9, %v3026_v42  ;;  %v3029_v29 = vrot.slane %v6059_v0, 2  ;;  %v3792_v61 = vrot.slane %v6112_v62, 1  ;;  %v3172_v0 = vld [vmem:[#allocation3 + $0x70] sm:$0xff] }
 0x219   : > { %v3790_v8 = vrot.slane %v3647_v47, 1  ;;  %3262 = vst.msk [vmem:[#allocation3 + $0x40] sm:$0xff] %vm1939_vm13, %v3214_v40  ;;  %3263 = vst.msk [vmem:[#allocation3 + $0x48] sm:$0xff] %vm1939_vm13, %v3215_v2  ;;  %v3121_v60 = vadd.f32 %v3097_v35, %v7814_v27  ;;  %v2874_v33 = vpop.f32.mrf.mxu1 }
 0x21a   : > { %v6113_v18 = vpop.f32.mrf.mxu0  ;;  %v3094_v56 = vsel %vm1842_vm12, %v3028_v26, %v3029_v29  ;;  %v3027_v22 = vrot.slane %v2874_v33, 2 }
 0x21b   : > { %v3793_v5 = vrot.slane %v6113_v18, 1  ;;  %v8137_v44 = vsel %vm1287_vm11, %v3789_v3, %v3790_v8  ;;  %v3217_v9 = vadd.f32 %v3169_v16, %v3121_v60  ;;  %v3124_v41 = vadd.f32 %v3094_v56, %v7818_v43  ;;  %v6062_v40 = vpop.f32.mrf.mxu1  ;;  %v3170_v16 = vld [vmem:[#allocation3 + $0x60] sm:$0xff]  ;;  %v3171_v56 = vld [vmem:[#allocation3 + $0x68] sm:$0xff] }
 0x21c   : > { %v3650_v2 = vpop.f32.mrf.mxu0  ;;  %v3095_v27 = vsel %vm1842_vm12, %v3027_v22, %v3028_v26  ;;  %v3096_v47 = vsel %vm1842_vm12, %v3026_v42, %v3027_v22 }
 0x21d   : > { %v3791_v35 = vrot.slane %v3650_v2, 1  ;;  %3265 = vst.msk [vmem:[#allocation3 + $0x58] sm:$0xff] %vm1939_vm13, %v3217_v9  ;;  %v3220_v33 = vadd.f32 %v3172_v0, %v3124_v41  ;;  %v3122_v3 = vadd.f32 %v3096_v47, %v7828_v63  ;;  %v3123_v60 = vadd.f32 %v3095_v27, %v7830_v49  ;;  %v2887_v18 = vpop.f32.mrf.mxu1 }
 0x21e   : > { %v6116_v43 = vpop.f32.mrf.mxu0  ;;  %v8149_v62 = vsel %vm1287_vm11, %v3792_v61, %v3793_v5  ;;  %v3030_v26 = vrot.slane %v2887_v18, 2  ;;  %v3032_v2 = vrot.slane %v6062_v40, 2  ;;  %v3173_v18 = vld [vmem:[#allocation3 + $0x78] sm:$0xff] }
 0x21f   : > { %v8153_v42 = vsel %vm1287_vm11, %v3790_v8, %v3791_v35  ;;  %v8157_v22 = vsel %vm1287_vm11, %v3791_v35, %v3792_v61  ;;  %3268 = vst.msk [vmem:[#allocation3 + $0x70] sm:$0xff] %vm1939_vm13, %v3220_v33  ;;  %v3218_v63 = vadd.f32 %v3170_v16, %v3122_v3  ;;  %v3219_v49 = vadd.f32 %v3171_v56, %v3123_v60  ;;  %v6063_v9 = vpop.f32.mrf.mxu1 }
 0x220   : > { %v3663_v41 = vpop.f32.mrf.mxu0  ;;  %v3093_v0 = vsel %vm1842_vm12, %v3029_v29, %v3030_v26  ;;  %v3033_v27 = vrot.slane %v6063_v9, 2  ;;  %v3796_v56 = vrot.slane %v6116_v43, 1  ;;  %v3176_v9 = vld [vmem:[#allocation3 + $0x90] sm:$0xff] }
 0x221   : > { %v3794_v47 = vrot.slane %v3663_v41, 1  ;;  %3266 = vst.msk [vmem:[#allocation3 + $0x60] sm:$0xff] %vm1939_vm13, %v3218_v63  ;;  %3267 = vst.msk [vmem:[#allocation3 + $0x68] sm:$0xff] %vm1939_vm13, %v3219_v49  ;;  %v3125_v8 = vadd.f32 %v3093_v0, %v7838_v45  ;;  %v2890_v61 = vpop.f32.mrf.mxu1 }
 0x222   : > { %v6117_v35 = vpop.f32.mrf.mxu0  ;;  %v3090_v33 = vsel %vm1842_vm12, %v3032_v2, %v3033_v27  ;;  %v3031_v3 = vrot.slane %v2890_v61, 2 }
 0x223   : > { %v3797_v60 = vrot.slane %v6117_v35, 1  ;;  %v8169_v40 = vsel %vm1287_vm11, %v3793_v5, %v3794_v47  ;;  %v3221_v29 = vadd.f32 %v3173_v18, %v3125_v8  ;;  %v3128_v16 = vadd.f32 %v3090_v33, %v7842_v23  ;;  %v6066_v63 = vpop.f32.mrf.mxu1  ;;  %v3174_v18 = vld [vmem:[#allocation3 + $0x80] sm:$0xff]  ;;  %v3175_v33 = vld [vmem:[#allocation3 + $0x88] sm:$0xff] }
 0x224   : > { %v3666_v49 = vpop.f32.mrf.mxu0  ;;  %v3091_v45 = vsel %vm1842_vm12, %v3031_v3, %v3032_v2  ;;  %v3092_v41 = vsel %vm1842_vm12, %v3030_v26, %v3031_v3 }
 0x225   : > { %v3795_v0 = vrot.slane %v3666_v49, 1  ;;  %3269 = vst.msk [vmem:[#allocation3 + $0x78] sm:$0xff] %vm1939_vm13, %v3221_v29  ;;  %v3224_v61 = vadd.f32 %v3176_v9, %v3128_v16  ;;  %v3126_v5 = vadd.f32 %v3092_v41, %v7852_v53  ;;  %v3127_v8 = vadd.f32 %v3091_v45, %v7854_v7  ;;  %v2903_v35 = vpop.f32.mrf.mxu1 }
 0x226   : > { %v6120_v23 = vpop.f32.mrf.mxu0  ;;  %v8181_v43 = vsel %vm1287_vm11, %v3796_v56, %v3797_v60  ;;  %v3034_v2 = vrot.slane %v2903_v35, 2  ;;  %v3036_v49 = vrot.slane %v6066_v63, 2  ;;  %v3177_v35 = vld [vmem:[#allocation3 + $0x98] sm:$0xff] }
 0x227   : > { %v8185_v26 = vsel %vm1287_vm11, %v3794_v47, %v3795_v0  ;;  %v8189_v3 = vsel %vm1287_vm11, %v3795_v0, %v3796_v56  ;;  %3272 = vst.msk [vmem:[#allocation3 + $0x90] sm:$0xff] %vm1939_vm13, %v3224_v61  ;;  %v3222_v53 = vadd.f32 %v3174_v18, %v3126_v5  ;;  %v3223_v7 = vadd.f32 %v3175_v33, %v3127_v8  ;;  %v6067_v29 = vpop.f32.mrf.mxu1 }
 0x228   : > { %v3679_v16 = vpop.f32.mrf.mxu0  ;;  %v3089_v9 = vsel %vm1842_vm12, %v3033_v27, %v3034_v2  ;;  %v3037_v45 = vrot.slane %v6067_v29, 2  ;;  %v3800_v33 = vrot.slane %v6120_v23, 1  ;;  %v3180_v29 = vld [vmem:[#allocation3 + $0xb0] sm:$0xff] }
 0x229   : > { %v3798_v41 = vrot.slane %v3679_v16, 1  ;;  %3270 = vst.msk [vmem:[#allocation3 + $0x80] sm:$0xff] %vm1939_vm13, %v3222_v53  ;;  %3271 = vst.msk [vmem:[#allocation3 + $0x88] sm:$0xff] %vm1939_vm13, %v3223_v7  ;;  %v3129_v47 = vadd.f32 %v3089_v9, %v7862_v19  ;;  %v2906_v56 = vpop.f32.mrf.mxu1 }
 0x22a   : > { %v6121_v0 = vpop.f32.mrf.mxu0  ;;  %v3086_v61 = vsel %vm1842_vm12, %v3036_v49, %v3037_v45  ;;  %v3035_v5 = vrot.slane %v2906_v56, 2 }
 0x22b   : > { %v3801_v8 = vrot.slane %v6121_v0, 1  ;;  %v8201_v63 = vsel %vm1287_vm11, %v3797_v60, %v3798_v41  ;;  %v3225_v27 = vadd.f32 %v3177_v35, %v3129_v47  ;;  %v3132_v18 = vadd.f32 %v3086_v61, %v7866_v31  ;;  %v6070_v53 = vpop.f32.mrf.mxu1  ;;  %v3178_v35 = vld [vmem:[#allocation3 + $0xa0] sm:$0xff]  ;;  %v3179_v61 = vld [vmem:[#allocation3 + $0xa8] sm:$0xff] }
 0x22c   : > { %v3682_v7 = vpop.f32.mrf.mxu0  ;;  %v3087_v19 = vsel %vm1842_vm12, %v3035_v5, %v3036_v49  ;;  %v3088_v16 = vsel %vm1842_vm12, %v3034_v2, %v3035_v5 }
 0x22d   : > { %v3799_v9 = vrot.slane %v3682_v7, 1  ;;  %3273 = vst.msk [vmem:[#allocation3 + $0x98] sm:$0xff] %vm1939_vm13, %v3225_v27  ;;  %v3228_v56 = vadd.f32 %v3180_v29, %v3132_v18  ;;  %v3130_v60 = vadd.f32 %v3088_v16, %v7876_v4  ;;  %v3131_v47 = vadd.f32 %v3087_v19, %v7878_v34  ;;  %v2919_v0 = vpop.f32.mrf.mxu1 }
 0x22e   : > { %v6124_v31 = vpop.f32.mrf.mxu0  ;;  %v8213_v23 = vsel %vm1287_vm11, %v3800_v33, %v3801_v8  ;;  %v3038_v49 = vrot.slane %v2919_v0, 2  ;;  %v3040_v7 = vrot.slane %v6070_v53, 2  ;;  %v3181_v0 = vld [vmem:[#allocation3 + $0xb8] sm:$0xff] }
 0x22f   : > { %v8217_v2 = vsel %vm1287_vm11, %v3798_v41, %v3799_v9  ;;  %v8221_v5 = vsel %vm1287_vm11, %v3799_v9, %v3800_v33  ;;  %3276 = vst.msk [vmem:[#allocation3 + $0xb0] sm:$0xff] %vm1939_vm13, %v3228_v56  ;;  %v3226_v4 = vadd.f32 %v3178_v35, %v3130_v60  ;;  %v3227_v34 = vadd.f32 %v3179_v61, %v3131_v47  ;;  %v6071_v27 = vpop.f32.mrf.mxu1 }
 0x230   : > { %v3695_v18 = vpop.f32.mrf.mxu0  ;;  %v3085_v29 = vsel %vm1842_vm12, %v3037_v45, %v3038_v49  ;;  %v3041_v19 = vrot.slane %v6071_v27, 2  ;;  %v3804_v61 = vrot.slane %v6124_v31, 1  ;;  %v3184_v27 = vld [vmem:[#allocation3 + $0xd0] sm:$0xff] }
 0x231   : > { %v3802_v16 = vrot.slane %v3695_v18, 1  ;;  %3274 = vst.msk [vmem:[#allocation3 + $0xa0] sm:$0xff] %vm1939_vm13, %v3226_v4  ;;  %3275 = vst.msk [vmem:[#allocation3 + $0xa8] sm:$0xff] %vm1939_vm13, %v3227_v34  ;;  %v3133_v41 = vadd.f32 %v3085_v29, %v7886_v59  ;;  %v2922_v33 = vpop.f32.mrf.mxu1 }
 0x232   : > { %v6125_v9 = vpop.f32.mrf.mxu0  ;;  %v3082_v56 = vsel %vm1842_vm12, %v3040_v7, %v3041_v19  ;;  %v3039_v60 = vrot.slane %v2922_v33, 2 }
 0x233   : > { %v3805_v47 = vrot.slane %v6125_v9, 1  ;;  %v8233_v53 = vsel %vm1287_vm11, %v3801_v8, %v3802_v16  ;;  %v3229_v45 = vadd.f32 %v3181_v0, %v3133_v41  ;;  %v3136_v35 = vadd.f32 %v3082_v56, %v7890_v52  ;;  %v6074_v4 = vpop.f32.mrf.mxu1  ;;  %v3182_v0 = vld [vmem:[#allocation3 + $0xc0] sm:$0xff]  ;;  %v3183_v56 = vld [vmem:[#allocation3 + $0xc8] sm:$0xff] }
 0x234   : > { %v3698_v34 = vpop.f32.mrf.mxu0  ;;  %v3083_v59 = vsel %vm1842_vm12, %v3039_v60, %v3040_v7  ;;  %v3084_v18 = vsel %vm1842_vm12, %v3038_v49, %v3039_v60 }
 0x235   : > { %v3803_v29 = vrot.slane %v3698_v34, 1  ;;  %3277 = vst.msk [vmem:[#allocation3 + $0xb8] sm:$0xff] %vm1939_vm13, %v3229_v45  ;;  %v3232_v33 = vadd.f32 %v3184_v27, %v3136_v35  ;;  %v3134_v8 = vadd.f32 %v3084_v18, %v7900_v11  ;;  %v3135_v41 = vadd.f32 %v3083_v59, %v7902_v32  ;;  %v2935_v9 = vpop.f32.mrf.mxu1 }
 0x236   : > { %v6128_v52 = vpop.f32.mrf.mxu0  ;;  %v8245_v31 = vsel %vm1287_vm11, %v3804_v61, %v3805_v47  ;;  %v3042_v7 = vrot.slane %v2935_v9, 2  ;;  %v3044_v34 = vrot.slane %v6074_v4, 2  ;;  %v3185_v9 = vld [vmem:[#allocation3 + $0xd8] sm:$0xff] }
 0x237   : > { %v8249_v49 = vsel %vm1287_vm11, %v3802_v16, %v3803_v29  ;;  %v8253_v60 = vsel %vm1287_vm11, %v3803_v29, %v3804_v61  ;;  %3280 = vst.msk [vmem:[#allocation3 + $0xd0] sm:$0xff] %vm1939_vm13, %v3232_v33  ;;  %v3230_v11 = vadd.f32 %v3182_v0, %v3134_v8  ;;  %v3231_v32 = vadd.f32 %v3183_v56, %v3135_v41  ;;  %v6075_v45 = vpop.f32.mrf.mxu1 }
 0x238   : > { %v3711_v35 = vpop.f32.mrf.mxu0  ;;  %v3081_v27 = vsel %vm1842_vm12, %v3041_v19, %v3042_v7  ;;  %v3045_v59 = vrot.slane %v6075_v45, 2  ;;  %v3808_v56 = vrot.slane %v6128_v52, 1  ;;  %v3188_v45 = vld [vmem:[#allocation3 + $0xf0] sm:$0xff] }
 0x239   : > { %v3806_v18 = vrot.slane %v3711_v35, 1  ;;  %3278 = vst.msk [vmem:[#allocation3 + $0xc0] sm:$0xff] %vm1939_vm13, %v3230_v11  ;;  %3279 = vst.msk [vmem:[#allocation3 + $0xc8] sm:$0xff] %vm1939_vm13, %v3231_v32  ;;  %v3137_v16 = vadd.f32 %v3081_v27, %v7910_v50  ;;  %v2938_v61 = vpop.f32.mrf.mxu1 }
 0x23a   : > { %v6129_v29 = vpop.f32.mrf.mxu0  ;;  %v3078_v33 = vsel %vm1842_vm12, %v3044_v34, %v3045_v59  ;;  %v3043_v8 = vrot.slane %v2938_v61, 2 }
 0x23b   : > { %v3809_v41 = vrot.slane %v6129_v29, 1  ;;  %v8265_v4 = vsel %vm1287_vm11, %v3805_v47, %v3806_v18  ;;  %v3233_v19 = vadd.f32 %v3185_v9, %v3137_v16  ;;  %v3140_v0 = vadd.f32 %v3078_v33, %v7914_v20  ;;  %v6078_v11 = vpop.f32.mrf.mxu1  ;;  %v3186_v9 = vld [vmem:[#allocation3 + $0xe0] sm:$0xff]  ;;  %v3187_v33 = vld [vmem:[#allocation3 + $0xe8] sm:$0xff] }
 0x23c   : > { %v3714_v32 = vpop.f32.mrf.mxu0  ;;  %v3079_v50 = vsel %vm1842_vm12, %v3043_v8, %v3044_v34  ;;  %v3080_v35 = vsel %vm1842_vm12, %v3042_v7, %v3043_v8 }
 0x23d   : > { %v3807_v27 = vrot.slane %v3714_v32, 1  ;;  %3281 = vst.msk [vmem:[#allocation3 + $0xd8] sm:$0xff] %vm1939_vm13, %v3233_v19  ;;  %v3236_v61 = vadd.f32 %v3188_v45, %v3140_v0  ;;  %v3138_v47 = vadd.f32 %v3080_v35, %v7924_v21  ;;  %v3139_v16 = vadd.f32 %v3079_v50, %v7926_v12  ;;  %v2951_v29 = vpop.f32.mrf.mxu1 }
 0x23e   : > { %v6132_v20 = vpop.f32.mrf.mxu0  ;;  %v8277_v52 = vsel %vm1287_vm11, %v3808_v56, %v3809_v41  ;;  %v3046_v34 = vrot.slane %v2951_v29, 2  ;;  %v3048_v32 = vrot.slane %v6078_v11, 2  ;;  %v3189_v29 = vld [vmem:[#allocation3 + $0xf8] sm:$0xff] }
 0x23f   : > { %v8281_v7 = vsel %vm1287_vm11, %v3806_v18, %v3807_v27  ;;  %v8285_v8 = vsel %vm1287_vm11, %v3807_v27, %v3808_v56  ;;  %3284 = vst.msk [vmem:[#allocation3 + $0xf0] sm:$0xff] %vm1939_vm13, %v3236_v61  ;;  %v3234_v21 = vadd.f32 %v3186_v9, %v3138_v47  ;;  %v3235_v12 = vadd.f32 %v3187_v33, %v3139_v16  ;;  %v6079_v19 = vpop.f32.mrf.mxu1 }
 0x240   : > { %v3727_v0 = vpop.f32.mrf.mxu0  ;;  %v3077_v45 = vsel %vm1842_vm12, %v3045_v59, %v3046_v34  ;;  %v3049_v50 = vrot.slane %v6079_v19, 2  ;;  %v3812_v33 = vrot.slane %v6132_v20, 1  ;;  %v3192_v19 = vld [vmem:[#allocation3 + $0x110] sm:$0xff] }
 0x241   : > { %v3810_v35 = vrot.slane %v3727_v0, 1  ;;  %3282 = vst.msk [vmem:[#allocation3 + $0xe0] sm:$0xff] %vm1939_vm13, %v3234_v21  ;;  %3283 = vst.msk [vmem:[#allocation3 + $0xe8] sm:$0xff] %vm1939_vm13, %v3235_v12  ;;  %v3141_v18 = vadd.f32 %v3077_v45, %v7934_v14  ;;  %v2954_v56 = vpop.f32.mrf.mxu1 }
 0x242   : > { %v6133_v27 = vpop.f32.mrf.mxu0  ;;  %v3074_v61 = vsel %vm1842_vm12, %v3048_v32, %v3049_v50  ;;  %v3047_v47 = vrot.slane %v2954_v56, 2 }
 0x243   : > { %v3813_v16 = vrot.slane %v6133_v27, 1  ;;  %v8297_v11 = vsel %vm1287_vm11, %v3809_v41, %v3810_v35  ;;  %v3237_v59 = vadd.f32 %v3189_v29, %v3141_v18  ;;  %v3144_v9 = vadd.f32 %v3074_v61, %v7938_v55  ;;  %v6082_v21 = vpop.f32.mrf.mxu1  ;;  %v3190_v29 = vld [vmem:[#allocation3 + $0x100] sm:$0xff]  ;;  %v3191_v61 = vld [vmem:[#allocation3 + $0x108] sm:$0xff] }
 0x244   : > { %v3730_v12 = vpop.f32.mrf.mxu0  ;;  %v3075_v14 = vsel %vm1842_vm12, %v3047_v47, %v3048_v32  ;;  %v3076_v0 = vsel %vm1842_vm12, %v3046_v34, %v3047_v47 }
 0x245   : > { %v3811_v45 = vrot.slane %v3730_v12, 1  ;;  %3285 = vst.msk [vmem:[#allocation3 + $0xf8] sm:$0xff] %vm1939_vm13, %v3237_v59  ;;  %v3240_v56 = vadd.f32 %v3192_v19, %v3144_v9  ;;  %v3142_v41 = vadd.f32 %v3076_v0, %v7948_v28  ;;  %v3143_v18 = vadd.f32 %v3075_v14, %v7950_v17  ;;  %v2967_v27 = vpop.f32.mrf.mxu1 }
 0x246   : > { %v6136_v55 = vpop.f32.mrf.mxu0  ;;  %v8309_v20 = vsel %vm1287_vm11, %v3812_v33, %v3813_v16  ;;  %v3050_v32 = vrot.slane %v2967_v27, 2  ;;  %v3052_v12 = vrot.slane %v6082_v21, 2  ;;  %v3193_v27 = vld [vmem:[#allocation3 + $0x118] sm:$0xff] }
 0x247   : > { %v8313_v34 = vsel %vm1287_vm11, %v3810_v35, %v3811_v45  ;;  %v8317_v47 = vsel %vm1287_vm11, %v3811_v45, %v3812_v33  ;;  %3288 = vst.msk [vmem:[#allocation3 + $0x110] sm:$0xff] %vm1939_vm13, %v3240_v56  ;;  %v3238_v28 = vadd.f32 %v3190_v29, %v3142_v41  ;;  %v3239_v17 = vadd.f32 %v3191_v61, %v3143_v18  ;;  %v6083_v59 = vpop.f32.mrf.mxu1  ;;  %v8950_v29 = vld [vmem:[#allocation9_spill] sm:$0xff] }
 0x248   : > { %8947 = vst [vmem:[#allocation16_spill] sm:$0xff] %v8313_v34  ;;  %8948 = vst [vmem:[#allocation23_spill] sm:$0xff] %v8317_v47  ;;  %v3743_v9 = vpop.f32.mrf.mxu0  ;;  %v3073_v19 = vsel %vm1842_vm12, %v3049_v50, %v3050_v32  ;;  %v3053_v14 = vrot.slane %v6083_v59, 2  ;;  %v3195_v34 = vld [vmem:[#allocation3 + $0x128] sm:$0xff] }
 0x249   : > { %v3814_v0 = vrot.slane %v3743_v9, 1  ;;  %3286 = vst.msk [vmem:[#allocation3 + $0x100] sm:$0xff] %vm1939_vm13, %v3238_v28  ;;  %3287 = vst.msk [vmem:[#allocation3 + $0x108] sm:$0xff] %vm1939_vm13, %v3239_v17  ;;  %v3145_v35 = vadd.f32 %v3073_v19, %v7958_v15  ;;  %v2970_v33 = vpop.f32.mrf.mxu1  ;;  %v3816_v28 = vrot.slane %v6136_v55, 1  ;;  %v3196_v9 = vld [vmem:[#allocation3 + $0x130] sm:$0xff] }
 0x24a   : > { %v6137_v45 = vpop.f32.mrf.mxu0  ;;  %v3070_v56 = vsel %vm1842_vm12, %v3052_v12, %v3053_v14  ;;  %v3051_v41 = vrot.slane %v2970_v33, 2 }
 0x24b   : > { %v3817_v18 = vrot.slane %v6137_v45, 1  ;;  %v8329_v21 = vsel %vm1287_vm11, %v3813_v16, %v3814_v0  ;;  %v3241_v50 = vadd.f32 %v3193_v27, %v3145_v35  ;;  %v3148_v61 = vadd.f32 %v3070_v56, %v8950_v29  ;;  %v6086_v59 = vpop.f32.mrf.mxu1  ;;  %v8951_v45 = vld [vmem:[#allocation7_spill] sm:$0xff] }
 0x24c   : > { %8949 = vst [vmem:[#allocation27_spill] sm:$0xff] %v8329_v21  ;;  %v3746_v17 = vpop.f32.mrf.mxu0  ;;  %v3071_v15 = vsel %vm1842_vm12, %v3051_v41, %v3052_v12  ;;  %v3072_v19 = vsel %vm1842_vm12, %v3050_v32, %v3051_v41  ;;  %v8952_v21 = vld [vmem:[#allocation11_spill] sm:$0xff] }
 0x24d   : > { %v3815_v47 = vrot.slane %v3746_v17, 1  ;;  %3289 = vst.msk [vmem:[#allocation3 + $0x118] sm:$0xff] %vm1939_vm13, %v3241_v50  ;;  %v3244_v33 = vadd.f32 %v3196_v9, %v3148_v61  ;;  %v3146_v16 = vadd.f32 %v3072_v19, %v8951_v45  ;;  %v3147_v35 = vadd.f32 %v3071_v15, %v8952_v21  ;;  %v2983_v27 = vpop.f32.mrf.mxu1  ;;  %v3194_v29 = vld [vmem:[#allocation3 + $0x120] sm:$0xff] }
 0x24e   : > { %v6140_v56 = vpop.f32.mrf.mxu0  ;;  %v8341_v55 = vsel %vm1287_vm11, %v3816_v28, %v3817_v18  ;;  %v3054_v12 = vrot.slane %v2983_v27, 2  ;;  %v3056_v9 = vrot.slane %v6086_v59, 2 }
 0x24f   : > { %v8345_v32 = vsel %vm1287_vm11, %v3814_v0, %v3815_v47  ;;  %v8349_v41 = vsel %vm1287_vm11, %v3815_v47, %v3816_v28  ;;  %3292 = vst.msk [vmem:[#allocation3 + $0x130] sm:$0xff] %vm1939_vm13, %v3244_v33  ;;  %v3242_v21 = vadd.f32 %v3194_v29, %v3146_v16  ;;  %v3243_v50 = vadd.f32 %v3195_v34, %v3147_v35  ;;  %v6087_v61 = vpop.f32.mrf.mxu1  ;;  %v8955_v0 = vld [vmem:[#allocation13_spill] sm:$0xff]  ;;  %v3197_v33 = vld [vmem:[#allocation3 + $0x138] sm:$0xff]  ;;  %v8958_v29 = vld [vmem:[#allocation12_spill] sm:$0xff] }
 0x250   : > { %8953 = vst [vmem:[#allocation24_spill] sm:$0xff] %v8345_v32  ;;  %8954 = vst [vmem:[#allocation19_spill] sm:$0xff] %v8349_v41  ;;  %v3759_v17 = vpop.f32.mrf.mxu0  ;;  %v3069_v15 = vsel %vm1842_vm12, %v3053_v14, %v3054_v12  ;;  %v3057_v19 = vrot.slane %v6087_v61, 2 }
 0x251   : > { %v3818_v45 = vrot.slane %v3759_v17, 1  ;;  %3290 = vst.msk [vmem:[#allocation3 + $0x120] sm:$0xff] %vm1939_vm13, %v3242_v21  ;;  %3291 = vst.msk [vmem:[#allocation3 + $0x128] sm:$0xff] %vm1939_vm13, %v3243_v50  ;;  %v3149_v27 = vadd.f32 %v3069_v15, %v8955_v0  ;;  %v2986_v47 = vpop.f32.mrf.mxu1  ;;  %v3820_v50 = vrot.slane %v6140_v56, 1  ;;  %v3200_v15 = vld [vmem:[#allocation3 + $0x150] sm:$0xff] }
 0x252   : > { %v8357_v28 = vpop.f32.mrf.mxu0  ;;  %v3066_v34 = vsel %vm1842_vm12, %v3056_v9, %v3057_v19  ;;  %v3055_v16 = vrot.slane %v2986_v47, 2 }
 0x253   : > { %8956 = vst [vmem:[#allocation28_spill] sm:$0xff] %v8357_v28  ;;  %v8364_v14 = vsel %vm1287_vm11, %v3817_v18, %v3818_v45  ;;  %v3245_v35 = vadd.f32 %v3197_v33, %v3149_v27  ;;  %v3152_v21 = vadd.f32 %v3066_v34, %v8958_v29  ;;  %v6090_v61 = vpop.f32.mrf.mxu1  ;;  %v8959_v56 = vrot.slane %v8357_v28, 1 }
 0x254   : > { %8957 = vst [vmem:[#allocation20_spill] sm:$0xff] %v8364_v14  ;;  %v3762_v17 = vpop.f32.mrf.mxu0  ;;  %v3067_v0 = vsel %vm1842_vm12, %v3055_v16, %v3056_v9  ;;  %v3068_v41 = vsel %vm1842_vm12, %v3054_v12, %v3055_v16  ;;  %v3198_v9 = vld [vmem:[#allocation3 + $0x140] sm:$0xff]  ;;  %v3199_v14 = vld [vmem:[#allocation3 + $0x148] sm:$0xff] }
 0x255   : > { %v3819_v47 = vrot.slane %v3762_v17, 1  ;;  %3293 = vst.msk [vmem:[#allocation3 + $0x138] sm:$0xff] %vm1939_vm13, %v3245_v35  ;;  %v3248_v59 = vadd.f32 %v3200_v15, %v3152_v21  ;;  %v3150_v18 = vadd.f32 %v3068_v41, %v7992_v51  ;;  %v3151_v27 = vadd.f32 %v3067_v0, %v7994_v57  ;;  %v2999_v33 = vpop.f32.mrf.mxu1 }
 0x256   : > { %v8374_v34 = vpop.f32.mrf.mxu0  ;;  %v8380_v29 = vsel %vm1287_vm11, %v3820_v50, %v8959_v56  ;;  %v3058_v12 = vrot.slane %v2999_v33, 2  ;;  %v3060_v17 = vrot.slane %v6090_v61, 2  ;;  %v8963_v61 = vrot.slane %v8023_v39, 2  ;;  %v8964_v56 = vld [vmem:[#allocation8_spill] sm:$0xff] }
 0x257   : > { %8960 = vst [vmem:[#allocation31_spill] sm:$0xff] %v8380_v29  ;;  %v8384_v16 = vsel %vm1287_vm11, %v3818_v45, %v3819_v47  ;;  %3296 = vst.msk [vmem:[#allocation3 + $0x150] sm:$0xff] %vm1939_vm13, %v3248_v59  ;;  %v3246_v51 = vadd.f32 %v3198_v9, %v3150_v18  ;;  %v3247_v57 = vadd.f32 %v3199_v14, %v3151_v27  ;;  %v6091_v41 = vpop.f32.mrf.mxu1  ;;  %v4330_v14 = vrot.slane %v8374_v34, 2  ;;  %v3201_v27 = vld [vmem:[#allocation3 + $0x158] sm:$0xff]  ;;  %v3202_v29 = vld [vmem:[#allocation3 + $0x160] sm:$0xff] }
 0x258   : > { %8961 = vst [vmem:[#allocation26_spill] sm:$0xff] %v8384_v16  ;;  %v8387_v35 = vpop.f32.mrf.mxu0  ;;  %v8391_v21 = vsel %vm1287_vm11, %v3819_v47, %v3820_v50  ;;  %v3065_v15 = vsel %vm1842_vm12, %v3057_v19, %v3058_v12  ;;  %v3061_v0 = vrot.slane %v6091_v41, 2  ;;  %v3205_v16 = vld [vmem:[#allocation3 + $0x178] sm:$0xff] }
 0x259   : > { %8962 = vst [vmem:[#allocation32_spill] sm:$0xff] %v8391_v21  ;;  %3294 = vst.msk [vmem:[#allocation3 + $0x140] sm:$0xff] %vm1939_vm13, %v3246_v51  ;;  %v3153_v45 = vadd.f32 %v3065_v15, %v8000_v30  ;;  %v3002_v59 = vpop.f32.mrf.mxu1  ;;  %v3204_v21 = vld [vmem:[#allocation3 + $0x170] sm:$0xff]  ;;  %v4328_v32 = vrot.slane %v8387_v35, 2 }
 0x25a   : > { %3295 = vst.msk [vmem:[#allocation3 + $0x148] sm:$0xff] %vm1939_vm13, %v3247_v57  ;;  %v6197_v18 = vpop.f32.mrf.mxu0  ;;  %v3062_v50 = vsel %vm1842_vm12, %v3060_v17, %v3061_v0  ;;  %v3109_v19 = vsel %vm1842_vm12, %v3061_v0, %v8963_v61  ;;  %v3059_v47 = vrot.slane %v3002_v59, 2  ;;  %v8965_v57 = vld [vmem:[#allocation15_spill] sm:$0xff]  ;;  %v8966_v0 = vld [vmem:[#allocation18_spill] sm:$0xff]  ;;  %v8968_v61 = vld [vmem:[#allocation21_spill] sm:$0xff] }
 0x25b   : > { %v4331_v33 = vrot.slane %v6197_v18, 2  ;;  %v3249_v51 = vadd.f32 %v3201_v27, %v3153_v45  ;;  %v3156_v30 = vadd.f32 %v3062_v50, %v8008_v46  ;;  %v3157_v41 = vadd.f32 %v3109_v19, %v8965_v57  ;;  %v6146_v34 = vpop.f32.mrf.mxu1  ;;  %v8967_v27 = vld [vmem:[#allocation17_spill] sm:$0xff] }
 0x25c   : > { %v4140_v15 = vpop.f32.mrf.mxu0  ;;  %v3063_v28 = vsel %vm1842_vm12, %v3059_v47, %v3060_v17  ;;  %v3064_v39 = vsel %vm1842_vm12, %v3058_v12, %v3059_v47  ;;  %v3916_v59 = vadd.f32 %v6146_v34, %v8966_v0  ;;  %v3203_v17 = vld [vmem:[#allocation3 + $0x168] sm:$0xff]  ;;  %v8969_v12 = vld [vmem:[#allocation10_spill] sm:$0xff]  ;;  %v8971_v34 = vrot.slane %v8964_v56, 1 }
 0x25d   : > { %v4420_v18 = vsel %vm1842_vm12, %v4330_v14, %v4331_v33  ;;  %3297 = vst.msk [vmem:[#allocation3 + $0x158] sm:$0xff] %vm1939_vm13, %v3249_v51  ;;  %v3252_v46 = vadd.f32 %v3204_v21, %v3156_v30  ;;  %v3253_v45 = vadd.f32 %v3205_v16, %v3157_v41  ;;  %v3154_v50 = vadd.f32 %v3064_v39, %v8967_v27  ;;  %v3907_v57 = vpop.f32.mrf.mxu1  ;;  %v4474_v41 = vld [vmem:[#allocation3 + $0x10] sm:$0xff] }
 0x25e   : > { %v3155_v19 = vadd.f32 %v3063_v28, %v8968_v61  ;;  %v6200_v9 = vpop.f32.mrf.mxu0  ;;  %v8970_v47 = vrot.slane %v8969_v12, 1  ;;  %v4426_v51 = vadd.f32 %v4420_v18, %v3916_v59  ;;  %v4329_v21 = vrot.slane %v4140_v15, 2 }
 0x25f   : > { %3300 = vst.msk [vmem:[#allocation3 + $0x170] sm:$0xff] %vm1939_vm13, %v3252_v46  ;;  %3301 = vst.msk [vmem:[#allocation3 + $0x178] sm:$0xff] %vm1939_vm13, %v3253_v45  ;;  %v3250_v28 = vadd.f32 %v3202_v29, %v3154_v50  ;;  %v6147_v39 = vpop.f32.mrf.mxu1  ;;  %v8972_v45 = vld [vmem:[#allocation22_spill] sm:$0xff] }
 0x260   : > { %v3868_v0 = vsel %vm1287_vm11, %v8971_v34, %v8970_v47  ;;  %v3251_v16 = vadd.f32 %v3203_v17, %v3155_v19  ;;  %v4153_v27 = vpop.f32.mrf.mxu0  ;;  %v4522_v61 = vadd.f32 %v4474_v41, %v4426_v51  ;;  %v4422_v12 = vsel %vm1842_vm12, %v4328_v32, %v4329_v21  ;;  %v4472_v19 = vld [vmem:[#allocation3] sm:$0xff] }
 0x261   : > { %v3908_v30 = vadd.f32 %v3907_v57, %v3868_v0  ;;  %3298 = vst.msk [vmem:[#allocation3 + $0x160] sm:$0xff] %vm1939_vm13, %v3250_v28  ;;  %v3910_v59 = vpop.f32.mrf.mxu1  ;;  %v4421_v29 = vsel %vm1842_vm12, %v4329_v21, %v4330_v14  ;;  %v4332_v18 = vrot.slane %v4153_v27, 2  ;;  %v3919_v50 = vadd.f32 %v6147_v39, %v8972_v45  ;;  %v8973_v57 = vld [vmem:[#allocation14_spill] sm:$0xff]  ;;  %v4473_v39 = vld [vmem:[#allocation3 + $0x8] sm:$0xff] }
 0x262   : > { %3299 = vst.msk [vmem:[#allocation3 + $0x168] sm:$0xff] %vm1939_vm13, %v3251_v16  ;;  %v6201_v46 = vpop.f32.mrf.mxu0  ;;  %4570 = vst.msk [vmem:[#allocation3 + $0x10] sm:$0xff] %vm1939_vm13, %v4522_v61  ;;  %v3911_v17 = vadd.f32 %v3910_v59, %v8973_v57  ;;  %v4334_v47 = vrot.slane %v6200_v9, 2  ;;  %v4475_v27 = vld [vmem:[#allocation3 + $0x18] sm:$0xff] }
 0x263   : > { %v4424_v15 = vadd.f32 %v4422_v12, %v3908_v30  ;;  %v4335_v34 = vrot.slane %v6201_v46, 2  ;;  %v6150_v51 = vpop.f32.mrf.mxu1  ;;  %v4419_v28 = vsel %vm1842_vm12, %v4331_v33, %v4332_v18 }
 0x264   : > { %v4156_v16 = vpop.f32.mrf.mxu0  ;;  %v4425_v30 = vadd.f32 %v4421_v29, %v3911_v17  ;;  %v3932_v14 = vadd.f32 %v6150_v51, %v8053_v25  ;;  %v4427_v21 = vadd.f32 %v4419_v28, %v3919_v50  ;;  %v4478_v29 = vld [vmem:[#allocation3 + $0x30] sm:$0xff]  ;;  %v4476_v51 = vld [vmem:[#allocation3 + $0x20] sm:$0xff] }
 0x265   : > { %v4520_v0 = vadd.f32 %v4472_v19, %v4424_v15  ;;  %v4416_v41 = vsel %vm1842_vm12, %v4334_v47, %v4335_v34  ;;  %v3923_v61 = vpop.f32.mrf.mxu1  ;;  %v4333_v9 = vrot.slane %v4156_v16, 2 }
 0x266   : > { %v6204_v12 = vpop.f32.mrf.mxu0  ;;  %v4521_v15 = vadd.f32 %v4473_v39, %v4425_v30  ;;  %v4523_v59 = vadd.f32 %v4475_v27, %v4427_v21  ;;  %v3924_v46 = vadd.f32 %v3923_v61, %v8057_v36  ;;  %v4430_v33 = vadd.f32 %v4416_v41, %v3932_v14 }
 0x267   : > { %4568 = vst.msk [vmem:[#allocation3] sm:$0xff] %vm1939_vm13, %v4520_v0  ;;  %v6151_v45 = vpop.f32.mrf.mxu1  ;;  %v4418_v25 = vsel %vm1842_vm12, %v4332_v18, %v4333_v9  ;;  %v4417_v36 = vsel %vm1842_vm12, %v4333_v9, %v4334_v47  ;;  %v4338_v16 = vrot.slane %v6204_v12, 2  ;;  %v8456_v18 = vld [vmem:[%s8831_s2] ss:$0 sm:$0xff] }
 0x268   : > { %v4169_v50 = vpop.f32.mrf.mxu0  ;;  %4569 = vst.msk [vmem:[#allocation3 + $0x8] sm:$0xff] %vm1939_vm13, %v4521_v15  ;;  %4571 = vst.msk [vmem:[#allocation3 + $0x18] sm:$0xff] %vm1939_vm13, %v4523_v59  ;;  %v4526_v19 = vadd.f32 %v4478_v29, %v4430_v33  ;;  %v4428_v57 = vadd.f32 %v4418_v25, %v3924_v46  ;;  %v3935_v0 = vadd.f32 %v6151_v45, %v8073_v58  ;;  %v4479_v15 = vld [vmem:[#allocation3 + $0x38] sm:$0xff] }
 0x269   : > { %v4336_v17 = vrot.slane %v4169_v50, 2  ;;  %v3926_v28 = vpop.f32.mrf.mxu1 }
 0x26a   : > { %v6205_v30 = vpop.f32.mrf.mxu0  ;;  %4574 = vst.msk [vmem:[#allocation3 + $0x30] sm:$0xff] %vm1939_vm13, %v4526_v19  ;;  %v4524_v14 = vadd.f32 %v4476_v51, %v4428_v57  ;;  %v3927_v21 = vadd.f32 %v3926_v28, %v8061_v48  ;;  %v4482_v28 = vld [vmem:[#allocation3 + $0x50] sm:$0xff] }
 0x26b   : > { %v4415_v58 = vsel %vm1842_vm12, %v4335_v34, %v4336_v17  ;;  %v4339_v41 = vrot.slane %v6205_v30, 2  ;;  %v6154_v39 = vpop.f32.mrf.mxu1  ;;  %v4477_v34 = vld [vmem:[#allocation3 + $0x28] sm:$0xff] }
 0x26c   : > { %v4431_v47 = vadd.f32 %v4415_v58, %v3935_v0  ;;  %v4172_v27 = vpop.f32.mrf.mxu0  ;;  %4572 = vst.msk [vmem:[#allocation3 + $0x20] sm:$0xff] %vm1939_vm13, %v4524_v14  ;;  %v4429_v9 = vadd.f32 %v4417_v36, %v3927_v21  ;;  %v3948_v12 = vadd.f32 %v6154_v39, %v8085_v54 }
 0x26d   : > { %v4412_v59 = vsel %vm1842_vm12, %v4338_v16, %v4339_v41  ;;  %v4337_v46 = vrot.slane %v4172_v27, 2  ;;  %v3939_v29 = vpop.f32.mrf.mxu1 }
 0x26e   : > { %v4616_v61 = vld [vmem:[#allocation3] sm:$0xff]  ;;  %v4527_v33 = vadd.f32 %v4479_v15, %v4431_v47  ;;  %v8471_v45 = vpop.f32.mrf.mxu0  ;;  %v4525_v25 = vadd.f32 %v4477_v34, %v4429_v9  ;;  %v4434_v50 = vadd.f32 %v4412_v59, %v3948_v12  ;;  %v3940_v51 = vadd.f32 %v3939_v29, %v8089_v6 }
 0x26f   : > { %v4625_v48 = vadd.f32 %v8456_v18, %v4616_v61  ;;  %v4414_v54 = vsel %vm1842_vm12, %v4336_v17, %v4337_v46  ;;  %v4617_v19 = vld [vmem:[#allocation3 + $0x8] sm:$0xff]  ;;  %v4640_v0 = vld [vmem:[#allocation3 + $0x18] sm:$0xff]  ;;  %v6155_v36 = vpop.f32.mrf.mxu1  ;;  %v4413_v17 = vsel %vm1842_vm12, %v4337_v46, %v4338_v16  ;;  %v4342_v6 = vrot.slane %v8471_v45, 2  ;;  %v4480_v34 = vld [vmem:[#allocation3 + $0x40] sm:$0xff] }
 0x270   : > { %4575 = vst.msk [vmem:[#allocation3 + $0x38] sm:$0xff] %vm1939_vm13, %v4527_v33  ;;  %v4185_v30 = vpop.f32.mrf.mxu0  ;;  %v4626_v14 = vadd.f32 %v8456_v18, %v4617_v19  ;;  %v4649_v21 = vadd.f32 %v8456_v18, %v4640_v0  ;;  %4573 = vst.msk [vmem:[#allocation3 + $0x28] sm:$0xff] %vm1939_vm13, %v4525_v25  ;;  %v4530_v58 = vadd.f32 %v4482_v28, %v4434_v50 }
 0x271   : > { %v4627_v57 = vmax.f32 %v4625_v48, 0.0  ;;  %v4664_v47 = vld [vmem:[#allocation3 + $0x30] sm:$0xff]  ;;  %v4432_v27 = vadd.f32 %v4414_v54, %v3940_v51  ;;  %v3942_v61 = vpop.f32.mrf.mxu1  ;;  %v4340_v9 = vrot.slane %v4185_v30, 2  ;;  %v3951_v46 = vadd.f32 %v6155_v36, %v8105_v38 }
 0x272   : > { %v8483_v12 = vpop.f32.mrf.mxu0  ;;  %v4628_v15 = vmax.f32 %v4626_v14, 0.0  ;;  %v4651_v59 = vmax.f32 %v4649_v21, 0.0  ;;  %v4673_v48 = vadd.f32 %v8456_v18, %v4664_v47  ;;  %4578 = vst.msk [vmem:[#allocation3 + $0x50] sm:$0xff] %vm1939_vm13, %v4530_v58  ;;  %v3943_v33 = vadd.f32 %v3942_v61, %v8093_v1  ;;  %v4483_v47 = vld [vmem:[#allocation3 + $0x58] sm:$0xff] }
 0x273   : > { %v5534_v39 = vpack.c.bf16 %v4627_v57, %v4627_v57  ;;  %v4641_v16 = vld [vmem:[#allocation3 + $0x20] sm:$0xff]  ;;  %v4528_v29 = vadd.f32 %v4480_v34, %v4432_v27  ;;  %v6158_v45 = vpop.f32.mrf.mxu1  ;;  %v4411_v25 = vsel %vm1842_vm12, %v4339_v41, %v4340_v9  ;;  %v4343_v50 = vrot.slane %v8483_v12, 2 }
 0x274   : > { %v4188_v54 = vpop.f32.mrf.mxu0  ;;  %v5535_v19 = vpack.c.bf16 %v4628_v15, %v4628_v15  ;;  %v5536_v1 = vpack.c.bf16 %v4651_v59, %v4651_v59  ;;  %v4675_v57 = vmax.f32 %v4673_v48, 0.0  ;;  %v4650_v0 = vadd.f32 %v8456_v18, %v4641_v16 }
 0x275   : > { %4638 = vst.msk [vmem:[%s8489_s9] sm:$0xf] %vm4637_vm14, %v5534_v39  ;;  %v4433_v51 = vadd.f32 %v4413_v17, %v3943_v33  ;;  %v3964_v38 = vadd.f32 %v6158_v45, %v8117_v10  ;;  %v4435_v28 = vadd.f32 %v4411_v25, %v3951_v46  ;;  %v3955_v36 = vpop.f32.mrf.mxu1  ;;  %v4408_v30 = vsel %vm1842_vm12, %v4342_v6, %v4343_v50  ;;  %v4481_v39 = vld [vmem:[#allocation3 + $0x48] sm:$0xff]  ;;  %v4486_v33 = vld [vmem:[#allocation3 + $0x70] sm:$0xff] }
 0x276   : > { %4576 = vst.msk [vmem:[#allocation3 + $0x40] sm:$0xff] %vm1939_vm13, %v4528_v29  ;;  %v8502_v14 = vpop.f32.mrf.mxu0  ;;  %v5538_v41 = vpack.c.bf16 %v4675_v57, %v4675_v57  ;;  %v4652_v21 = vmax.f32 %v4650_v0, 0.0  ;;  %v3956_v17 = vadd.f32 %v3955_v36, %v8121_v37  ;;  %v4341_v10 = vrot.slane %v4188_v54, 2  ;;  %v4484_v57 = vld [vmem:[#allocation3 + $0x60] sm:$0xff] }
 0x277   : > { %4639 = vst.msk [vmem:[%s8489_s9 + $0x4] sm:$0xf] %vm4637_vm14, %v5535_v19  ;;  %5456 = vst.msk [vmem:[%s8489_s9 + $0x8] sm:$0xf] %vm4637_vm14, %v5536_v1  ;;  %v4665_v58 = vld [vmem:[#allocation3 + $0x38] sm:$0xff]  ;;  %v4529_v61 = vadd.f32 %v4481_v39, %v4433_v51  ;;  %v4531_v12 = vadd.f32 %v4483_v47, %v4435_v28  ;;  %v4438_v15 = vadd.f32 %v4408_v30, %v3964_v38  ;;  %v6159_v59 = vpop.f32.mrf.mxu1  ;;  %v4346_v30 = vrot.slane %v8502_v14, 2 }
 0x278   : > { %v4674_v27 = vadd.f32 %v8456_v18, %v4665_v58  ;;  %v4201_v48 = vpop.f32.mrf.mxu0  ;;  %5461 = vst.msk [vmem:[%s8489_s9 + $0x10] sm:$0xf] %vm4637_vm14, %v5538_v41  ;;  %v5537_v34 = vpack.c.bf16 %v4652_v21, %v4652_v21  ;;  %v4410_v16 = vsel %vm1842_vm12, %v4340_v9, %v4341_v10  ;;  %v4409_v54 = vsel %vm1842_vm12, %v4341_v10, %v4342_v6 }
 0x279   : > { %v4689_v29 = vld [vmem:[#allocation3 + $0x50] sm:$0xff]  ;;  %4577 = vst.msk [vmem:[#allocation3 + $0x48] sm:$0xff] %vm1939_vm13, %v4529_v61  ;;  %4579 = vst.msk [vmem:[#allocation3 + $0x58] sm:$0xff] %vm1939_vm13, %v4531_v12  ;;  %v4534_v37 = vadd.f32 %v4486_v33, %v4438_v15  ;;  %v4436_v45 = vadd.f32 %v4410_v16, %v3956_v17  ;;  %v3958_v25 = vpop.f32.mrf.mxu1  ;;  %v4344_v0 = vrot.slane %v4201_v48, 2  ;;  %v3967_v28 = vadd.f32 %v6159_v59, %v8137_v44 }
 0x27a   : > { %v4676_v46 = vmax.f32 %v4674_v27, 0.0  ;;  %v6213_v19 = vpop.f32.mrf.mxu0  ;;  %5457 = vst.msk [vmem:[%s8489_s9 + $0xc] sm:$0xf] %vm4637_vm14, %v5537_v34  ;;  %v4698_v1 = vadd.f32 %v8456_v18, %v4689_v29  ;;  %v3959_v9 = vadd.f32 %v3958_v25, %v8125_v24  ;;  %v4485_v24 = vld [vmem:[#allocation3 + $0x68] sm:$0xff]  ;;  %v4490_v48 = vld [vmem:[#allocation3 + $0x90] sm:$0xff] }
 0x27b   : > { %v4347_v51 = vrot.slane %v6213_v19, 2  ;;  %4582 = vst.msk [vmem:[#allocation3 + $0x70] sm:$0xff] %vm1939_vm13, %v4534_v37  ;;  %v4532_v36 = vadd.f32 %v4484_v57, %v4436_v45  ;;  %v6162_v6 = vpop.f32.mrf.mxu1  ;;  %v4407_v47 = vsel %vm1842_vm12, %v4343_v50, %v4344_v0 }
 0x27c   : > { %v5539_v38 = vpack.c.bf16 %v4676_v46, %v4676_v46  ;;  %v4204_v41 = vpop.f32.mrf.mxu0  ;;  %v4700_v21 = vmax.f32 %v4698_v1, 0.0  ;;  %v4437_v58 = vadd.f32 %v4409_v54, %v3959_v9  ;;  %v3980_v39 = vadd.f32 %v6162_v6, %v8149_v62  ;;  %v4487_v62 = vld [vmem:[#allocation3 + $0x78] sm:$0xff]  ;;  %v4488_v54 = vld [vmem:[#allocation3 + $0x80] sm:$0xff] }
 0x27d   : > { %4580 = vst.msk [vmem:[#allocation3 + $0x60] sm:$0xff] %vm1939_vm13, %v4532_v36  ;;  %v4439_v17 = vadd.f32 %v4407_v47, %v3967_v28  ;;  %v3971_v44 = vpop.f32.mrf.mxu1  ;;  %v4404_v14 = vsel %vm1842_vm12, %v4346_v30, %v4347_v51  ;;  %v4345_v10 = vrot.slane %v4204_v41, 2  ;;  %v4491_v47 = vld [vmem:[#allocation3 + $0x98] sm:$0xff] }
 0x27e   : > { %5462 = vst.msk [vmem:[%s8489_s9 + $0x14] sm:$0xf] %vm4637_vm14, %v5539_v38  ;;  %v8533_v27 = vpop.f32.mrf.mxu0  ;;  %v5541_v61 = vpack.c.bf16 %v4700_v21, %v4700_v21  ;;  %v4533_v12 = vadd.f32 %v4485_v24, %v4437_v58  ;;  %v3972_v15 = vadd.f32 %v3971_v44, %v8153_v42  ;;  %v4442_v50 = vadd.f32 %v4404_v14, %v3980_v39  ;;  %v4489_v44 = vld [vmem:[#allocation3 + $0x88] sm:$0xff] }
 0x27f   : > { %v4535_v59 = vadd.f32 %v4487_v62, %v4439_v17  ;;  %v6163_v34 = vpop.f32.mrf.mxu1  ;;  %v4406_v33 = vsel %vm1842_vm12, %v4344_v0, %v4345_v10  ;;  %v4405_v1 = vsel %vm1842_vm12, %v4345_v10, %v4346_v30  ;;  %v4350_v57 = vrot.slane %v8533_v27, 2 }
 0x280   : > { %v4217_v16 = vpop.f32.mrf.mxu0  ;;  %v4688_v46 = vld [vmem:[#allocation3 + $0x48] sm:$0xff]  ;;  %5467 = vst.msk [vmem:[%s8489_s9 + $0x1c] sm:$0xf] %vm4637_vm14, %v5541_v61  ;;  %v4538_v29 = vadd.f32 %v4490_v48, %v4442_v50  ;;  %v4440_v37 = vadd.f32 %v4406_v33, %v3972_v15  ;;  %v3983_v42 = vadd.f32 %v6163_v34, %v8169_v40 }
 0x281   : > { %4581 = vst.msk [vmem:[#allocation3 + $0x68] sm:$0xff] %vm1939_vm13, %v4533_v12  ;;  %v4348_v45 = vrot.slane %v4217_v16, 2  ;;  %v4697_v25 = vadd.f32 %v8456_v18, %v4688_v46  ;;  %4583 = vst.msk [vmem:[#allocation3 + $0x78] sm:$0xff] %vm1939_vm13, %v4535_v59  ;;  %v3974_v19 = vpop.f32.mrf.mxu1  ;;  %v4494_v59 = vld [vmem:[#allocation3 + $0xb0] sm:$0xff] }
 0x282   : > { %v6217_v9 = vpop.f32.mrf.mxu0  ;;  %4586 = vst.msk [vmem:[#allocation3 + $0x90] sm:$0xff] %vm1939_vm13, %v4538_v29  ;;  %v4536_v0 = vadd.f32 %v4488_v54, %v4440_v37  ;;  %v3975_v38 = vadd.f32 %v3974_v19, %v8157_v22 }
 0x283   : > { %v4403_v28 = vsel %vm1842_vm12, %v4347_v51, %v4348_v45  ;;  %v4351_v36 = vrot.slane %v6217_v9, 2  ;;  %v4699_v6 = vmax.f32 %v4697_v25, 0.0  ;;  %v6166_v41 = vpop.f32.mrf.mxu1 }
 0x284   : > { %v4443_v40 = vadd.f32 %v4403_v28, %v3983_v42  ;;  %v4220_v21 = vpop.f32.mrf.mxu0  ;;  %v4712_v58 = vld [vmem:[#allocation3 + $0x60] sm:$0xff]  ;;  %4584 = vst.msk [vmem:[#allocation3 + $0x80] sm:$0xff] %vm1939_vm13, %v4536_v0  ;;  %v4441_v30 = vadd.f32 %v4405_v1, %v3975_v38  ;;  %v3996_v39 = vadd.f32 %v6166_v41, %v8181_v43 }
 0x285   : > { %v4400_v24 = vsel %vm1842_vm12, %v4350_v57, %v4351_v36  ;;  %v4349_v22 = vrot.slane %v4220_v21, 2  ;;  %v5540_v17 = vpack.c.bf16 %v4699_v6, %v4699_v6  ;;  %v4721_v51 = vadd.f32 %v8456_v18, %v4712_v58  ;;  %v3987_v10 = vpop.f32.mrf.mxu1  ;;  %v4492_v42 = vld [vmem:[#allocation3 + $0xa0] sm:$0xff] }
 0x286   : > { %v4539_v14 = vadd.f32 %v4491_v47, %v4443_v40  ;;  %v8556_v27 = vpop.f32.mrf.mxu0  ;;  %v4537_v61 = vadd.f32 %v4489_v44, %v4441_v30  ;;  %v3988_v12 = vadd.f32 %v3987_v10, %v8185_v26  ;;  %v4446_v62 = vadd.f32 %v4400_v24, %v3996_v39 }
 0x287   : > { %v4402_v43 = vsel %vm1842_vm12, %v4348_v45, %v4349_v22  ;;  %5466 = vst.msk [vmem:[%s8489_s9 + $0x18] sm:$0xf] %vm4637_vm14, %v5540_v17  ;;  %v4723_v50 = vmax.f32 %v4721_v51, 0.0  ;;  %v6167_v48 = vpop.f32.mrf.mxu1  ;;  %v4401_v29 = vsel %vm1842_vm12, %v4349_v22, %v4350_v57  ;;  %v4354_v19 = vrot.slane %v8556_v27, 2  ;;  %v4493_v51 = vld [vmem:[#allocation3 + $0xa8] sm:$0xff] }
 0x288   : > { %v4713_v15 = vld [vmem:[#allocation3 + $0x68] sm:$0xff]  ;;  %4587 = vst.msk [vmem:[#allocation3 + $0x98] sm:$0xff] %vm1939_vm13, %v4539_v14  ;;  %v8564_v34 = vpop.f32.mrf.mxu0  ;;  %v4736_v16 = vld [vmem:[#allocation3 + $0x78] sm:$0xff]  ;;  %4585 = vst.msk [vmem:[#allocation3 + $0x88] sm:$0xff] %vm1939_vm13, %v4537_v61  ;;  %v4542_v26 = vadd.f32 %v4494_v59, %v4446_v62  ;;  %v4444_v46 = vadd.f32 %v4402_v43, %v3988_v12  ;;  %v3999_v40 = vadd.f32 %v6167_v48, %v8201_v63 }
 0x289   : > { %v4722_v33 = vadd.f32 %v8456_v18, %v4713_v15  ;;  %v5542_v37 = vpack.c.bf16 %v4723_v50, %v4723_v50  ;;  %v4745_v45 = vadd.f32 %v8456_v18, %v4736_v16  ;;  %v4760_v25 = vld [vmem:[#allocation3 + $0x90] sm:$0xff]  ;;  %v3990_v54 = vpop.f32.mrf.mxu1  ;;  %v4352_v1 = vrot.slane %v8564_v34, 2  ;;  %v4495_v43 = vld [vmem:[#allocation3 + $0xb8] sm:$0xff] }
 0x28a   : > { %v6221_v9 = vpop.f32.mrf.mxu0  ;;  %v4769_v38 = vadd.f32 %v8456_v18, %v4760_v25  ;;  %4590 = vst.msk [vmem:[#allocation3 + $0xb0] sm:$0xff] %vm1939_vm13, %v4542_v26  ;;  %v4540_v28 = vadd.f32 %v4492_v42, %v4444_v46  ;;  %v3991_v6 = vadd.f32 %v3990_v54, %v8189_v3  ;;  %v4498_v26 = vld [vmem:[#allocation3 + $0xd0] sm:$0xff] }
 0x28b   : > { %v4724_v0 = vmax.f32 %v4722_v33, 0.0  ;;  %5471 = vst.msk [vmem:[%s8489_s9 + $0x20] sm:$0xf] %vm4637_vm14, %v5542_v37  ;;  %v4747_v57 = vmax.f32 %v4745_v45, 0.0  ;;  %v4737_v41 = vld [vmem:[#allocation3 + $0x80] sm:$0xff]  ;;  %v6170_v21 = vpop.f32.mrf.mxu1  ;;  %v4399_v58 = vsel %vm1842_vm12, %v4351_v36, %v4352_v1  ;;  %v4355_v30 = vrot.slane %v6221_v9, 2 }
 0x28c   : > { %v4236_v39 = vpop.f32.mrf.mxu0  ;;  %v4771_v24 = vmax.f32 %v4769_v38, 0.0  ;;  %v4746_v22 = vadd.f32 %v8456_v18, %v4737_v41  ;;  %4588 = vst.msk [vmem:[#allocation3 + $0xa0] sm:$0xff] %vm1939_vm13, %v4540_v28  ;;  %v4445_v3 = vadd.f32 %v4401_v29, %v3991_v6  ;;  %v4012_v44 = vadd.f32 %v6170_v21, %v8213_v23 }
 0x28d   : > { %v5543_v47 = vpack.c.bf16 %v4724_v0, %v4724_v0  ;;  %v5544_v17 = vpack.c.bf16 %v4747_v57, %v4747_v57  ;;  %v4447_v63 = vadd.f32 %v4399_v58, %v3999_v40  ;;  %v4003_v14 = vpop.f32.mrf.mxu1  ;;  %v4396_v36 = vsel %vm1842_vm12, %v4354_v19, %v4355_v30 }
 0x28e   : > { %v8586_v10 = vpop.f32.mrf.mxu0  ;;  %v5546_v27 = vpack.c.bf16 %v4771_v24, %v4771_v24  ;;  %v4748_v61 = vmax.f32 %v4746_v22, 0.0  ;;  %v4541_v62 = vadd.f32 %v4493_v51, %v4445_v3  ;;  %v4450_v50 = vadd.f32 %v4396_v36, %v4012_v44  ;;  %v4499_v22 = vld [vmem:[#allocation3 + $0xd8] sm:$0xff] }
 0x28f   : > { %5472 = vst.msk [vmem:[%s8489_s9 + $0x24] sm:$0xf] %vm4637_vm14, %v5543_v47  ;;  %v4761_v12 = vld [vmem:[#allocation3 + $0x98] sm:$0xff]  ;;  %5476 = vst.msk [vmem:[%s8489_s9 + $0x28] sm:$0xf] %vm4637_vm14, %v5544_v17  ;;  %v4543_v23 = vadd.f32 %v4495_v43, %v4447_v63  ;;  %v6171_v59 = vpop.f32.mrf.mxu1  ;;  %v4353_v48 = vrot.slane %v4236_v39, 2  ;;  %v4004_v16 = vadd.f32 %v4003_v14, %v8217_v2 }
 0x290   : > { %v4770_v15 = vadd.f32 %v8456_v18, %v4761_v12  ;;  %v4249_v34 = vpop.f32.mrf.mxu0  ;;  %5481 = vst.msk [vmem:[%s8489_s9 + $0x30] sm:$0xf] %vm4637_vm14, %v5546_v27  ;;  %v5545_v33 = vpack.c.bf16 %v4748_v61, %v4748_v61  ;;  %v4015_v46 = vadd.f32 %v6171_v59, %v8233_v53  ;;  %v4546_v25 = vadd.f32 %v4498_v26, %v4450_v50  ;;  %v4502_v27 = vld [vmem:[#allocation3 + $0xf0] sm:$0xff]  ;;  %v4500_v50 = vld [vmem:[#allocation3 + $0xe0] sm:$0xff] }
 0x291   : > { %4589 = vst.msk [vmem:[#allocation3 + $0xa8] sm:$0xff] %vm1939_vm13, %v4541_v62  ;;  %v4356_v29 = vrot.slane %v4249_v34, 2  ;;  %v4785_v45 = vld [vmem:[#allocation3 + $0xb0] sm:$0xff]  ;;  %4591 = vst.msk [vmem:[#allocation3 + $0xb8] sm:$0xff] %vm1939_vm13, %v4543_v23  ;;  %v4398_v42 = vsel %vm1842_vm12, %v4352_v1, %v4353_v48  ;;  %v4006_v54 = vpop.f32.mrf.mxu1  ;;  %v4397_v9 = vsel %vm1842_vm12, %v4353_v48, %v4354_v19  ;;  %v4496_v1 = vld [vmem:[#allocation3 + $0xc0] sm:$0xff]  ;;  %v4358_v57 = vrot.slane %v8586_v10, 2 }
 0x292   : > { %v4772_v37 = vmax.f32 %v4770_v15, 0.0  ;;  %v6225_v0 = vpop.f32.mrf.mxu0  ;;  %5477 = vst.msk [vmem:[%s8489_s9 + $0x2c] sm:$0xf] %vm4637_vm14, %v5545_v33  ;;  %v4794_v2 = vadd.f32 %v8456_v18, %v4785_v45  ;;  %v4448_v38 = vadd.f32 %v4398_v42, %v4004_v16  ;;  %v4007_v53 = vadd.f32 %v4006_v54, %v8221_v5  ;;  %v4497_v5 = vld [vmem:[#allocation3 + $0xc8] sm:$0xff] }
 0x293   : > { %v4395_v28 = vsel %vm1842_vm12, %v4355_v30, %v4356_v29  ;;  %4594 = vst.msk [vmem:[#allocation3 + $0xd0] sm:$0xff] %vm1939_vm13, %v4546_v25  ;;  %v6174_v41 = vpop.f32.mrf.mxu1  ;;  %v4359_v40 = vrot.slane %v6225_v0, 2 }
 0x294   : > { %v5547_v6 = vpack.c.bf16 %v4772_v37, %v4772_v37  ;;  %v4451_v19 = vadd.f32 %v4395_v28, %v4015_v46  ;;  %v4252_v21 = vpop.f32.mrf.mxu0  ;;  %v4796_v58 = vmax.f32 %v4794_v2, 0.0  ;;  %v4544_v39 = vadd.f32 %v4496_v1, %v4448_v38  ;;  %v4501_v2 = vld [vmem:[#allocation3 + $0xe8] sm:$0xff] }
 0x295   : > { %v4449_v47 = vadd.f32 %v4397_v9, %v4007_v53  ;;  %v4028_v24 = vadd.f32 %v6174_v41, %v8245_v31  ;;  %v4019_v3 = vpop.f32.mrf.mxu1  ;;  %v4392_v17 = vsel %vm1842_vm12, %v4358_v57, %v4359_v40  ;;  %v4357_v51 = vrot.slane %v4252_v21, 2  ;;  %v4503_v53 = vld [vmem:[#allocation3 + $0xf8] sm:$0xff] }
 0x296   : > { %5482 = vst.msk [vmem:[%s8489_s9 + $0x34] sm:$0xf] %vm4637_vm14, %v5547_v6  ;;  %v4547_v30 = vadd.f32 %v4499_v22, %v4451_v19  ;;  %v6228_v44 = vpop.f32.mrf.mxu0  ;;  %v5549_v63 = vpack.c.bf16 %v4796_v58, %v4796_v58  ;;  %v4020_v36 = vadd.f32 %v4019_v3, %v8249_v49 }
 0x297   : > { %4592 = vst.msk [vmem:[#allocation3 + $0xc0] sm:$0xff] %vm1939_vm13, %v4544_v39  ;;  %v4545_v14 = vadd.f32 %v4497_v5, %v4449_v47  ;;  %v4454_v10 = vadd.f32 %v4392_v17, %v4028_v24  ;;  %v6175_v61 = vpop.f32.mrf.mxu1  ;;  %v4394_v12 = vsel %vm1842_vm12, %v4356_v29, %v4357_v51  ;;  %v4393_v48 = vsel %vm1842_vm12, %v4357_v51, %v4358_v57 }
 0x298   : > { %v4784_v31 = vld [vmem:[#allocation3 + $0xa8] sm:$0xff]  ;;  %4595 = vst.msk [vmem:[#allocation3 + $0xd8] sm:$0xff] %vm1939_vm13, %v4547_v30  ;;  %v4265_v62 = vpop.f32.mrf.mxu0  ;;  %v4452_v23 = vadd.f32 %v4394_v12, %v4020_v36  ;;  %v4031_v49 = vadd.f32 %v6175_v61, %v8265_v4  ;;  %v4362_v37 = vrot.slane %v6228_v44, 2  ;;  %v4504_v36 = vld [vmem:[#allocation3 + $0x100] sm:$0xff] }
 0x299   : > { %v4793_v43 = vadd.f32 %v8456_v18, %v4784_v31  ;;  %5487 = vst.msk [vmem:[%s8489_s9 + $0x3c] sm:$0xf] %vm4637_vm14, %v5549_v63  ;;  %v4550_v15 = vadd.f32 %v4502_v27, %v4454_v10  ;;  %v4022_v59 = vpop.f32.mrf.mxu1  ;;  %v4360_v34 = vrot.slane %v4265_v62, 2 }
 0x29a   : > { %4593 = vst.msk [vmem:[#allocation3 + $0xc8] sm:$0xff] %vm1939_vm13, %v4545_v14  ;;  %v6229_v33 = vpop.f32.mrf.mxu0  ;;  %v4548_v26 = vadd.f32 %v4500_v50, %v4452_v23  ;;  %v4023_v46 = vadd.f32 %v4022_v59, %v8253_v60 }
 0x29b   : > { %v4795_v16 = vmax.f32 %v4793_v43, 0.0  ;;  %4598 = vst.msk [vmem:[#allocation3 + $0xf0] sm:$0xff] %vm1939_vm13, %v4550_v15  ;;  %v4363_v29 = vrot.slane %v6229_v33, 2  ;;  %v6178_v45 = vpop.f32.mrf.mxu1  ;;  %v4391_v4 = vsel %vm1842_vm12, %v4359_v40, %v4360_v34 }
 0x29c   : > { %v4268_v25 = vpop.f32.mrf.mxu0  ;;  %4596 = vst.msk [vmem:[#allocation3 + $0xe0] sm:$0xff] %vm1939_vm13, %v4548_v26  ;;  %v4453_v54 = vadd.f32 %v4393_v48, %v4023_v46  ;;  %v4455_v9 = vadd.f32 %v4391_v4, %v4031_v49  ;;  %v4044_v38 = vadd.f32 %v6178_v45, %v8277_v52 }
 0x29d   : > { %v5548_v42 = vpack.c.bf16 %v4795_v16, %v4795_v16  ;;  %v4035_v28 = vpop.f32.mrf.mxu1  ;;  %v4388_v60 = vsel %vm1842_vm12, %v4362_v37, %v4363_v29  ;;  %v4361_v6 = vrot.slane %v4268_v25, 2 }
 0x29e   : > { %v4808_v0 = vld [vmem:[#allocation3 + $0xc0] sm:$0xff]  ;;  %v8636_v1 = vpop.f32.mrf.mxu0  ;;  %v4549_v19 = vadd.f32 %v4501_v2, %v4453_v54  ;;  %v4551_v40 = vadd.f32 %v4503_v53, %v4455_v9  ;;  %v4036_v21 = vadd.f32 %v4035_v28, %v8281_v7  ;;  %v4458_v39 = vadd.f32 %v4388_v60, %v4044_v38  ;;  %v4506_v7 = vld [vmem:[#allocation3 + $0x110] sm:$0xff]  ;;  %v4505_v9 = vld [vmem:[#allocation3 + $0x108] sm:$0xff] }
 0x29f   : > { %5486 = vst.msk [vmem:[%s8489_s9 + $0x38] sm:$0xf] %vm4637_vm14, %v5548_v42  ;;  %v4817_v57 = vadd.f32 %v8456_v18, %v4808_v0  ;;  %v4832_v41 = vld [vmem:[#allocation3 + $0xd8] sm:$0xff]  ;;  %v6179_v47 = vpop.f32.mrf.mxu1  ;;  %v4390_v24 = vsel %vm1842_vm12, %v4360_v34, %v4361_v6  ;;  %v4389_v22 = vsel %vm1842_vm12, %v4361_v6, %v4362_v37  ;;  %v4366_v31 = vrot.slane %v8636_v1, 2  ;;  %v8974_v28 = vld [vmem:[#allocation16_spill] sm:$0xff]  ;;  %v4510_v6 = vld [vmem:[#allocation3 + $0x130] sm:$0xff] }
 0x2a0   : > { %v4841_v52 = vadd.f32 %v8456_v18, %v4832_v41  ;;  %v4281_v5 = vpop.f32.mrf.mxu0  ;;  %4597 = vst.msk [vmem:[#allocation3 + $0xe8] sm:$0xff] %vm1939_vm13, %v4549_v19  ;;  %4599 = vst.msk [vmem:[#allocation3 + $0xf8] sm:$0xff] %vm1939_vm13, %v4551_v40  ;;  %v4047_v17 = vadd.f32 %v6179_v47, %v8297_v11  ;;  %v4456_v51 = vadd.f32 %v4390_v24, %v4036_v21  ;;  %v4507_v0 = vld [vmem:[#allocation3 + $0x118] sm:$0xff] }
 0x2a1   : > { %v4809_v58 = vld [vmem:[#allocation3 + $0xc8] sm:$0xff]  ;;  %v4819_v3 = vmax.f32 %v4817_v57, 0.0  ;;  %v4554_v14 = vadd.f32 %v4506_v7, %v4458_v39  ;;  %v4038_v10 = vpop.f32.mrf.mxu1  ;;  %v4364_v27 = vrot.slane %v4281_v5, 2  ;;  %v4508_v7 = vld [vmem:[#allocation3 + $0x120] sm:$0xff] }
 0x2a2   : > { %v4818_v30 = vadd.f32 %v8456_v18, %v4809_v58  ;;  %v4843_v44 = vmax.f32 %v4841_v52, 0.0  ;;  %v4856_v63 = vld [vmem:[#allocation3 + $0xf0] sm:$0xff]  ;;  %v8652_v61 = vpop.f32.mrf.mxu0  ;;  %v4552_v15 = vadd.f32 %v4504_v36, %v4456_v51  ;;  %v4039_v49 = vadd.f32 %v4038_v10, %v8285_v8 }
 0x2a3   : > { %v5550_v62 = vpack.c.bf16 %v4819_v3, %v4819_v3  ;;  %v4865_v43 = vadd.f32 %v8456_v18, %v4856_v63  ;;  %v4833_v11 = vld [vmem:[#allocation3 + $0xe0] sm:$0xff]  ;;  %4602 = vst.msk [vmem:[#allocation3 + $0x110] sm:$0xff] %vm1939_vm13, %v4554_v14  ;;  %v6182_v50 = vpop.f32.mrf.mxu1  ;;  %v4387_v59 = vsel %vm1842_vm12, %v4363_v29, %v4364_v27  ;;  %v4367_v48 = vrot.slane %v8652_v61, 2 }
 0x2a4   : > { %v4820_v12 = vmax.f32 %v4818_v30, 0.0  ;;  %v5552_v23 = vpack.c.bf16 %v4843_v44, %v4843_v44  ;;  %v4284_v34 = vpop.f32.mrf.mxu0  ;;  %v4842_v26 = vadd.f32 %v8456_v18, %v4833_v11  ;;  %4600 = vst.msk [vmem:[#allocation3 + $0x100] sm:$0xff] %vm1939_vm13, %v4552_v15  ;;  %v4060_v46 = vadd.f32 %v6182_v50, %v8309_v20  ;;  %v8975_v30 = vld [vmem:[#allocation27_spill] sm:$0xff]  ;;  %v4511_v11 = vld [vmem:[#allocation3 + $0x138] sm:$0xff] }
 0x2a5   : > { %5491 = vst.msk [vmem:[%s8489_s9 + $0x40] sm:$0xf] %vm4637_vm14, %v5550_v62  ;;  %v4867_v16 = vmax.f32 %v4865_v43, 0.0  ;;  %v4457_v8 = vadd.f32 %v4389_v22, %v4039_v49  ;;  %v4459_v37 = vadd.f32 %v4387_v59, %v4047_v17  ;;  %v4051_v45 = vpop.f32.mrf.mxu1  ;;  %v4384_v29 = vsel %vm1842_vm12, %v4366_v31, %v4367_v48  ;;  %v8976_v17 = vld [vmem:[#allocation23_spill] sm:$0xff] }
 0x2a6   : > { %v5551_v33 = vpack.c.bf16 %v4820_v12, %v4820_v12  ;;  %5496 = vst.msk [vmem:[%s8489_s9 + $0x48] sm:$0xf] %vm4637_vm14, %v5552_v23  ;;  %v4365_v4 = vrot.slane %v4284_v34, 2  ;;  %v8669_v25 = vpop.f32.mrf.mxu0  ;;  %v4844_v54 = vmax.f32 %v4842_v26, 0.0  ;;  %v4462_v2 = vadd.f32 %v4384_v29, %v4060_v46  ;;  %v4509_v23 = vld [vmem:[#allocation3 + $0x128] sm:$0xff] }
 0x2a7   : > { %v5554_v42 = vpack.c.bf16 %v4867_v16, %v4867_v16  ;;  %v4857_v20 = vld [vmem:[#allocation3 + $0xf8] sm:$0xff]  ;;  %v4553_v38 = vadd.f32 %v4505_v9, %v4457_v8  ;;  %v4555_v53 = vadd.f32 %v4507_v0, %v4459_v37  ;;  %v4052_v60 = vadd.f32 %v4051_v45, %v8974_v28  ;;  %v6183_v1 = vpop.f32.mrf.mxu1  ;;  %v8977_v16 = vld [vmem:[#allocation24_spill] sm:$0xff]  ;;  %v4514_v8 = vld [vmem:[#allocation3 + $0x150] sm:$0xff] }
 0x2a8   : > { %5492 = vst.msk [vmem:[%s8489_s9 + $0x44] sm:$0xf] %vm4637_vm14, %v5551_v33  ;;  %v4386_v57 = vsel %vm1842_vm12, %v4364_v27, %v4365_v4  ;;  %v4297_v41 = vpop.f32.mrf.mxu0  ;;  %v5553_v19 = vpack.c.bf16 %v4844_v54, %v4844_v54  ;;  %v4866_v40 = vadd.f32 %v8456_v18, %v4857_v20  ;;  %v4558_v21 = vadd.f32 %v4510_v6, %v4462_v2  ;;  %v8978_v0 = vld [vmem:[#allocation20_spill] sm:$0xff]  ;;  %v4512_v20 = vld [vmem:[#allocation3 + $0x140] sm:$0xff] }
 0x2a9   : > { %5501 = vst.msk [vmem:[%s8489_s9 + $0x50] sm:$0xf] %vm4637_vm14, %v5554_v42  ;;  %v4460_v58 = vadd.f32 %v4386_v57, %v4052_v60  ;;  %v4054_v52 = vpop.f32.mrf.mxu1  ;;  %v4385_v39 = vsel %vm1842_vm12, %v4365_v4, %v4366_v31  ;;  %v4368_v47 = vrot.slane %v4297_v41, 2  ;;  %v4063_v3 = vadd.f32 %v6183_v1, %v8975_v30  ;;  %v8979_v1 = vld [vmem:[#allocation19_spill] sm:$0xff] }
 0x2aa   : > { %4601 = vst.msk [vmem:[#allocation3 + $0x108] sm:$0xff] %vm1939_vm13, %v4553_v38  ;;  %4603 = vst.msk [vmem:[#allocation3 + $0x118] sm:$0xff] %vm1939_vm13, %v4555_v53  ;;  %v6237_v24 = vpop.f32.mrf.mxu0  ;;  %v4868_v22 = vmax.f32 %v4866_v40, 0.0  ;;  %v4881_v5 = vld [vmem:[#allocation3 + $0x110] sm:$0xff]  ;;  %v4055_v51 = vadd.f32 %v4054_v52, %v8976_v17  ;;  %v4370_v36 = vrot.slane %v8669_v25, 2 }
 0x2ab   : > { %5497 = vst.msk [vmem:[%s8489_s9 + $0x4c] sm:$0xf] %vm4637_vm14, %v5553_v19  ;;  %v4371_v44 = vrot.slane %v6237_v24, 2  ;;  %v4890_v63 = vadd.f32 %v8456_v18, %v4881_v5  ;;  %v4556_v14 = vadd.f32 %v4508_v7, %v4460_v58  ;;  %v6186_v10 = vpop.f32.mrf.mxu1  ;;  %v4383_v31 = vsel %vm1842_vm12, %v4367_v48, %v4368_v47  ;;  %v8980_v24 = vld [vmem:[#allocation31_spill] sm:$0xff]  ;;  %v4515_v5 = vld [vmem:[#allocation3 + $0x158] sm:$0xff] }
 0x2ac   : > { %4606 = vst.msk [vmem:[#allocation3 + $0x130] sm:$0xff] %vm1939_vm13, %v4558_v21  ;;  %v4300_v27 = vpop.f32.mrf.mxu0  ;;  %v5555_v61 = vpack.c.bf16 %v4868_v22, %v4868_v22  ;;  %v4461_v12 = vadd.f32 %v4385_v39, %v4055_v51  ;;  %v4076_v62 = vadd.f32 %v6186_v10, %v8341_v55  ;;  %v4463_v43 = vadd.f32 %v4383_v31, %v4063_v3  ;;  %v8724_v17 = vld [vmem:[%s8831_s2] ss:$0 sm:$0xff] }
 0x2ad   : > { %v4892_v15 = vmax.f32 %v4890_v63, 0.0  ;;  %4604 = vst.msk [vmem:[#allocation3 + $0x120] sm:$0xff] %vm1939_vm13, %v4556_v14  ;;  %v4067_v49 = vpop.f32.mrf.mxu1  ;;  %v4380_v50 = vsel %vm1842_vm12, %v4370_v36, %v4371_v44  ;;  %v4369_v59 = vrot.slane %v4300_v27, 2  ;;  %v4513_v51 = vld [vmem:[#allocation3 + $0x148] sm:$0xff]  ;;  %v8981_v31 = vrot.slane %v8964_v56, 1 }
 0x2ae   : > { %v8696_v34 = vpop.f32.mrf.mxu0  ;;  %5502 = vst.msk [vmem:[%s8489_s9 + $0x54] sm:$0xf] %vm4637_vm14, %v5555_v61  ;;  %v4557_v48 = vadd.f32 %v4509_v23, %v4461_v12  ;;  %v4559_v33 = vadd.f32 %v4511_v11, %v4463_v43  ;;  %v4068_v55 = vadd.f32 %v4067_v49, %v8977_v16  ;;  %v4466_v26 = vadd.f32 %v4380_v50, %v4076_v62  ;;  %v8982_v27 = vld [vmem:[#allocation28_spill] sm:$0xff]  ;;  %v8984_v23 = vld [vmem:[#allocation26_spill] sm:$0xff]  ;;  %v4518_v49 = vld [vmem:[#allocation3 + $0x170] sm:$0xff] }
 0x2af   : > { %v5557_v46 = vpack.c.bf16 %v4892_v15, %v4892_v15  ;;  %v6187_v37 = vpop.f32.mrf.mxu1  ;;  %v4382_v45 = vsel %vm1842_vm12, %v4368_v47, %v4369_v59  ;;  %v4381_v53 = vsel %vm1842_vm12, %v4369_v59, %v4370_v36  ;;  %v4374_v28 = vrot.slane %v8696_v34, 2 }
 0x2b0   : > { %v4313_v29 = vpop.f32.mrf.mxu0  ;;  %4605 = vst.msk [vmem:[#allocation3 + $0x128] sm:$0xff] %vm1939_vm13, %v4557_v48  ;;  %4607 = vst.msk [vmem:[#allocation3 + $0x138] sm:$0xff] %vm1939_vm13, %v4559_v33  ;;  %v4562_v25 = vadd.f32 %v4514_v8, %v4466_v26  ;;  %v4464_v42 = vadd.f32 %v4382_v45, %v4068_v55  ;;  %v4079_v2 = vadd.f32 %v6187_v37, %v8978_v0  ;;  %v8983_v61 = vrot.slane %v8982_v27, 1 }
 0x2b1   : > { %v4880_v4 = vld [vmem:[#allocation3 + $0x108] sm:$0xff]  ;;  %v4372_v54 = vrot.slane %v4313_v29, 2  ;;  %5507 = vst.msk [vmem:[%s8489_s9 + $0x5c] sm:$0xf] %vm4637_vm14, %v5557_v46  ;;  %v4070_v38 = vpop.f32.mrf.mxu1  ;;  %v4516_v29 = vld [vmem:[#allocation3 + $0x160] sm:$0xff] }
 0x2b2   : > { %v4889_v9 = vadd.f32 %v8456_v18, %v4880_v4  ;;  %v6241_v60 = vpop.f32.mrf.mxu0  ;;  %4610 = vst.msk [vmem:[#allocation3 + $0x150] sm:$0xff] %vm1939_vm13, %v4562_v25  ;;  %v4560_v6 = vadd.f32 %v4512_v20, %v4464_v42  ;;  %v4071_v57 = vadd.f32 %v4070_v38, %v8979_v1  ;;  %v3869_v12 = vsel %vm1287_vm11, %v8983_v61, %v8981_v31  ;;  %v8985_v42 = vld [vmem:[#allocation32_spill] sm:$0xff]  ;;  %v4519_v20 = vld [vmem:[#allocation3 + $0x178] sm:$0xff] }
 0x2b3   : > { %v4379_v41 = vsel %vm1842_vm12, %v4371_v44, %v4372_v54  ;;  %v4375_v19 = vrot.slane %v6241_v60, 2  ;;  %v6190_v21 = vpop.f32.mrf.mxu1  ;;  %v4517_v1 = vld [vmem:[#allocation3 + $0x168] sm:$0xff] }
 0x2b4   : > { %v4891_v40 = vmax.f32 %v4889_v9, 0.0  ;;  %v4467_v58 = vadd.f32 %v4379_v41, %v4079_v2  ;;  %v4316_v52 = vpop.f32.mrf.mxu0  ;;  %v4904_v39 = vld [vmem:[#allocation3 + $0x120] sm:$0xff]  ;;  %4608 = vst.msk [vmem:[#allocation3 + $0x140] sm:$0xff] %vm1939_vm13, %v4560_v6  ;;  %v4465_v47 = vadd.f32 %v4381_v53, %v4071_v57  ;;  %v4092_v22 = vadd.f32 %v6190_v21, %v8980_v24 }
 0x2b5   : > { %v4376_v30 = vsel %vm1842_vm12, %v4374_v28, %v4375_v19  ;;  %v4913_v7 = vadd.f32 %v8456_v18, %v4904_v39  ;;  %v4083_v63 = vpop.f32.mrf.mxu1  ;;  %v4373_v14 = vrot.slane %v4316_v52, 2  ;;  %v4423_v56 = vsel %vm1842_vm12, %v4375_v19, %v4328_v32 }
 0x2b6   : > { %v5556_v3 = vpack.c.bf16 %v4891_v40, %v4891_v40  ;;  %v4563_v44 = vadd.f32 %v4515_v5, %v4467_v58  ;;  %v4561_v36 = vadd.f32 %v4513_v51, %v4465_v47  ;;  %v4470_v10 = vadd.f32 %v4376_v30, %v4092_v22 }
 0x2b7   : > { %v4905_v62 = vld [vmem:[#allocation3 + $0x128] sm:$0xff]  ;;  %v4915_v43 = vmax.f32 %v4913_v7, 0.0  ;;  %v4928_v15 = vld [vmem:[#allocation3 + $0x138] sm:$0xff]  ;;  %v4084_v11 = vadd.f32 %v4083_v63, %v8984_v23  ;;  %v6191_v50 = vpop.f32.mrf.mxu1  ;;  %v4378_v59 = vsel %vm1842_vm12, %v4372_v54, %v4373_v14  ;;  %v4377_v35 = vsel %vm1842_vm12, %v4373_v14, %v4374_v28 }
 0x2b8   : > { %5506 = vst.msk [vmem:[%s8489_s9 + $0x58] sm:$0xf] %vm4637_vm14, %v5556_v3  ;;  %v4914_v34 = vadd.f32 %v8456_v18, %v4905_v62  ;;  %v4937_v48 = vadd.f32 %v8724_v17, %v4928_v15  ;;  %v4566_v33 = vadd.f32 %v4518_v49, %v4470_v10  ;;  %v4095_v16 = vadd.f32 %v6191_v50, %v3869_v12 }
 0x2b9   : > { %4611 = vst.msk [vmem:[#allocation3 + $0x158] sm:$0xff] %vm1939_vm13, %v4563_v44  ;;  %4609 = vst.msk [vmem:[#allocation3 + $0x148] sm:$0xff] %vm1939_vm13, %v4561_v36  ;;  %v5558_v55 = vpack.c.bf16 %v4915_v43, %v4915_v43  ;;  %v4952_v26 = vld [vmem:[#allocation3 + $0x150] sm:$0xff]  ;;  %v4468_v46 = vadd.f32 %v4378_v59, %v4084_v11  ;;  %v4086_v8 = vpop.f32.mrf.mxu1 }
 0x2ba   : > { %v4916_v32 = vmax.f32 %v4914_v34, 0.0  ;;  %v4939_v37 = vmax.f32 %v4937_v48, 0.0  ;;  %v4961_v45 = vadd.f32 %v8724_v17, %v4952_v26  ;;  %4614 = vst.msk [vmem:[#allocation3 + $0x170] sm:$0xff] %vm1939_vm13, %v4566_v33  ;;  %v4471_v18 = vadd.f32 %v4423_v56, %v4095_v16 }
 0x2bb   : > { %5511 = vst.msk [vmem:[%s8489_s9 + $0x60] sm:$0xf] %vm4637_vm14, %v5558_v55  ;;  %v4929_v4 = vld [vmem:[#allocation3 + $0x140] sm:$0xff]  ;;  %v4564_v25 = vadd.f32 %v4516_v29, %v4468_v46  ;;  %v4087_v54 = vadd.f32 %v4086_v8, %v8985_v42 }
 0x2bc   : > { %v5559_v9 = vpack.c.bf16 %v4916_v32, %v4916_v32  ;;  %v5560_v0 = vpack.c.bf16 %v4939_v37, %v4939_v37  ;;  %v4963_v13 = vmax.f32 %v4961_v45, 0.0  ;;  %v4938_v2 = vadd.f32 %v8724_v17, %v4929_v4 }
 0x2bd   : > { %v4567_v38 = vadd.f32 %v4519_v20, %v4471_v18  ;;  %4612 = vst.msk [vmem:[#allocation3 + $0x160] sm:$0xff] %vm1939_vm13, %v4564_v25  ;;  %v4469_v53 = vadd.f32 %v4377_v35, %v4087_v54 }
 0x2be   : > { %5512 = vst.msk [vmem:[%s8489_s9 + $0x64] sm:$0xf] %vm4637_vm14, %v5559_v9  ;;  %5516 = vst.msk [vmem:[%s8489_s9 + $0x68] sm:$0xf] %vm4637_vm14, %v5560_v0  ;;  %v5562_v28 = vpack.c.bf16 %v4963_v13, %v4963_v13  ;;  %v4940_v60 = vmax.f32 %v4938_v2, 0.0 }
 0x2bf   : > { %4615 = vst.msk [vmem:[#allocation3 + $0x178] sm:$0xff] %vm1939_vm13, %v4567_v38  ;;  %v4565_v41 = vadd.f32 %v4517_v1, %v4469_v53 }
 0x2c0   : > { %v4953_v6 = vld [vmem:[#allocation3 + $0x158] sm:$0xff]  ;;  %5521 = vst.msk [vmem:[%s8489_s9 + $0x70] sm:$0xf] %vm4637_vm14, %v5562_v28  ;;  %v5561_v19 = vpack.c.bf16 %v4940_v60, %v4940_v60 }
 0x2c1   : > { %v4962_v57 = vadd.f32 %v8724_v17, %v4953_v6  ;;  %v4977_v21 = vld [vmem:[#allocation3 + $0x170] sm:$0xff]  ;;  %4613 = vst.msk [vmem:[#allocation3 + $0x168] sm:$0xff] %vm1939_vm13, %v4565_v41 }
 0x2c2   : > { %5517 = vst.msk [vmem:[%s8489_s9 + $0x6c] sm:$0xf] %vm4637_vm14, %v5561_v19  ;;  %v4986_v58 = vadd.f32 %v8724_v17, %v4977_v21 }
 0x2c3   : > { %v4964_v40 = vmax.f32 %v4962_v57, 0.0 }
 0x2c4   : > { %v4988_v39 = vmax.f32 %v4986_v58, 0.0 }
 0x2c5   : > { %v5563_v52 = vpack.c.bf16 %v4964_v40, %v4964_v40 }
 0x2c6   : > { %v5565_v47 = vpack.c.bf16 %v4988_v39, %v4988_v39 }
 0x2c7   : > { %5522 = vst.msk [vmem:[%s8489_s9 + $0x74] sm:$0xf] %vm4637_vm14, %v5563_v52 }
 0x2c8   : > { %v4976_v24 = vld [vmem:[#allocation3 + $0x168] sm:$0xff]  ;;  %5527 = vst.msk [vmem:[%s8489_s9 + $0x7c] sm:$0xf] %vm4637_vm14, %v5565_v47 }
 0x2c9   : > { %v4985_v22 = vadd.f32 %v8724_v17, %v4976_v24 }
 0x2cb   : > { %v4987_v5 = vmax.f32 %v4985_v22, 0.0 }
 0x2cd   : > { %v5564_v30 = vpack.c.bf16 %v4987_v5, %v4987_v5 }
 0x2cf   : > { %5526 = vst.msk [vmem:[%s8489_s9 + $0x78] sm:$0xf] %vm4637_vm14, %v5564_v30 }
 0x2d0   : > { %6388 = shalt.err (!%p6385_p5)
}
 0x2d1   : > { %s6389_s4 = scalar_lea.hbm %s8776_s26, 2048  ;;  %s6393_s7 = scalar_lea.hbm %s8832_s3, 4096 }
 0x2d2   : > { %p6390_p6 = scmp.ne.s32.totalorder %s8776_s26, %s6389_s4  ;;  %p6394_p10 = scmp.lt.s32.totalorder %s8776_s26, %s8832_s3 }
 0x2d3   : > { %p6395_p11 = scmp.lt.s32.totalorder %s6393_s7, %s6389_s4 }
 0x2d4   : > { %p6391_p7 = pnand %p6390_p6, %p6518_p4 }
 0x2d5   : > { %p6396_p12 = por %p6395_p11, %p6394_p10 }
 0x2d6   : > { %p6392_p9 = pneg %p6391_p7 }
 0x2d8   : > { %p6397_p13 = pnand %p6396_p12, %p6392_p9 }
 0x2da   : > { %6400 = shalt.err (!%p6397_p13)
}
 0x2db   : > { %s6456_s10 = smov 64   ;;  %s6457_s11 = smov 4  }
 0x2dc   : > { %6244 = dma.vmem_to_hbm [thread:$0]  (%p6518_p4), %s8778_s19, 2048, %s8776_s26, %s8784_s27, %s6456_s10, %s6456_s10, %s6457_s11  }
 0x2dd PF: > { %p6250_p0 = scmp.ge.s32.totalorder %s6451_s17, 2  ;;  %s5030_s18 = sand.u32 1, %s6431_s12  }
 0x2de   : > { %s5031_s21 = scalar_lea.sflag [#allocation5], %s5030_s18 }
 0x2df   : > { %p6247_p1 = pnand %p6250_p0, %p6525_p8 }
 0x2e1   : > { %p6248_p2 = pneg %p6247_p1 }
 0x2e3   : > { %6426 = dma.done.wait (%p6248_p2), %s5031_s21, 2048  }
 0x2e4   : > { %6428 = vsyncadd (%p6248_p2), %s5031_s21, 4294965248  ;;  %s16_s17 = sadd.s32 1, %s6451_s17   ;;  %s8986_s12 = smov %s6435_s13 }
 0x2e5   : > { %p13_p3 = scmp.ge.s32.totalorder %s16_s17, 4   ;;  %s8987_s13 = smov %s6439_s14 }
 0x2e6   : > { %s8988_s14 = smov %s6531_s25  ;;  %s8989_s15 = smov %s6447_s16 }
 0x2e7   : > { %s8990_s16 = smov %s8992_s20  ;;  %15 = sbr.rel (!%p13_p3) target bundleno = 4 (0x4), region = 115 }
 0x2ec   :  { %5036 = vsyncpa [#allocation5], 1 }
 0x2ed   :  { %5038 = vsyncpa [#allocation5 + $0x1], 1 }

</bundles_post_ra>
